<compile_context>
chip_gen: v6e
topology: v6e:2x2x1
jax: 0.10.0
libtpu: 0.0.40
codegen_flags: <defaults>
</compile_context>

<pallas_src>
import functools

import numpy as np
import jax
import jax.numpy as jnp
from jax.experimental import pallas as pl
from jax.experimental.pallas import tpu as pltpu

_LN_EPS = 1e-5                       # PyTorch nn.LayerNorm default
_MXU_DTYPE = jnp.float32             # set to jnp.bfloat16 on v5e/v6e/v7x for the fast MXU
                                     # path (weights are pre-cast once in the wrapper);
                                     # demo keeps f32 so the tight reference check holds.


def _pick_vmem_limit():
    # ~75% of physical VMEM, capped at 100 MiB: ≈96 MiB on v5e/v6e, ≈48 MiB on v7x.
    try:
        cap = int(pltpu.get_tpu_info().vmem_capacity_bytes)
    except Exception:
        cap = 64 * 1024 * 1024
    return min(max(cap - cap // 4, 32 * 1024 * 1024), 100 * 1024 * 1024)


_VMEM_LIMIT = _pick_vmem_limit()


def _round_up(n, m):
    return (n + m - 1) // m * m


def _layernorm_f32(x, g, b):
    x = x.astype(jnp.float32)
    mu = jnp.mean(x, axis=-1, keepdims=True)
    var = jnp.mean(jnp.square(x - mu), axis=-1, keepdims=True)
    return (x - mu) * jax.lax.rsqrt(var + _LN_EPS) * g.astype(jnp.float32) + b.astype(jnp.float32)


# ---------------------------------------------------------------------------
# Kernels
# ---------------------------------------------------------------------------
def _ln_qkv_kernel(x_ref, y_ref, g_ref, b_ref, wq_ref, wkv_ref, q_ref, kv_ref):
    g = g_ref[...]
    b = b_ref[...]
    xn = _layernorm_f32(x_ref[...], g, b)
    yn = _layernorm_f32(y_ref[...], g, b)
    q_ref[...] = jnp.dot(xn.astype(_MXU_DTYPE), wq_ref[...],
                         preferred_element_type=jnp.float32).astype(q_ref.dtype)
    kv_ref[...] = jnp.dot(yn.astype(_MXU_DTYPE), wkv_ref[...],
                          preferred_element_type=jnp.float32).astype(kv_ref.dtype)


def _attn_kernel(q_ref, kv_ref, o_ref, *, num_heads, scale):
    # One grid step per batch; all heads handled here; single lane-dense (N, C) write.
    # TODO(synk): for long sequences switch to flash-style KV tiling with online softmax
    #             (the full (N, N) f32 score tile does not fit VMEM at large N).
    C = q_ref.shape[-1]
    D = C // num_heads
    outs = []
    for h in range(num_heads):
        qh = q_ref[:, h * D:(h + 1) * D].astype(jnp.float32) * scale   # scale folded into q
        kh = kv_ref[:, h * D:(h + 1) * D]
        vh = kv_ref[:, C + h * D:C + (h + 1) * D]
        # contract dim 1 of both operands -> no explicit transpose of k
        s = jax.lax.dot_general(qh.astype(_MXU_DTYPE), kh.astype(_MXU_DTYPE),
                                (((1,), (1,)), ((), ())),
                                preferred_element_type=jnp.float32)
        s = s - jnp.max(s, axis=-1, keepdims=True)
        p = jnp.exp(s)
        l = jnp.sum(p, axis=-1, keepdims=True)
        pv = jnp.dot(p.astype(_MXU_DTYPE), vh.astype(_MXU_DTYPE),
                     preferred_element_type=jnp.float32)
        # normalization deferred to the (N, D) PV output (not the (N, N) scores)
        outs.append(pv * pl.reciprocal(l, approx=False))
    o_ref[...] = jnp.concatenate(outs, axis=-1).astype(o_ref.dtype)


def _proj_mlp_kernel(x_ref, a_ref, g2_ref, bln2_ref, wp_ref, bp_ref,
                     w1_ref, b1_ref, w2_ref, b2_ref, o_ref):
    # residual + proj(attn_out), then LN2 + fc1 + GELU + fc2 + residual, fused.
    # TODO(synk): for large C / mlp_ratio, tile the hidden dim as a grid axis (f32 VMEM
    #             accumulator) so w1/w2 don't have to be fully VMEM-resident on v7x.
    x = x_ref[...].astype(jnp.float32)
    proj = jnp.dot(a_ref[...].astype(_MXU_DTYPE), wp_ref[...],
                   preferred_element_type=jnp.float32) + bp_ref[...]
    x = x + proj                                       # residual 1
    xn = _layernorm_f32(x, g2_ref[...], bln2_ref[...])
    h = jnp.dot(xn.astype(_MXU_DTYPE), w1_ref[...],
                preferred_element_type=jnp.float32) + b1_ref[...]
    # exact GELU (matches nn.GELU default): 0.5*x*(1+erf(x/sqrt(2)))
    h = 0.5 * h * (1.0 + jax.lax.erf(h * 0.7071067811865476))
    o = jnp.dot(h.astype(_MXU_DTYPE), w2_ref[...],
                preferred_element_type=jnp.float32) + b2_ref[...]
    o_ref[...] = (x + o).astype(o_ref.dtype)           # residual 2


def _ln_kernel(x_ref, g_ref, b_ref, o_ref):
    o_ref[...] = _layernorm_f32(x_ref[...], g_ref[...], b_ref[...]).astype(o_ref.dtype)


# ---------------------------------------------------------------------------
# pallas_call wrappers
# ---------------------------------------------------------------------------
def _token_call(kernel, token_inputs, const_inputs, out_cols, out_dtype, *,
                tm_eff, flops=0, transcendentals=0):
    """Run `kernel` over row-tiles of token-major 2-D inputs (already padded)."""
    m_pad = token_inputs[0].shape[0]
    in_specs = [pl.BlockSpec((tm_eff, a.shape[1]), lambda i: (i, 0)) for a in token_inputs]
    in_specs += [pl.BlockSpec(c.shape, lambda i: (0, 0)) for c in const_inputs]
    out_specs = tuple(pl.BlockSpec((tm_eff, oc), lambda i: (i, 0)) for oc in out_cols)
    out_shape = tuple(jax.ShapeDtypeStruct((m_pad, oc), out_dtype) for oc in out_cols)

    bytes_accessed = (sum(int(a.size) * a.dtype.itemsize for a in token_inputs)
                      + sum(int(c.size) * c.dtype.itemsize for c in const_inputs)
                      + sum(m_pad * oc for oc in out_cols) * np.dtype(out_dtype).itemsize)
    cost = pl.CostEstimate(flops=int(flops), transcendentals=int(transcendentals),
                           bytes_accessed=int(bytes_accessed))

    out = pl.pallas_call(
        kernel,
        out_shape=out_shape,
        grid_spec=pltpu.PrefetchScalarGridSpec(
            num_scalar_prefetch=0,
            grid=(m_pad // tm_eff,),
            in_specs=in_specs,
            out_specs=out_specs,
        ),
        compiler_params=pltpu.CompilerParams(
            dimension_semantics=("parallel",),
            vmem_limit_bytes=_VMEM_LIMIT,
        ),
        cost_estimate=cost,
    )(*token_inputs, *const_inputs)
    return out if len(out_cols) > 1 else out[0]


def _mha_call(q2d, kv2d, *, B, N, C, num_heads, scale, out_dtype, m_pad):
    """q2d: (m_pad, C), kv2d: (m_pad, 2C) with the real B*N tokens in the first rows.

    Grid is per-batch; all heads are processed inside the kernel; the output block is
    a lane-dense (N, C) row-slab written straight into an (m_pad, C) buffer (rows past
    B*N are never read downstream -- they are sliced off after the final LN).
    """
    H = num_heads
    cost = pl.CostEstimate(
        flops=4 * B * N * N * C,
        transcendentals=B * H * N * N + B * H * N,
        bytes_accessed=int(B * N * (C + 2 * C + C) * np.dtype(out_dtype).itemsize))
    return pl.pallas_call(
        functools.partial(_attn_kernel, num_heads=H, scale=scale),
        out_shape=jax.ShapeDtypeStruct((m_pad, C), out_dtype),
        grid_spec=pltpu.PrefetchScalarGridSpec(
            num_scalar_prefetch=0,
            grid=(B,),
            in_specs=[pl.BlockSpec((N, C), lambda b: (b, 0)),
                      pl.BlockSpec((N, 2 * C), lambda b: (b, 0))],
            out_specs=pl.BlockSpec((N, C), lambda b: (b, 0)),
        ),
        compiler_params=pltpu.CompilerParams(
            dimension_semantics=("parallel",),
            vmem_limit_bytes=_VMEM_LIMIT,
        ),
        cost_estimate=cost,
    )(q2d, kv2d)


@functools.partial(jax.jit, static_argnames=("num_heads", "tm"))
def encoder_forward(x, y, params, *, num_heads, tm=512):
    """x, y: (B, N, C). Returns (B, N, C)."""
    B, N, C = x.shape
    H = num_heads
    D = C // H
    scale = float(D) ** -0.5
    M = B * N
    dt = x.dtype
    hidden = params["blocks"][0]["w1"].shape[1] if params["blocks"] else C

    # Token tile: honor `tm`, keep it a multiple of 8, and try to keep >=2 grid steps
    # per call so v7x's two TensorCores both get work.
    tm_eff = max(8, min(_round_up(tm, 8), _round_up(pl.cdiv(M, 2), 8)))
    m_pad = _round_up(M, tm_eff)

    # Padding hoisted out of the depth loop (done once; sliced off once at the end).
    x2d = x.reshape(M, C)
    y2d = y.reshape(M, C)
    if m_pad != M:
        pad = ((0, m_pad - M), (0, 0))
        x2d = jnp.pad(x2d, pad)
        y2d = jnp.pad(y2d, pad)

    for blk in params["blocks"]:
        # Pre-cast MXU-operand weights once (no per-grid-step astype; halves weight DMA
        # when _MXU_DTYPE is bf16). Biases / LN params stay f32.
        wq = blk["wq"].astype(_MXU_DTYPE)
        wkv = blk["wkv"].astype(_MXU_DTYPE)
        wproj = blk["wproj"].astype(_MXU_DTYPE)
        w1 = blk["w1"].astype(_MXU_DTYPE)
        w2 = blk["w2"].astype(_MXU_DTYPE)

        # --- norm1 fused into q and kv projections (one call, two outputs) ---
        q2d, kv2d = _token_call(
            _ln_qkv_kernel, [x2d, y2d],
            [blk["norm1_g"], blk["norm1_b"], wq, wkv],
            [C, 2 * C], dt, tm_eff=tm_eff,
            flops=2 * m_pad * C * (3 * C),
            transcendentals=2 * m_pad)                     # 2 rsqrt per token

        # --- cross attention (per-batch grid, heads handled in-kernel) ---
        attn2d = _mha_call(q2d, kv2d, B=B, N=N, C=C, num_heads=H, scale=scale,
                           out_dtype=dt, m_pad=m_pad)

        # --- proj + residual + norm2 + Mlp + residual, fully fused ---
        x2d = _token_call(
            _proj_mlp_kernel, [x2d, attn2d],
            [blk["norm2_g"], blk["norm2_b"], wproj, blk["bproj"],
             w1, blk["b1"], w2, blk["b2"]],
            [C], dt, tm_eff=tm_eff,
            flops=2 * m_pad * (C * C + 2 * C * hidden),
            transcendentals=m_pad * (hidden + 1))          # erf per hidden unit + rsqrt

    # --- final LayerNorm ---
    x2d = _token_call(_ln_kernel, [x2d], [params["norm_g"], params["norm_b"]],
                      [C], dt, tm_eff=tm_eff,
                      flops=10 * m_pad * C, transcendentals=m_pad)

    if m_pad != M:
        x2d = x2d[:M]
    return x2d.reshape(B, N, C)


# ---------------------------------------------------------------------------
# Parameter construction + plain-JAX reference
# ---------------------------------------------------------------------------
def _linear_init(key, fan_in, fan_out, dtype=jnp.float32, bias=True):
    kw, kb = jax.random.split(key)
    bound = float(fan_in) ** -0.5
    w = jax.random.uniform(kw, (fan_in, fan_out), dtype, -bound, bound)
    b = (jax.random.uniform(kb, (1, fan_out), dtype, -bound, bound)
         if bias else jnp.zeros((1, fan_out), dtype))
    return w, b


def _make_params(key, C, depth, mlp_ratio, dtype=jnp.float32):
    hidden = int(C * mlp_ratio)
    blocks = []
    keys = jax.random.split(key, depth + 1)
    for d in range(depth):
        ks = jax.random.split(keys[d], 9)
        wq, bq = _linear_init(ks[0], C, C, dtype, bias=False)       # qkv_bias=False
        wkv, bkv = _linear_init(ks[1], C, 2 * C, dtype, bias=False)
        wproj, bproj = _linear_init(ks[2], C, C, dtype, bias=True)
        w1, b1 = _linear_init(ks[3], C, hidden, dtype, bias=True)
        w2, b2 = _linear_init(ks[4], hidden, C, dtype, bias=True)
        blocks.append(dict(
            norm1_g=1.0 + 0.1 * jax.random.normal(ks[5], (1, C), dtype),
            norm1_b=0.1 * jax.random.normal(ks[6], (1, C), dtype),
            norm2_g=1.0 + 0.1 * jax.random.normal(ks[7], (1, C), dtype),
            norm2_b=0.1 * jax.random.normal(ks[8], (1, C), dtype),
            wq=wq, bq=bq, wkv=wkv, bkv=bkv, wproj=wproj, bproj=bproj,
            w1=w1, b1=b1, w2=w2, b2=b2))
    kn = jax.random.split(keys[depth], 2)
    return dict(
        blocks=blocks,
        norm_g=1.0 + 0.1 * jax.random.normal(kn[0], (1, C), dtype),
        norm_b=0.1 * jax.random.normal(kn[1], (1, C), dtype))


def _ln_ref(x, g, b):
    mu = x.mean(-1, keepdims=True)
    var = ((x - mu) ** 2).mean(-1, keepdims=True)
    return (x - mu) / jnp.sqrt(var + _LN_EPS) * g + b


def encoder_ref(x, y, params, num_heads):
    B, N, C = x.shape
    H = num_heads
    D = C // H
    scale = float(D) ** -0.5
    for blk in params["blocks"]:
        xn = _ln_ref(x, blk["norm1_g"], blk["norm1_b"])
        yn = _ln_ref(y, blk["norm1_g"], blk["norm1_b"])
        q = (xn @ blk["wq"]).reshape(B, N, H, D).transpose(0, 2, 1, 3)
        kv = yn @ blk["wkv"]
        k = kv[..., :C].reshape(B, N, H, D).transpose(0, 2, 1, 3)
        v = kv[..., C:].reshape(B, N, H, D).transpose(0, 2, 1, 3)
        attn = jax.nn.softmax(jnp.einsum("bhnd,bhmd->bhnm", q, k) * scale, axis=-1)
        o = jnp.einsum("bhnm,bhmd->bhnd", attn, v).transpose(0, 2, 1, 3).reshape(B, N, C)
        x = x + (o @ blk["wproj"] + blk["bproj"])
        xn2 = _ln_ref(x, blk["norm2_g"], blk["norm2_b"])
        h = xn2 @ blk["w1"] + blk["b1"]
        h = 0.5 * h * (1.0 + jax.lax.erf(h / jnp.sqrt(2.0)))
        x = x + (h @ blk["w2"] + blk["b2"])
    return _ln_ref(x, params["norm_g"], params["norm_b"])


if __name__ == "__main__":
    # Small encoder-like shapes: batch=2, seq=8, embed_dim=128, heads=4, depth=2, mlp_ratio=2
    B, N, C = 2, 8, 128
    num_heads, depth, mlp_ratio = 4, 2, 2.0

    key = jax.random.PRNGKey(0)
    kx, ky, kp = jax.random.split(key, 3)
    x = jax.random.normal(kx, (B, N, C), jnp.float32)
    y = jax.random.normal(ky, (B, N, C), jnp.float32)
    params = _make_params(kp, C, depth, mlp_ratio)

    out = encoder_forward(x, y, params, num_heads=num_heads)
    jax.block_until_ready(out)

    ref = encoder_ref(x, y, params, num_heads)
    assert out.shape == (B, N, C)
    assert jnp.allclose(out, ref, atol=2e-4, rtol=2e-4), (
        f"mismatch vs reference, max abs diff = {jnp.max(jnp.abs(out - ref))}")

    print("KERNEL_OK")
</pallas_src>

<mosaic_0001>
module attributes {stable_mosaic.version = 11 : i64} {
  func.func @_attn_kernel(%arg0: i32, %arg1: memref<8x128xf32, #tpu.memory_space<vmem>>, %arg2: memref<8x256xf32, #tpu.memory_space<vmem>>, %arg3: memref<8x128xf32, #tpu.memory_space<vmem>>) attributes {dimension_semantics = [#tpu.dimension_semantics<parallel>], iteration_bounds = array<i64: 2>, scalar_prefetch = 0 : i64, scratch_operands = 0 : i64, tpu.core_type = #tpu.core_type<tc>, window_params = [{transform_indices = @transform_0, window_bounds = array<i64: 8, 128>}, {transform_indices = @transform_1, window_bounds = array<i64: 8, 256>}, {transform_indices = @transform_2, window_bounds = array<i64: 8, 128>}]} {
    %c0 = arith.constant 0 : index
    %c0_0 = arith.constant 0 : index
    %0 = vector.load %arg1[%c0, %c0_0] : memref<8x128xf32, #tpu.memory_space<vmem>>, vector<8x32xf32>
    %cst = arith.constant 0.176776692 : f32
    %1 = vector.broadcast %cst : f32 to vector<8x32xf32>
    %2 = arith.mulf %0, %1 : vector<8x32xf32>
    %c0_1 = arith.constant 0 : index
    %c0_2 = arith.constant 0 : index
    %3 = vector.load %arg2[%c0_1, %c0_2] : memref<8x256xf32, #tpu.memory_space<vmem>>, vector<8x32xf32>
    %c0_3 = arith.constant 0 : index
    %c128 = arith.constant 128 : index
    %4 = vector.load %arg2[%c0_3, %c128] : memref<8x256xf32, #tpu.memory_space<vmem>>, vector<8x32xf32>
    %cst_4 = arith.constant dense<0.000000e+00> : vector<8x8xf32>
    %5 = tpu.matmul %2, %3, %cst_4 {dimension_numbers = #tpu.dot_dimension_numbers<[1], [1], [0], [0], [0, 0, 1, 0], [], []>} : vector<8x32xf32>, vector<8x32xf32>, vector<8x8xf32> -> vector<8x8xf32>
    %cst_5 = arith.constant dense<0xFF800000> : vector<8xf32>
    %6 = vector.multi_reduction <maximumf>, %5, %cst_5 [1] : vector<8x8xf32> to vector<8xf32>
    %7 = vector.shape_cast %6 : vector<8xf32> to vector<8x1xf32>
    %8 = vector.broadcast %7 : vector<8x1xf32> to vector<8x8xf32>
    %9 = arith.subf %5, %8 : vector<8x8xf32>
    %10 = math.exp %9 : vector<8x8xf32>
    %cst_6 = arith.constant dense<0.000000e+00> : vector<8xf32>
    %11 = vector.multi_reduction <add>, %10, %cst_6 [1] : vector<8x8xf32> to vector<8xf32>
    %12 = vector.shape_cast %11 : vector<8xf32> to vector<8x1xf32>
    %cst_7 = arith.constant dense<0.000000e+00> : vector<8x32xf32>
    %13 = tpu.matmul %10, %4, %cst_7 {dimension_numbers = #tpu.dot_dimension_numbers<[1], [0], [0], [1], [0, 0, 1, 1], [], []>} : vector<8x8xf32>, vector<8x32xf32>, vector<8x32xf32> -> vector<8x32xf32>
    %14 = tpu.reciprocal %12 : vector<8x1xf32> -> vector<8x1xf32>
    %15 = vector.broadcast %14 : vector<8x1xf32> to vector<8x32xf32>
    %16 = arith.mulf %13, %15 : vector<8x32xf32>
    %c0_8 = arith.constant 0 : index
    %c32 = arith.constant 32 : index
    %17 = vector.load %arg1[%c0_8, %c32] : memref<8x128xf32, #tpu.memory_space<vmem>>, vector<8x32xf32>
    %cst_9 = arith.constant 0.176776692 : f32
    %18 = vector.broadcast %cst_9 : f32 to vector<8x32xf32>
    %19 = arith.mulf %17, %18 : vector<8x32xf32>
    %c0_10 = arith.constant 0 : index
    %c32_11 = arith.constant 32 : index
    %20 = vector.load %arg2[%c0_10, %c32_11] : memref<8x256xf32, #tpu.memory_space<vmem>>, vector<8x32xf32>
    %c0_12 = arith.constant 0 : index
    %c160 = arith.constant 160 : index
    %21 = vector.load %arg2[%c0_12, %c160] : memref<8x256xf32, #tpu.memory_space<vmem>>, vector<8x32xf32>
    %cst_13 = arith.constant dense<0.000000e+00> : vector<8x8xf32>
    %22 = tpu.matmul %19, %20, %cst_13 {dimension_numbers = #tpu.dot_dimension_numbers<[1], [1], [0], [0], [0, 0, 1, 0], [], []>} : vector<8x32xf32>, vector<8x32xf32>, vector<8x8xf32> -> vector<8x8xf32>
    %cst_14 = arith.constant dense<0xFF800000> : vector<8xf32>
    %23 = vector.multi_reduction <maximumf>, %22, %cst_14 [1] : vector<8x8xf32> to vector<8xf32>
    %24 = vector.shape_cast %23 : vector<8xf32> to vector<8x1xf32>
    %25 = vector.broadcast %24 : vector<8x1xf32> to vector<8x8xf32>
    %26 = arith.subf %22, %25 : vector<8x8xf32>
    %27 = math.exp %26 : vector<8x8xf32>
    %cst_15 = arith.constant dense<0.000000e+00> : vector<8xf32>
    %28 = vector.multi_reduction <add>, %27, %cst_15 [1] : vector<8x8xf32> to vector<8xf32>
    %29 = vector.shape_cast %28 : vector<8xf32> to vector<8x1xf32>
    %cst_16 = arith.constant dense<0.000000e+00> : vector<8x32xf32>
    %30 = tpu.matmul %27, %21, %cst_16 {dimension_numbers = #tpu.dot_dimension_numbers<[1], [0], [0], [1], [0, 0, 1, 1], [], []>} : vector<8x8xf32>, vector<8x32xf32>, vector<8x32xf32> -> vector<8x32xf32>
    %31 = tpu.reciprocal %29 : vector<8x1xf32> -> vector<8x1xf32>
    %32 = vector.broadcast %31 : vector<8x1xf32> to vector<8x32xf32>
    %33 = arith.mulf %30, %32 : vector<8x32xf32>
    %c0_17 = arith.constant 0 : index
    %c64 = arith.constant 64 : index
    %34 = vector.load %arg1[%c0_17, %c64] : memref<8x128xf32, #tpu.memory_space<vmem>>, vector<8x32xf32>
    %cst_18 = arith.constant 0.176776692 : f32
    %35 = vector.broadcast %cst_18 : f32 to vector<8x32xf32>
    %36 = arith.mulf %34, %35 : vector<8x32xf32>
    %c0_19 = arith.constant 0 : index
    %c64_20 = arith.constant 64 : index
    %37 = vector.load %arg2[%c0_19, %c64_20] : memref<8x256xf32, #tpu.memory_space<vmem>>, vector<8x32xf32>
    %c0_21 = arith.constant 0 : index
    %c192 = arith.constant 192 : index
    %38 = vector.load %arg2[%c0_21, %c192] : memref<8x256xf32, #tpu.memory_space<vmem>>, vector<8x32xf32>
    %cst_22 = arith.constant dense<0.000000e+00> : vector<8x8xf32>
    %39 = tpu.matmul %36, %37, %cst_22 {dimension_numbers = #tpu.dot_dimension_numbers<[1], [1], [0], [0], [0, 0, 1, 0], [], []>} : vector<8x32xf32>, vector<8x32xf32>, vector<8x8xf32> -> vector<8x8xf32>
    %cst_23 = arith.constant dense<0xFF800000> : vector<8xf32>
    %40 = vector.multi_reduction <maximumf>, %39, %cst_23 [1] : vector<8x8xf32> to vector<8xf32>
    %41 = vector.shape_cast %40 : vector<8xf32> to vector<8x1xf32>
    %42 = vector.broadcast %41 : vector<8x1xf32> to vector<8x8xf32>
    %43 = arith.subf %39, %42 : vector<8x8xf32>
    %44 = math.exp %43 : vector<8x8xf32>
    %cst_24 = arith.constant dense<0.000000e+00> : vector<8xf32>
    %45 = vector.multi_reduction <add>, %44, %cst_24 [1] : vector<8x8xf32> to vector<8xf32>
    %46 = vector.shape_cast %45 : vector<8xf32> to vector<8x1xf32>
    %cst_25 = arith.constant dense<0.000000e+00> : vector<8x32xf32>
    %47 = tpu.matmul %44, %38, %cst_25 {dimension_numbers = #tpu.dot_dimension_numbers<[1], [0], [0], [1], [0, 0, 1, 1], [], []>} : vector<8x8xf32>, vector<8x32xf32>, vector<8x32xf32> -> vector<8x32xf32>
    %48 = tpu.reciprocal %46 : vector<8x1xf32> -> vector<8x1xf32>
    %49 = vector.broadcast %48 : vector<8x1xf32> to vector<8x32xf32>
    %50 = arith.mulf %47, %49 : vector<8x32xf32>
    %c0_26 = arith.constant 0 : index
    %c96 = arith.constant 96 : index
    %51 = vector.load %arg1[%c0_26, %c96] : memref<8x128xf32, #tpu.memory_space<vmem>>, vector<8x32xf32>
    %cst_27 = arith.constant 0.176776692 : f32
    %52 = vector.broadcast %cst_27 : f32 to vector<8x32xf32>
    %53 = arith.mulf %51, %52 : vector<8x32xf32>
    %c0_28 = arith.constant 0 : index
    %c96_29 = arith.constant 96 : index
    %54 = vector.load %arg2[%c0_28, %c96_29] : memref<8x256xf32, #tpu.memory_space<vmem>>, vector<8x32xf32>
    %c0_30 = arith.constant 0 : index
    %c224 = arith.constant 224 : index
    %55 = vector.load %arg2[%c0_30, %c224] : memref<8x256xf32, #tpu.memory_space<vmem>>, vector<8x32xf32>
    %cst_31 = arith.constant dense<0.000000e+00> : vector<8x8xf32>
    %56 = tpu.matmul %53, %54, %cst_31 {dimension_numbers = #tpu.dot_dimension_numbers<[1], [1], [0], [0], [0, 0, 1, 0], [], []>} : vector<8x32xf32>, vector<8x32xf32>, vector<8x8xf32> -> vector<8x8xf32>
    %cst_32 = arith.constant dense<0xFF800000> : vector<8xf32>
    %57 = vector.multi_reduction <maximumf>, %56, %cst_32 [1] : vector<8x8xf32> to vector<8xf32>
    %58 = vector.shape_cast %57 : vector<8xf32> to vector<8x1xf32>
    %59 = vector.broadcast %58 : vector<8x1xf32> to vector<8x8xf32>
    %60 = arith.subf %56, %59 : vector<8x8xf32>
    %61 = math.exp %60 : vector<8x8xf32>
    %cst_33 = arith.constant dense<0.000000e+00> : vector<8xf32>
    %62 = vector.multi_reduction <add>, %61, %cst_33 [1] : vector<8x8xf32> to vector<8xf32>
    %63 = vector.shape_cast %62 : vector<8xf32> to vector<8x1xf32>
    %cst_34 = arith.constant dense<0.000000e+00> : vector<8x32xf32>
    %64 = tpu.matmul %61, %55, %cst_34 {dimension_numbers = #tpu.dot_dimension_numbers<[1], [0], [0], [1], [0, 0, 1, 1], [], []>} : vector<8x8xf32>, vector<8x32xf32>, vector<8x32xf32> -> vector<8x32xf32>
    %65 = tpu.reciprocal %63 : vector<8x1xf32> -> vector<8x1xf32>
    %66 = vector.broadcast %65 : vector<8x1xf32> to vector<8x32xf32>
    %67 = arith.mulf %64, %66 : vector<8x32xf32>
    %68 = tpu.concatenate %16, %33, %50, %67 in 1 : vector<8x32xf32>, vector<8x32xf32>, vector<8x32xf32>, vector<8x32xf32> -> vector<8x128xf32>
    %c0_35 = arith.constant 0 : index
    %c0_36 = arith.constant 0 : index
    %69 = vector.load %arg3[%c0_35, %c0_36] : memref<8x128xf32, #tpu.memory_space<vmem>>, vector<8x128xf32>
    tpu.vector_store %arg3[%c0_35, %c0_36], %68 {strides = array<i32>} : memref<8x128xf32, #tpu.memory_space<vmem>>, vector<8x128xf32>,
    return
  }
  func.func @transform_0(%arg0: i32) -> (i32, i32) {
    %c0_i32 = arith.constant 0 : i32
    %c0_i32_0 = arith.constant 0 : i32
    return %arg0, %c0_i32 : i32, i32
  }
  func.func @transform_1(%arg0: i32) -> (i32, i32) {
    %c0_i32 = arith.constant 0 : i32
    %c0_i32_0 = arith.constant 0 : i32
    return %arg0, %c0_i32 : i32, i32
  }
  func.func @transform_2(%arg0: i32) -> (i32, i32) {
    %c0_i32 = arith.constant 0 : i32
    %c0_i32_0 = arith.constant 0 : i32
    return %arg0, %c0_i32 : i32, i32
  }
}

module attributes {stable_mosaic.version = 11 : i64} {
  func.func @_ln_qkv_kernel(%arg0: i32, %arg1: memref<8x128xf32, #tpu.memory_space<vmem>>, %arg2: memref<8x128xf32, #tpu.memory_space<vmem>>, %arg3: memref<1x128xf32, #tpu.memory_space<vmem>>, %arg4: memref<1x128xf32, #tpu.memory_space<vmem>>, %arg5: memref<128x128xf32, #tpu.memory_space<vmem>>, %arg6: memref<128x256xf32, #tpu.memory_space<vmem>>, %arg7: memref<8x128xf32, #tpu.memory_space<vmem>>, %arg8: memref<8x256xf32, #tpu.memory_space<vmem>>) attributes {dimension_semantics = [#tpu.dimension_semantics<parallel>], iteration_bounds = array<i64: 2>, scalar_prefetch = 0 : i64, scratch_operands = 0 : i64, tpu.core_type = #tpu.core_type<tc>, window_params = [{transform_indices = @transform_0, window_bounds = array<i64: 8, 128>}, {transform_indices = @transform_1, window_bounds = array<i64: 8, 128>}, {pipeline_mode = #tpu.pipeline_mode<synchronous>, transform_indices = @transform_2, window_bounds = array<i64: 1, 128>}, {pipeline_mode = #tpu.pipeline_mode<synchronous>, transform_indices = @transform_3, window_bounds = array<i64: 1, 128>}, {pipeline_mode = #tpu.pipeline_mode<synchronous>, transform_indices = @transform_4, window_bounds = array<i64: 128, 128>}, {pipeline_mode = #tpu.pipeline_mode<synchronous>, transform_indices = @transform_5, window_bounds = array<i64: 128, 256>}, {transform_indices = @transform_6, window_bounds = array<i64: 8, 128>}, {transform_indices = @transform_7, window_bounds = array<i64: 8, 256>}]} {
    %c0 = arith.constant 0 : index
    %c0_0 = arith.constant 0 : index
    %0 = vector.load %arg3[%c0, %c0_0] : memref<1x128xf32, #tpu.memory_space<vmem>>, vector<1x128xf32>
    %c0_1 = arith.constant 0 : index
    %c0_2 = arith.constant 0 : index
    %1 = vector.load %arg4[%c0_1, %c0_2] : memref<1x128xf32, #tpu.memory_space<vmem>>, vector<1x128xf32>
    %c0_3 = arith.constant 0 : index
    %c0_4 = arith.constant 0 : index
    %2 = vector.load %arg1[%c0_3, %c0_4] : memref<8x128xf32, #tpu.memory_space<vmem>>, vector<8x128xf32>
    %cst = arith.constant dense<0.000000e+00> : vector<8xf32>
    %3 = vector.multi_reduction <add>, %2, %cst [1] : vector<8x128xf32> to vector<8xf32>
    %4 = vector.shape_cast %3 : vector<8xf32> to vector<8x1xf32>
    %cst_5 = arith.constant 1.280000e+02 : f32
    %5 = vector.broadcast %cst_5 : f32 to vector<8x1xf32>
    %6 = arith.divf %4, %5 : vector<8x1xf32>
    %7 = vector.broadcast %6 : vector<8x1xf32> to vector<8x128xf32>
    %8 = arith.subf %2, %7 : vector<8x128xf32>
    %9 = arith.mulf %8, %8 : vector<8x128xf32>
    %cst_6 = arith.constant dense<0.000000e+00> : vector<8xf32>
    %10 = vector.multi_reduction <add>, %9, %cst_6 [1] : vector<8x128xf32> to vector<8xf32>
    %11 = vector.shape_cast %10 : vector<8xf32> to vector<8x1xf32>
    %cst_7 = arith.constant 1.280000e+02 : f32
    %12 = vector.broadcast %cst_7 : f32 to vector<8x1xf32>
    %13 = arith.divf %11, %12 : vector<8x1xf32>
    %14 = vector.broadcast %6 : vector<8x1xf32> to vector<8x128xf32>
    %15 = arith.subf %2, %14 : vector<8x128xf32>
    %cst_8 = arith.constant 9.99999974E-6 : f32
    %16 = vector.broadcast %cst_8 : f32 to vector<8x1xf32>
    %17 = arith.addf %13, %16 : vector<8x1xf32>
    %18 = math.rsqrt %17 : vector<8x1xf32>
    %19 = vector.broadcast %18 : vector<8x1xf32> to vector<8x128xf32>
    %20 = arith.mulf %15, %19 : vector<8x128xf32>
    %21 = vector.broadcast %0 : vector<1x128xf32> to vector<8x128xf32>
    %22 = arith.mulf %20, %21 : vector<8x128xf32>
    %23 = vector.broadcast %1 : vector<1x128xf32> to vector<8x128xf32>
    %24 = arith.addf %22, %23 : vector<8x128xf32>
    %c0_9 = arith.constant 0 : index
    %c0_10 = arith.constant 0 : index
    %25 = vector.load %arg2[%c0_9, %c0_10] : memref<8x128xf32, #tpu.memory_space<vmem>>, vector<8x128xf32>
    %cst_11 = arith.constant dense<0.000000e+00> : vector<8xf32>
    %26 = vector.multi_reduction <add>, %25, %cst_11 [1] : vector<8x128xf32> to vector<8xf32>
    %27 = vector.shape_cast %26 : vector<8xf32> to vector<8x1xf32>
    %cst_12 = arith.constant 1.280000e+02 : f32
    %28 = vector.broadcast %cst_12 : f32 to vector<8x1xf32>
    %29 = arith.divf %27, %28 : vector<8x1xf32>
    %30 = vector.broadcast %29 : vector<8x1xf32> to vector<8x128xf32>
    %31 = arith.subf %25, %30 : vector<8x128xf32>
    %32 = arith.mulf %31, %31 : vector<8x128xf32>
    %cst_13 = arith.constant dense<0.000000e+00> : vector<8xf32>
    %33 = vector.multi_reduction <add>, %32, %cst_13 [1] : vector<8x128xf32> to vector<8xf32>
    %34 = vector.shape_cast %33 : vector<8xf32> to vector<8x1xf32>
    %cst_14 = arith.constant 1.280000e+02 : f32
    %35 = vector.broadcast %cst_14 : f32 to vector<8x1xf32>
    %36 = arith.divf %34, %35 : vector<8x1xf32>
    %37 = vector.broadcast %29 : vector<8x1xf32> to vector<8x128xf32>
    %38 = arith.subf %25, %37 : vector<8x128xf32>
    %cst_15 = arith.constant 9.99999974E-6 : f32
    %39 = vector.broadcast %cst_15 : f32 to vector<8x1xf32>
    %40 = arith.addf %36, %39 : vector<8x1xf32>
    %41 = math.rsqrt %40 : vector<8x1xf32>
    %42 = vector.broadcast %41 : vector<8x1xf32> to vector<8x128xf32>
    %43 = arith.mulf %38, %42 : vector<8x128xf32>
    %44 = vector.broadcast %0 : vector<1x128xf32> to vector<8x128xf32>
    %45 = arith.mulf %43, %44 : vector<8x128xf32>
    %46 = vector.broadcast %1 : vector<1x128xf32> to vector<8x128xf32>
    %47 = arith.addf %45, %46 : vector<8x128xf32>
    %c0_16 = arith.constant 0 : index
    %c0_17 = arith.constant 0 : index
    %48 = vector.load %arg5[%c0_16, %c0_17] : memref<128x128xf32, #tpu.memory_space<vmem>>, vector<128x128xf32>
    %cst_18 = arith.constant dense<0.000000e+00> : vector<8x128xf32>
    %49 = tpu.matmul %24, %48, %cst_18 {dimension_numbers = #tpu.dot_dimension_numbers<[1], [0], [0], [1], [0, 0, 1, 1], [], []>} : vector<8x128xf32>, vector<128x128xf32>, vector<8x128xf32> -> vector<8x128xf32>
    %c0_19 = arith.constant 0 : index
    %c0_20 = arith.constant 0 : index
    %50 = vector.load %arg7[%c0_19, %c0_20] : memref<8x128xf32, #tpu.memory_space<vmem>>, vector<8x128xf32>
    tpu.vector_store %arg7[%c0_19, %c0_20], %49 {strides = array<i32>} : memref<8x128xf32, #tpu.memory_space<vmem>>, vector<8x128xf32>,
    %c0_21 = arith.constant 0 : index
    %c0_22 = arith.constant 0 : index
    %51 = vector.load %arg6[%c0_21, %c0_22] : memref<128x256xf32, #tpu.memory_space<vmem>>, vector<128x256xf32>
    %cst_23 = arith.constant dense<0.000000e+00> : vector<8x256xf32>
    %52 = tpu.matmul %47, %51, %cst_23 {dimension_numbers = #tpu.dot_dimension_numbers<[1], [0], [0], [1], [0, 0, 1, 1], [], []>} : vector<8x128xf32>, vector<128x256xf32>, vector<8x256xf32> -> vector<8x256xf32>
    %c0_24 = arith.constant 0 : index
    %c0_25 = arith.constant 0 : index
    %53 = vector.load %arg8[%c0_24, %c0_25] : memref<8x256xf32, #tpu.memory_space<vmem>>, vector<8x256xf32>
    tpu.vector_store %arg8[%c0_24, %c0_25], %52 {strides = array<i32>} : memref<8x256xf32, #tpu.memory_space<vmem>>, vector<8x256xf32>,
    return
  }
  func.func @transform_0(%arg0: i32) -> (i32, i32) {
    %c0_i32 = arith.constant 0 : i32
    %c0_i32_0 = arith.constant 0 : i32
    return %arg0, %c0_i32 : i32, i32
  }
  func.func @transform_1(%arg0: i32) -> (i32, i32) {
    %c0_i32 = arith.constant 0 : i32
    %c0_i32_0 = arith.constant 0 : i32
    return %arg0, %c0_i32 : i32, i32
  }
  func.func @transform_2(%arg0: i32) -> (i32, i32) {
    %c0_i32 = arith.constant 0 : i32
    %c0_i32_0 = arith.constant 0 : i32
    %c0_i32_1 = arith.constant 0 : i32
    return %c0_i32, %c0_i32_0 : i32, i32
  }
  func.func @transform_3(%arg0: i32) -> (i32, i32) {
    %c0_i32 = arith.constant 0 : i32
    %c0_i32_0 = arith.constant 0 : i32
    %c0_i32_1 = arith.constant 0 : i32
    return %c0_i32, %c0_i32_0 : i32, i32
  }
  func.func @transform_4(%arg0: i32) -> (i32, i32) {
    %c0_i32 = arith.constant 0 : i32
    %c0_i32_0 = arith.constant 0 : i32
    %c0_i32_1 = arith.constant 0 : i32
    return %c0_i32, %c0_i32_0 : i32, i32
  }
  func.func @transform_5(%arg0: i32) -> (i32, i32) {
    %c0_i32 = arith.constant 0 : i32
    %c0_i32_0 = arith.constant 0 : i32
    %c0_i32_1 = arith.constant 0 : i32
    return %c0_i32, %c0_i32_0 : i32, i32
  }
  func.func @transform_6(%arg0: i32) -> (i32, i32) {
    %c0_i32 = arith.constant 0 : i32
    %c0_i32_0 = arith.constant 0 : i32
    return %arg0, %c0_i32 : i32, i32
  }
  func.func @transform_7(%arg0: i32) -> (i32, i32) {
    %c0_i32 = arith.constant 0 : i32
    %c0_i32_0 = arith.constant 0 : i32
    return %arg0, %c0_i32 : i32, i32
  }
}

module attributes {stable_mosaic.version = 11 : i64} {
  func.func @_ln_qkv_kernel(%arg0: i32, %arg1: memref<8x128xf32, #tpu.memory_space<vmem>>, %arg2: memref<8x128xf32, #tpu.memory_space<vmem>>, %arg3: memref<1x128xf32, #tpu.memory_space<vmem>>, %arg4: memref<1x128xf32, #tpu.memory_space<vmem>>, %arg5: memref<128x128xf32, #tpu.memory_space<vmem>>, %arg6: memref<128x256xf32, #tpu.memory_space<vmem>>, %arg7: memref<8x128xf32, #tpu.memory_space<vmem>>, %arg8: memref<8x256xf32, #tpu.memory_space<vmem>>) attributes {dimension_semantics = [#tpu.dimension_semantics<parallel>], iteration_bounds = array<i64: 2>, scalar_prefetch = 0 : i64, scratch_operands = 0 : i64, tpu.core_type = #tpu.core_type<tc>, window_params = [{transform_indices = @transform_0, window_bounds = array<i64: 8, 128>}, {transform_indices = @transform_1, window_bounds = array<i64: 8, 128>}, {pipeline_mode = #tpu.pipeline_mode<synchronous>, transform_indices = @transform_2, window_bounds = array<i64: 1, 128>}, {pipeline_mode = #tpu.pipeline_mode<synchronous>, transform_indices = @transform_3, window_bounds = array<i64: 1, 128>}, {pipeline_mode = #tpu.pipeline_mode<synchronous>, transform_indices = @transform_4, window_bounds = array<i64: 128, 128>}, {pipeline_mode = #tpu.pipeline_mode<synchronous>, transform_indices = @transform_5, window_bounds = array<i64: 128, 256>}, {transform_indices = @transform_6, window_bounds = array<i64: 8, 128>}, {transform_indices = @transform_7, window_bounds = array<i64: 8, 256>}]} {
    %c0 = arith.constant 0 : index
    %c0_0 = arith.constant 0 : index
    %0 = vector.load %arg3[%c0, %c0_0] : memref<1x128xf32, #tpu.memory_space<vmem>>, vector<1x128xf32>
    %c0_1 = arith.constant 0 : index
    %c0_2 = arith.constant 0 : index
    %1 = vector.load %arg4[%c0_1, %c0_2] : memref<1x128xf32, #tpu.memory_space<vmem>>, vector<1x128xf32>
    %c0_3 = arith.constant 0 : index
    %c0_4 = arith.constant 0 : index
    %2 = vector.load %arg1[%c0_3, %c0_4] : memref<8x128xf32, #tpu.memory_space<vmem>>, vector<8x128xf32>
    %cst = arith.constant dense<0.000000e+00> : vector<8xf32>
    %3 = vector.multi_reduction <add>, %2, %cst [1] : vector<8x128xf32> to vector<8xf32>
    %4 = vector.shape_cast %3 : vector<8xf32> to vector<8x1xf32>
    %cst_5 = arith.constant 1.280000e+02 : f32
    %5 = vector.broadcast %cst_5 : f32 to vector<8x1xf32>
    %6 = arith.divf %4, %5 : vector<8x1xf32>
    %7 = vector.broadcast %6 : vector<8x1xf32> to vector<8x128xf32>
    %8 = arith.subf %2, %7 : vector<8x128xf32>
    %9 = arith.mulf %8, %8 : vector<8x128xf32>
    %cst_6 = arith.constant dense<0.000000e+00> : vector<8xf32>
    %10 = vector.multi_reduction <add>, %9, %cst_6 [1] : vector<8x128xf32> to vector<8xf32>
    %11 = vector.shape_cast %10 : vector<8xf32> to vector<8x1xf32>
    %cst_7 = arith.constant 1.280000e+02 : f32
    %12 = vector.broadcast %cst_7 : f32 to vector<8x1xf32>
    %13 = arith.divf %11, %12 : vector<8x1xf32>
    %14 = vector.broadcast %6 : vector<8x1xf32> to vector<8x128xf32>
    %15 = arith.subf %2, %14 : vector<8x128xf32>
    %cst_8 = arith.constant 9.99999974E-6 : f32
    %16 = vector.broadcast %cst_8 : f32 to vector<8x1xf32>
    %17 = arith.addf %13, %16 : vector<8x1xf32>
    %18 = math.rsqrt %17 : vector<8x1xf32>
    %19 = vector.broadcast %18 : vector<8x1xf32> to vector<8x128xf32>
    %20 = arith.mulf %15, %19 : vector<8x128xf32>
    %21 = vector.broadcast %0 : vector<1x128xf32> to vector<8x128xf32>
    %22 = arith.mulf %20, %21 : vector<8x128xf32>
    %23 = vector.broadcast %1 : vector<1x128xf32> to vector<8x128xf32>
    %24 = arith.addf %22, %23 : vector<8x128xf32>
    %c0_9 = arith.constant 0 : index
    %c0_10 = arith.constant 0 : index
    %25 = vector.load %arg2[%c0_9, %c0_10] : memref<8x128xf32, #tpu.memory_space<vmem>>, vector<8x128xf32>
    %cst_11 = arith.constant dense<0.000000e+00> : vector<8xf32>
    %26 = vector.multi_reduction <add>, %25, %cst_11 [1] : vector<8x128xf32> to vector<8xf32>
    %27 = vector.shape_cast %26 : vector<8xf32> to vector<8x1xf32>
    %cst_12 = arith.constant 1.280000e+02 : f32
    %28 = vector.broadcast %cst_12 : f32 to vector<8x1xf32>
    %29 = arith.divf %27, %28 : vector<8x1xf32>
    %30 = vector.broadcast %29 : vector<8x1xf32> to vector<8x128xf32>
    %31 = arith.subf %25, %30 : vector<8x128xf32>
    %32 = arith.mulf %31, %31 : vector<8x128xf32>
    %cst_13 = arith.constant dense<0.000000e+00> : vector<8xf32>
    %33 = vector.multi_reduction <add>, %32, %cst_13 [1] : vector<8x128xf32> to vector<8xf32>
    %34 = vector.shape_cast %33 : vector<8xf32> to vector<8x1xf32>
    %cst_14 = arith.constant 1.280000e+02 : f32
    %35 = vector.broadcast %cst_14 : f32 to vector<8x1xf32>
    %36 = arith.divf %34, %35 : vector<8x1xf32>
    %37 = vector.broadcast %29 : vector<8x1xf32> to vector<8x128xf32>
    %38 = arith.subf %25, %37 : vector<8x128xf32>
    %cst_15 = arith.constant 9.99999974E-6 : f32
    %39 = vector.broadcast %cst_15 : f32 to vector<8x1xf32>
    %40 = arith.addf %36, %39 : vector<8x1xf32>
    %41 = math.rsqrt %40 : vector<8x1xf32>
    %42 = vector.broadcast %41 : vector<8x1xf32> to vector<8x128xf32>
    %43 = arith.mulf %38, %42 : vector<8x128xf32>
    %44 = vector.broadcast %0 : vector<1x128xf32> to vector<8x128xf32>
    %45 = arith.mulf %43, %44 : vector<8x128xf32>
    %46 = vector.broadcast %1 : vector<1x128xf32> to vector<8x128xf32>
    %47 = arith.addf %45, %46 : vector<8x128xf32>
    %c0_16 = arith.constant 0 : index
    %c0_17 = arith.constant 0 : index
    %48 = vector.load %arg5[%c0_16, %c0_17] : memref<128x128xf32, #tpu.memory_space<vmem>>, vector<128x128xf32>
    %cst_18 = arith.constant dense<0.000000e+00> : vector<8x128xf32>
    %49 = tpu.matmul %24, %48, %cst_18 {dimension_numbers = #tpu.dot_dimension_numbers<[1], [0], [0], [1], [0, 0, 1, 1], [], []>} : vector<8x128xf32>, vector<128x128xf32>, vector<8x128xf32> -> vector<8x128xf32>
    %c0_19 = arith.constant 0 : index
    %c0_20 = arith.constant 0 : index
    %50 = vector.load %arg7[%c0_19, %c0_20] : memref<8x128xf32, #tpu.memory_space<vmem>>, vector<8x128xf32>
    tpu.vector_store %arg7[%c0_19, %c0_20], %49 {strides = array<i32>} : memref<8x128xf32, #tpu.memory_space<vmem>>, vector<8x128xf32>,
    %c0_21 = arith.constant 0 : index
    %c0_22 = arith.constant 0 : index
    %51 = vector.load %arg6[%c0_21, %c0_22] : memref<128x256xf32, #tpu.memory_space<vmem>>, vector<128x256xf32>
    %cst_23 = arith.constant dense<0.000000e+00> : vector<8x256xf32>
    %52 = tpu.matmul %47, %51, %cst_23 {dimension_numbers = #tpu.dot_dimension_numbers<[1], [0], [0], [1], [0, 0, 1, 1], [], []>} : vector<8x128xf32>, vector<128x256xf32>, vector<8x256xf32> -> vector<8x256xf32>
    %c0_24 = arith.constant 0 : index
    %c0_25 = arith.constant 0 : index
    %53 = vector.load %arg8[%c0_24, %c0_25] : memref<8x256xf32, #tpu.memory_space<vmem>>, vector<8x256xf32>
    tpu.vector_store %arg8[%c0_24, %c0_25], %52 {strides = array<i32>} : memref<8x256xf32, #tpu.memory_space<vmem>>, vector<8x256xf32>,
    return
  }
  func.func @transform_0(%arg0: i32) -> (i32, i32) {
    %c0_i32 = arith.constant 0 : i32
    %c0_i32_0 = arith.constant 0 : i32
    return %arg0, %c0_i32 : i32, i32
  }
  func.func @transform_1(%arg0: i32) -> (i32, i32) {
    %c0_i32 = arith.constant 0 : i32
    %c0_i32_0 = arith.constant 0 : i32
    return %arg0, %c0_i32 : i32, i32
  }
  func.func @transform_2(%arg0: i32) -> (i32, i32) {
    %c0_i32 = arith.constant 0 : i32
    %c0_i32_0 = arith.constant 0 : i32
    %c0_i32_1 = arith.constant 0 : i32
    return %c0_i32, %c0_i32_0 : i32, i32
  }
  func.func @transform_3(%arg0: i32) -> (i32, i32) {
    %c0_i32 = arith.constant 0 : i32
    %c0_i32_0 = arith.constant 0 : i32
    %c0_i32_1 = arith.constant 0 : i32
    return %c0_i32, %c0_i32_0 : i32, i32
  }
  func.func @transform_4(%arg0: i32) -> (i32, i32) {
    %c0_i32 = arith.constant 0 : i32
    %c0_i32_0 = arith.constant 0 : i32
    %c0_i32_1 = arith.constant 0 : i32
    return %c0_i32, %c0_i32_0 : i32, i32
  }
  func.func @transform_5(%arg0: i32) -> (i32, i32) {
    %c0_i32 = arith.constant 0 : i32
    %c0_i32_0 = arith.constant 0 : i32
    %c0_i32_1 = arith.constant 0 : i32
    return %c0_i32, %c0_i32_0 : i32, i32
  }
  func.func @transform_6(%arg0: i32) -> (i32, i32) {
    %c0_i32 = arith.constant 0 : i32
    %c0_i32_0 = arith.constant 0 : i32
    return %arg0, %c0_i32 : i32, i32
  }
  func.func @transform_7(%arg0: i32) -> (i32, i32) {
    %c0_i32 = arith.constant 0 : i32
    %c0_i32_0 = arith.constant 0 : i32
    return %arg0, %c0_i32 : i32, i32
  }
}

module attributes {stable_mosaic.version = 11 : i64} {
  func.func @_proj_mlp_kernel(%arg0: i32, %arg1: memref<8x128xf32, #tpu.memory_space<vmem>>, %arg2: memref<8x128xf32, #tpu.memory_space<vmem>>, %arg3: memref<1x128xf32, #tpu.memory_space<vmem>>, %arg4: memref<1x128xf32, #tpu.memory_space<vmem>>, %arg5: memref<128x128xf32, #tpu.memory_space<vmem>>, %arg6: memref<1x128xf32, #tpu.memory_space<vmem>>, %arg7: memref<128x256xf32, #tpu.memory_space<vmem>>, %arg8: memref<1x256xf32, #tpu.memory_space<vmem>>, %arg9: memref<256x128xf32, #tpu.memory_space<vmem>>, %arg10: memref<1x128xf32, #tpu.memory_space<vmem>>, %arg11: memref<8x128xf32, #tpu.memory_space<vmem>>) attributes {dimension_semantics = [#tpu.dimension_semantics<parallel>], iteration_bounds = array<i64: 2>, scalar_prefetch = 0 : i64, scratch_operands = 0 : i64, tpu.core_type = #tpu.core_type<tc>, window_params = [{transform_indices = @transform_0, window_bounds = array<i64: 8, 128>}, {transform_indices = @transform_1, window_bounds = array<i64: 8, 128>}, {pipeline_mode = #tpu.pipeline_mode<synchronous>, transform_indices = @transform_2, window_bounds = array<i64: 1, 128>}, {pipeline_mode = #tpu.pipeline_mode<synchronous>, transform_indices = @transform_3, window_bounds = array<i64: 1, 128>}, {pipeline_mode = #tpu.pipeline_mode<synchronous>, transform_indices = @transform_4, window_bounds = array<i64: 128, 128>}, {pipeline_mode = #tpu.pipeline_mode<synchronous>, transform_indices = @transform_5, window_bounds = array<i64: 1, 128>}, {pipeline_mode = #tpu.pipeline_mode<synchronous>, transform_indices = @transform_6, window_bounds = array<i64: 128, 256>}, {pipeline_mode = #tpu.pipeline_mode<synchronous>, transform_indices = @transform_7, window_bounds = array<i64: 1, 256>}, {pipeline_mode = #tpu.pipeline_mode<synchronous>, transform_indices = @transform_8, window_bounds = array<i64: 256, 128>}, {pipeline_mode = #tpu.pipeline_mode<synchronous>, transform_indices = @transform_9, window_bounds = array<i64: 1, 128>}, {transform_indices = @transform_10, window_bounds = array<i64: 8, 128>}]} {
    %c0 = arith.constant 0 : index
    %c0_0 = arith.constant 0 : index
    %0 = vector.load %arg1[%c0, %c0_0] : memref<8x128xf32, #tpu.memory_space<vmem>>, vector<8x128xf32>
    %c0_1 = arith.constant 0 : index
    %c0_2 = arith.constant 0 : index
    %1 = vector.load %arg2[%c0_1, %c0_2] : memref<8x128xf32, #tpu.memory_space<vmem>>, vector<8x128xf32>
    %c0_3 = arith.constant 0 : index
    %c0_4 = arith.constant 0 : index
    %2 = vector.load %arg5[%c0_3, %c0_4] : memref<128x128xf32, #tpu.memory_space<vmem>>, vector<128x128xf32>
    %cst = arith.constant dense<0.000000e+00> : vector<8x128xf32>
    %3 = tpu.matmul %1, %2, %cst {dimension_numbers = #tpu.dot_dimension_numbers<[1], [0], [0], [1], [0, 0, 1, 1], [], []>} : vector<8x128xf32>, vector<128x128xf32>, vector<8x128xf32> -> vector<8x128xf32>
    %c0_5 = arith.constant 0 : index
    %c0_6 = arith.constant 0 : index
    %4 = vector.load %arg6[%c0_5, %c0_6] : memref<1x128xf32, #tpu.memory_space<vmem>>, vector<1x128xf32>
    %5 = vector.broadcast %4 : vector<1x128xf32> to vector<8x128xf32>
    %6 = arith.addf %3, %5 : vector<8x128xf32>
    %7 = arith.addf %0, %6 : vector<8x128xf32>
    %c0_7 = arith.constant 0 : index
    %c0_8 = arith.constant 0 : index
    %8 = vector.load %arg3[%c0_7, %c0_8] : memref<1x128xf32, #tpu.memory_space<vmem>>, vector<1x128xf32>
    %c0_9 = arith.constant 0 : index
    %c0_10 = arith.constant 0 : index
    %9 = vector.load %arg4[%c0_9, %c0_10] : memref<1x128xf32, #tpu.memory_space<vmem>>, vector<1x128xf32>
    %cst_11 = arith.constant dense<0.000000e+00> : vector<8xf32>
    %10 = vector.multi_reduction <add>, %7, %cst_11 [1] : vector<8x128xf32> to vector<8xf32>
    %11 = vector.shape_cast %10 : vector<8xf32> to vector<8x1xf32>
    %cst_12 = arith.constant 1.280000e+02 : f32
    %12 = vector.broadcast %cst_12 : f32 to vector<8x1xf32>
    %13 = arith.divf %11, %12 : vector<8x1xf32>
    %14 = vector.broadcast %13 : vector<8x1xf32> to vector<8x128xf32>
    %15 = arith.subf %7, %14 : vector<8x128xf32>
    %16 = arith.mulf %15, %15 : vector<8x128xf32>
    %cst_13 = arith.constant dense<0.000000e+00> : vector<8xf32>
    %17 = vector.multi_reduction <add>, %16, %cst_13 [1] : vector<8x128xf32> to vector<8xf32>
    %18 = vector.shape_cast %17 : vector<8xf32> to vector<8x1xf32>
    %cst_14 = arith.constant 1.280000e+02 : f32
    %19 = vector.broadcast %cst_14 : f32 to vector<8x1xf32>
    %20 = arith.divf %18, %19 : vector<8x1xf32>
    %21 = vector.broadcast %13 : vector<8x1xf32> to vector<8x128xf32>
    %22 = arith.subf %7, %21 : vector<8x128xf32>
    %cst_15 = arith.constant 9.99999974E-6 : f32
    %23 = vector.broadcast %cst_15 : f32 to vector<8x1xf32>
    %24 = arith.addf %20, %23 : vector<8x1xf32>
    %25 = math.rsqrt %24 : vector<8x1xf32>
    %26 = vector.broadcast %25 : vector<8x1xf32> to vector<8x128xf32>
    %27 = arith.mulf %22, %26 : vector<8x128xf32>
    %28 = vector.broadcast %8 : vector<1x128xf32> to vector<8x128xf32>
    %29 = arith.mulf %27, %28 : vector<8x128xf32>
    %30 = vector.broadcast %9 : vector<1x128xf32> to vector<8x128xf32>
    %31 = arith.addf %29, %30 : vector<8x128xf32>
    %c0_16 = arith.constant 0 : index
    %c0_17 = arith.constant 0 : index
    %32 = vector.load %arg7[%c0_16, %c0_17] : memref<128x256xf32, #tpu.memory_space<vmem>>, vector<128x256xf32>
    %cst_18 = arith.constant dense<0.000000e+00> : vector<8x256xf32>
    %33 = tpu.matmul %31, %32, %cst_18 {dimension_numbers = #tpu.dot_dimension_numbers<[1], [0], [0], [1], [0, 0, 1, 1], [], []>} : vector<8x128xf32>, vector<128x256xf32>, vector<8x256xf32> -> vector<8x256xf32>
    %c0_19 = arith.constant 0 : index
    %c0_20 = arith.constant 0 : index
    %34 = vector.load %arg8[%c0_19, %c0_20] : memref<1x256xf32, #tpu.memory_space<vmem>>, vector<1x256xf32>
    %35 = vector.broadcast %34 : vector<1x256xf32> to vector<8x256xf32>
    %36 = arith.addf %33, %35 : vector<8x256xf32>
    %cst_21 = arith.constant 5.000000e-01 : f32
    %37 = vector.broadcast %cst_21 : f32 to vector<8x256xf32>
    %38 = arith.mulf %37, %36 : vector<8x256xf32>
    %cst_22 = arith.constant 0.707106769 : f32
    %39 = vector.broadcast %cst_22 : f32 to vector<8x256xf32>
    %40 = arith.mulf %36, %39 : vector<8x256xf32>
    %41 = math.erf %40 : vector<8x256xf32>
    %cst_23 = arith.constant 1.000000e+00 : f32
    %42 = vector.broadcast %cst_23 : f32 to vector<8x256xf32>
    %43 = arith.addf %42, %41 : vector<8x256xf32>
    %44 = arith.mulf %38, %43 : vector<8x256xf32>
    %c0_24 = arith.constant 0 : index
    %c0_25 = arith.constant 0 : index
    %45 = vector.load %arg9[%c0_24, %c0_25] : memref<256x128xf32, #tpu.memory_space<vmem>>, vector<256x128xf32>
    %cst_26 = arith.constant dense<0.000000e+00> : vector<8x128xf32>
    %46 = tpu.matmul %44, %45, %cst_26 {dimension_numbers = #tpu.dot_dimension_numbers<[1], [0], [0], [1], [0, 0, 1, 1], [], []>} : vector<8x256xf32>, vector<256x128xf32>, vector<8x128xf32> -> vector<8x128xf32>
    %c0_27 = arith.constant 0 : index
    %c0_28 = arith.constant 0 : index
    %47 = vector.load %arg10[%c0_27, %c0_28] : memref<1x128xf32, #tpu.memory_space<vmem>>, vector<1x128xf32>
    %48 = vector.broadcast %47 : vector<1x128xf32> to vector<8x128xf32>
    %49 = arith.addf %46, %48 : vector<8x128xf32>
    %50 = arith.addf %7, %49 : vector<8x128xf32>
    %c0_29 = arith.constant 0 : index
    %c0_30 = arith.constant 0 : index
    %51 = vector.load %arg11[%c0_29, %c0_30] : memref<8x128xf32, #tpu.memory_space<vmem>>, vector<8x128xf32>
    tpu.vector_store %arg11[%c0_29, %c0_30], %50 {strides = array<i32>} : memref<8x128xf32, #tpu.memory_space<vmem>>, vector<8x128xf32>,
    return
  }
  func.func @transform_0(%arg0: i32) -> (i32, i32) {
    %c0_i32 = arith.constant 0 : i32
    %c0_i32_0 = arith.constant 0 : i32
    return %arg0, %c0_i32 : i32, i32
  }
  func.func @transform_1(%arg0: i32) -> (i32, i32) {
    %c0_i32 = arith.constant 0 : i32
    %c0_i32_0 = arith.constant 0 : i32
    return %arg0, %c0_i32 : i32, i32
  }
  func.func @transform_2(%arg0: i32) -> (i32, i32) {
    %c0_i32 = arith.constant 0 : i32
    %c0_i32_0 = arith.constant 0 : i32
    %c0_i32_1 = arith.constant 0 : i32
    return %c0_i32, %c0_i32_0 : i32, i32
  }
  func.func @transform_3(%arg0: i32) -> (i32, i32) {
    %c0_i32 = arith.constant 0 : i32
    %c0_i32_0 = arith.constant 0 : i32
    %c0_i32_1 = arith.constant 0 : i32
    return %c0_i32, %c0_i32_0 : i32, i32
  }
  func.func @transform_4(%arg0: i32) -> (i32, i32) {
    %c0_i32 = arith.constant 0 : i32
    %c0_i32_0 = arith.constant 0 : i32
    %c0_i32_1 = arith.constant 0 : i32
    return %c0_i32, %c0_i32_0 : i32, i32
  }
  func.func @transform_5(%arg0: i32) -> (i32, i32) {
    %c0_i32 = arith.constant 0 : i32
    %c0_i32_0 = arith.constant 0 : i32
    %c0_i32_1 = arith.constant 0 : i32
    return %c0_i32, %c0_i32_0 : i32, i32
  }
  func.func @transform_6(%arg0: i32) -> (i32, i32) {
    %c0_i32 = arith.constant 0 : i32
    %c0_i32_0 = arith.constant 0 : i32
    %c0_i32_1 = arith.constant 0 : i32
    return %c0_i32, %c0_i32_0 : i32, i32
  }
  func.func @transform_7(%arg0: i32) -> (i32, i32) {
    %c0_i32 = arith.constant 0 : i32
    %c0_i32_0 = arith.constant 0 : i32
    %c0_i32_1 = arith.constant 0 : i32
    return %c0_i32, %c0_i32_0 : i32, i32
  }
  func.func @transform_8(%arg0: i32) -> (i32, i32) {
    %c0_i32 = arith.constant 0 : i32
    %c0_i32_0 = arith.constant 0 : i32
    %c0_i32_1 = arith.constant 0 : i32
    return %c0_i32, %c0_i32_0 : i32, i32
  }
  func.func @transform_9(%arg0: i32) -> (i32, i32) {
    %c0_i32 = arith.constant 0 : i32
    %c0_i32_0 = arith.constant 0 : i32
    %c0_i32_1 = arith.constant 0 : i32
    return %c0_i32, %c0_i32_0 : i32, i32
  }
  func.func @transform_10(%arg0: i32) -> (i32, i32) {
    %c0_i32 = arith.constant 0 : i32
    %c0_i32_0 = arith.constant 0 : i32
    return %arg0, %c0_i32 : i32, i32
  }
}

module attributes {stable_mosaic.version = 11 : i64} {
  func.func @_ln_kernel(%arg0: i32, %arg1: memref<8x128xf32, #tpu.memory_space<vmem>>, %arg2: memref<1x128xf32, #tpu.memory_space<vmem>>, %arg3: memref<1x128xf32, #tpu.memory_space<vmem>>, %arg4: memref<8x128xf32, #tpu.memory_space<vmem>>) attributes {dimension_semantics = [#tpu.dimension_semantics<parallel>], iteration_bounds = array<i64: 2>, scalar_prefetch = 0 : i64, scratch_operands = 0 : i64, tpu.core_type = #tpu.core_type<tc>, window_params = [{transform_indices = @transform_0, window_bounds = array<i64: 8, 128>}, {pipeline_mode = #tpu.pipeline_mode<synchronous>, transform_indices = @transform_1, window_bounds = array<i64: 1, 128>}, {pipeline_mode = #tpu.pipeline_mode<synchronous>, transform_indices = @transform_2, window_bounds = array<i64: 1, 128>}, {transform_indices = @transform_3, window_bounds = array<i64: 8, 128>}]} {
    %c0 = arith.constant 0 : index
    %c0_0 = arith.constant 0 : index
    %0 = vector.load %arg1[%c0, %c0_0] : memref<8x128xf32, #tpu.memory_space<vmem>>, vector<8x128xf32>
    %c0_1 = arith.constant 0 : index
    %c0_2 = arith.constant 0 : index
    %1 = vector.load %arg2[%c0_1, %c0_2] : memref<1x128xf32, #tpu.memory_space<vmem>>, vector<1x128xf32>
    %c0_3 = arith.constant 0 : index
    %c0_4 = arith.constant 0 : index
    %2 = vector.load %arg3[%c0_3, %c0_4] : memref<1x128xf32, #tpu.memory_space<vmem>>, vector<1x128xf32>
    %cst = arith.constant dense<0.000000e+00> : vector<8xf32>
    %3 = vector.multi_reduction <add>, %0, %cst [1] : vector<8x128xf32> to vector<8xf32>
    %4 = vector.shape_cast %3 : vector<8xf32> to vector<8x1xf32>
    %cst_5 = arith.constant 1.280000e+02 : f32
    %5 = vector.broadcast %cst_5 : f32 to vector<8x1xf32>
    %6 = arith.divf %4, %5 : vector<8x1xf32>
    %7 = vector.broadcast %6 : vector<8x1xf32> to vector<8x128xf32>
    %8 = arith.subf %0, %7 : vector<8x128xf32>
    %9 = arith.mulf %8, %8 : vector<8x128xf32>
    %cst_6 = arith.constant dense<0.000000e+00> : vector<8xf32>
    %10 = vector.multi_reduction <add>, %9, %cst_6 [1] : vector<8x128xf32> to vector<8xf32>
    %11 = vector.shape_cast %10 : vector<8xf32> to vector<8x1xf32>
    %cst_7 = arith.constant 1.280000e+02 : f32
    %12 = vector.broadcast %cst_7 : f32 to vector<8x1xf32>
    %13 = arith.divf %11, %12 : vector<8x1xf32>
    %14 = vector.broadcast %6 : vector<8x1xf32> to vector<8x128xf32>
    %15 = arith.subf %0, %14 : vector<8x128xf32>
    %cst_8 = arith.constant 9.99999974E-6 : f32
    %16 = vector.broadcast %cst_8 : f32 to vector<8x1xf32>
    %17 = arith.addf %13, %16 : vector<8x1xf32>
    %18 = math.rsqrt %17 : vector<8x1xf32>
    %19 = vector.broadcast %18 : vector<8x1xf32> to vector<8x128xf32>
    %20 = arith.mulf %15, %19 : vector<8x128xf32>
    %21 = vector.broadcast %1 : vector<1x128xf32> to vector<8x128xf32>
    %22 = arith.mulf %20, %21 : vector<8x128xf32>
    %23 = vector.broadcast %2 : vector<1x128xf32> to vector<8x128xf32>
    %24 = arith.addf %22, %23 : vector<8x128xf32>
    %c0_9 = arith.constant 0 : index
    %c0_10 = arith.constant 0 : index
    %25 = vector.load %arg4[%c0_9, %c0_10] : memref<8x128xf32, #tpu.memory_space<vmem>>, vector<8x128xf32>
    tpu.vector_store %arg4[%c0_9, %c0_10], %24 {strides = array<i32>} : memref<8x128xf32, #tpu.memory_space<vmem>>, vector<8x128xf32>,
    return
  }
  func.func @transform_0(%arg0: i32) -> (i32, i32) {
    %c0_i32 = arith.constant 0 : i32
    %c0_i32_0 = arith.constant 0 : i32
    return %arg0, %c0_i32 : i32, i32
  }
  func.func @transform_1(%arg0: i32) -> (i32, i32) {
    %c0_i32 = arith.constant 0 : i32
    %c0_i32_0 = arith.constant 0 : i32
    %c0_i32_1 = arith.constant 0 : i32
    return %c0_i32, %c0_i32_0 : i32, i32
  }
  func.func @transform_2(%arg0: i32) -> (i32, i32) {
    %c0_i32 = arith.constant 0 : i32
    %c0_i32_0 = arith.constant 0 : i32
    %c0_i32_1 = arith.constant 0 : i32
    return %c0_i32, %c0_i32_0 : i32, i32
  }
  func.func @transform_3(%arg0: i32) -> (i32, i32) {
    %c0_i32 = arith.constant 0 : i32
    %c0_i32_0 = arith.constant 0 : i32
    return %arg0, %c0_i32 : i32, i32
  }
}

module attributes {stable_mosaic.version = 11 : i64} {
  func.func @_proj_mlp_kernel(%arg0: i32, %arg1: memref<8x128xf32, #tpu.memory_space<vmem>>, %arg2: memref<8x128xf32, #tpu.memory_space<vmem>>, %arg3: memref<1x128xf32, #tpu.memory_space<vmem>>, %arg4: memref<1x128xf32, #tpu.memory_space<vmem>>, %arg5: memref<128x128xf32, #tpu.memory_space<vmem>>, %arg6: memref<1x128xf32, #tpu.memory_space<vmem>>, %arg7: memref<128x256xf32, #tpu.memory_space<vmem>>, %arg8: memref<1x256xf32, #tpu.memory_space<vmem>>, %arg9: memref<256x128xf32, #tpu.memory_space<vmem>>, %arg10: memref<1x128xf32, #tpu.memory_space<vmem>>, %arg11: memref<8x128xf32, #tpu.memory_space<vmem>>) attributes {dimension_semantics = [#tpu.dimension_semantics<parallel>], iteration_bounds = array<i64: 2>, scalar_prefetch = 0 : i64, scratch_operands = 0 : i64, tpu.core_type = #tpu.core_type<tc>, window_params = [{transform_indices = @transform_0, window_bounds = array<i64: 8, 128>}, {transform_indices = @transform_1, window_bounds = array<i64: 8, 128>}, {pipeline_mode = #tpu.pipeline_mode<synchronous>, transform_indices = @transform_2, window_bounds = array<i64: 1, 128>}, {pipeline_mode = #tpu.pipeline_mode<synchronous>, transform_indices = @transform_3, window_bounds = array<i64: 1, 128>}, {pipeline_mode = #tpu.pipeline_mode<synchronous>, transform_indices = @transform_4, window_bounds = array<i64: 128, 128>}, {pipeline_mode = #tpu.pipeline_mode<synchronous>, transform_indices = @transform_5, window_bounds = array<i64: 1, 128>}, {pipeline_mode = #tpu.pipeline_mode<synchronous>, transform_indices = @transform_6, window_bounds = array<i64: 128, 256>}, {pipeline_mode = #tpu.pipeline_mode<synchronous>, transform_indices = @transform_7, window_bounds = array<i64: 1, 256>}, {pipeline_mode = #tpu.pipeline_mode<synchronous>, transform_indices = @transform_8, window_bounds = array<i64: 256, 128>}, {pipeline_mode = #tpu.pipeline_mode<synchronous>, transform_indices = @transform_9, window_bounds = array<i64: 1, 128>}, {transform_indices = @transform_10, window_bounds = array<i64: 8, 128>}]} {
    %c0 = arith.constant 0 : index
    %c0_0 = arith.constant 0 : index
    %0 = vector.load %arg1[%c0, %c0_0] : memref<8x128xf32, #tpu.memory_space<vmem>>, vector<8x128xf32>
    %c0_1 = arith.constant 0 : index
    %c0_2 = arith.constant 0 : index
    %1 = vector.load %arg2[%c0_1, %c0_2] : memref<8x128xf32, #tpu.memory_space<vmem>>, vector<8x128xf32>
    %c0_3 = arith.constant 0 : index
    %c0_4 = arith.constant 0 : index
    %2 = vector.load %arg5[%c0_3, %c0_4] : memref<128x128xf32, #tpu.memory_space<vmem>>, vector<128x128xf32>
    %cst = arith.constant dense<0.000000e+00> : vector<8x128xf32>
    %3 = tpu.matmul %1, %2, %cst {dimension_numbers = #tpu.dot_dimension_numbers<[1], [0], [0], [1], [0, 0, 1, 1], [], []>} : vector<8x128xf32>, vector<128x128xf32>, vector<8x128xf32> -> vector<8x128xf32>
    %c0_5 = arith.constant 0 : index
    %c0_6 = arith.constant 0 : index
    %4 = vector.load %arg6[%c0_5, %c0_6] : memref<1x128xf32, #tpu.memory_space<vmem>>, vector<1x128xf32>
    %5 = vector.broadcast %4 : vector<1x128xf32> to vector<8x128xf32>
    %6 = arith.addf %3, %5 : vector<8x128xf32>
    %7 = arith.addf %0, %6 : vector<8x128xf32>
    %c0_7 = arith.constant 0 : index
    %c0_8 = arith.constant 0 : index
    %8 = vector.load %arg3[%c0_7, %c0_8] : memref<1x128xf32, #tpu.memory_space<vmem>>, vector<1x128xf32>
    %c0_9 = arith.constant 0 : index
    %c0_10 = arith.constant 0 : index
    %9 = vector.load %arg4[%c0_9, %c0_10] : memref<1x128xf32, #tpu.memory_space<vmem>>, vector<1x128xf32>
    %cst_11 = arith.constant dense<0.000000e+00> : vector<8xf32>
    %10 = vector.multi_reduction <add>, %7, %cst_11 [1] : vector<8x128xf32> to vector<8xf32>
    %11 = vector.shape_cast %10 : vector<8xf32> to vector<8x1xf32>
    %cst_12 = arith.constant 1.280000e+02 : f32
    %12 = vector.broadcast %cst_12 : f32 to vector<8x1xf32>
    %13 = arith.divf %11, %12 : vector<8x1xf32>
    %14 = vector.broadcast %13 : vector<8x1xf32> to vector<8x128xf32>
    %15 = arith.subf %7, %14 : vector<8x128xf32>
    %16 = arith.mulf %15, %15 : vector<8x128xf32>
    %cst_13 = arith.constant dense<0.000000e+00> : vector<8xf32>
    %17 = vector.multi_reduction <add>, %16, %cst_13 [1] : vector<8x128xf32> to vector<8xf32>
    %18 = vector.shape_cast %17 : vector<8xf32> to vector<8x1xf32>
    %cst_14 = arith.constant 1.280000e+02 : f32
    %19 = vector.broadcast %cst_14 : f32 to vector<8x1xf32>
    %20 = arith.divf %18, %19 : vector<8x1xf32>
    %21 = vector.broadcast %13 : vector<8x1xf32> to vector<8x128xf32>
    %22 = arith.subf %7, %21 : vector<8x128xf32>
    %cst_15 = arith.constant 9.99999974E-6 : f32
    %23 = vector.broadcast %cst_15 : f32 to vector<8x1xf32>
    %24 = arith.addf %20, %23 : vector<8x1xf32>
    %25 = math.rsqrt %24 : vector<8x1xf32>
    %26 = vector.broadcast %25 : vector<8x1xf32> to vector<8x128xf32>
    %27 = arith.mulf %22, %26 : vector<8x128xf32>
    %28 = vector.broadcast %8 : vector<1x128xf32> to vector<8x128xf32>
    %29 = arith.mulf %27, %28 : vector<8x128xf32>
    %30 = vector.broadcast %9 : vector<1x128xf32> to vector<8x128xf32>
    %31 = arith.addf %29, %30 : vector<8x128xf32>
    %c0_16 = arith.constant 0 : index
    %c0_17 = arith.constant 0 : index
    %32 = vector.load %arg7[%c0_16, %c0_17] : memref<128x256xf32, #tpu.memory_space<vmem>>, vector<128x256xf32>
    %cst_18 = arith.constant dense<0.000000e+00> : vector<8x256xf32>
    %33 = tpu.matmul %31, %32, %cst_18 {dimension_numbers = #tpu.dot_dimension_numbers<[1], [0], [0], [1], [0, 0, 1, 1], [], []>} : vector<8x128xf32>, vector<128x256xf32>, vector<8x256xf32> -> vector<8x256xf32>
    %c0_19 = arith.constant 0 : index
    %c0_20 = arith.constant 0 : index
    %34 = vector.load %arg8[%c0_19, %c0_20] : memref<1x256xf32, #tpu.memory_space<vmem>>, vector<1x256xf32>
    %35 = vector.broadcast %34 : vector<1x256xf32> to vector<8x256xf32>
    %36 = arith.addf %33, %35 : vector<8x256xf32>
    %cst_21 = arith.constant 5.000000e-01 : f32
    %37 = vector.broadcast %cst_21 : f32 to vector<8x256xf32>
    %38 = arith.mulf %37, %36 : vector<8x256xf32>
    %cst_22 = arith.constant 0.707106769 : f32
    %39 = vector.broadcast %cst_22 : f32 to vector<8x256xf32>
    %40 = arith.mulf %36, %39 : vector<8x256xf32>
    %41 = math.erf %40 : vector<8x256xf32>
    %cst_23 = arith.constant 1.000000e+00 : f32
    %42 = vector.broadcast %cst_23 : f32 to vector<8x256xf32>
    %43 = arith.addf %42, %41 : vector<8x256xf32>
    %44 = arith.mulf %38, %43 : vector<8x256xf32>
    %c0_24 = arith.constant 0 : index
    %c0_25 = arith.constant 0 : index
    %45 = vector.load %arg9[%c0_24, %c0_25] : memref<256x128xf32, #tpu.memory_space<vmem>>, vector<256x128xf32>
    %cst_26 = arith.constant dense<0.000000e+00> : vector<8x128xf32>
    %46 = tpu.matmul %44, %45, %cst_26 {dimension_numbers = #tpu.dot_dimension_numbers<[1], [0], [0], [1], [0, 0, 1, 1], [], []>} : vector<8x256xf32>, vector<256x128xf32>, vector<8x128xf32> -> vector<8x128xf32>
    %c0_27 = arith.constant 0 : index
    %c0_28 = arith.constant 0 : index
    %47 = vector.load %arg10[%c0_27, %c0_28] : memref<1x128xf32, #tpu.memory_space<vmem>>, vector<1x128xf32>
    %48 = vector.broadcast %47 : vector<1x128xf32> to vector<8x128xf32>
    %49 = arith.addf %46, %48 : vector<8x128xf32>
    %50 = arith.addf %7, %49 : vector<8x128xf32>
    %c0_29 = arith.constant 0 : index
    %c0_30 = arith.constant 0 : index
    %51 = vector.load %arg11[%c0_29, %c0_30] : memref<8x128xf32, #tpu.memory_space<vmem>>, vector<8x128xf32>
    tpu.vector_store %arg11[%c0_29, %c0_30], %50 {strides = array<i32>} : memref<8x128xf32, #tpu.memory_space<vmem>>, vector<8x128xf32>,
    return
  }
  func.func @transform_0(%arg0: i32) -> (i32, i32) {
    %c0_i32 = arith.constant 0 : i32
    %c0_i32_0 = arith.constant 0 : i32
    return %arg0, %c0_i32 : i32, i32
  }
  func.func @transform_1(%arg0: i32) -> (i32, i32) {
    %c0_i32 = arith.constant 0 : i32
    %c0_i32_0 = arith.constant 0 : i32
    return %arg0, %c0_i32 : i32, i32
  }
  func.func @transform_2(%arg0: i32) -> (i32, i32) {
    %c0_i32 = arith.constant 0 : i32
    %c0_i32_0 = arith.constant 0 : i32
    %c0_i32_1 = arith.constant 0 : i32
    return %c0_i32, %c0_i32_0 : i32, i32
  }
  func.func @transform_3(%arg0: i32) -> (i32, i32) {
    %c0_i32 = arith.constant 0 : i32
    %c0_i32_0 = arith.constant 0 : i32
    %c0_i32_1 = arith.constant 0 : i32
    return %c0_i32, %c0_i32_0 : i32, i32
  }
  func.func @transform_4(%arg0: i32) -> (i32, i32) {
    %c0_i32 = arith.constant 0 : i32
    %c0_i32_0 = arith.constant 0 : i32
    %c0_i32_1 = arith.constant 0 : i32
    return %c0_i32, %c0_i32_0 : i32, i32
  }
  func.func @transform_5(%arg0: i32) -> (i32, i32) {
    %c0_i32 = arith.constant 0 : i32
    %c0_i32_0 = arith.constant 0 : i32
    %c0_i32_1 = arith.constant 0 : i32
    return %c0_i32, %c0_i32_0 : i32, i32
  }
  func.func @transform_6(%arg0: i32) -> (i32, i32) {
    %c0_i32 = arith.constant 0 : i32
    %c0_i32_0 = arith.constant 0 : i32
    %c0_i32_1 = arith.constant 0 : i32
    return %c0_i32, %c0_i32_0 : i32, i32
  }
  func.func @transform_7(%arg0: i32) -> (i32, i32) {
    %c0_i32 = arith.constant 0 : i32
    %c0_i32_0 = arith.constant 0 : i32
    %c0_i32_1 = arith.constant 0 : i32
    return %c0_i32, %c0_i32_0 : i32, i32
  }
  func.func @transform_8(%arg0: i32) -> (i32, i32) {
    %c0_i32 = arith.constant 0 : i32
    %c0_i32_0 = arith.constant 0 : i32
    %c0_i32_1 = arith.constant 0 : i32
    return %c0_i32, %c0_i32_0 : i32, i32
  }
  func.func @transform_9(%arg0: i32) -> (i32, i32) {
    %c0_i32 = arith.constant 0 : i32
    %c0_i32_0 = arith.constant 0 : i32
    %c0_i32_1 = arith.constant 0 : i32
    return %c0_i32, %c0_i32_0 : i32, i32
  }
  func.func @transform_10(%arg0: i32) -> (i32, i32) {
    %c0_i32 = arith.constant 0 : i32
    %c0_i32_0 = arith.constant 0 : i32
    return %arg0, %c0_i32 : i32, i32
  }
}

</mosaic_0001>

<bundles_post_ra>
// kernel: encoder_forward.10
= control target key start
LH: loop header
LB: loop body
LE: loop exit
PB: predicated region body
PF: predicated region fallthrough
CT: control target
= control target key end

     0   :  { %s768_s24 = smov 0   ;;  %s978_s0 = inlined_call_operand.vmem [shape: f32[16,128], index: 0, kind: input, shape index: {}]   ;;  %s979_s1 = inlined_call_operand.vmem [shape: f32[16,128], index: 1, kind: input, shape index: {}]   ;;  %s980_s2 = inlined_call_operand.vmem [shape: f32[1,128], index: 2, kind: input, shape index: {}]   ;;  %s981_s3 = inlined_call_operand.vmem [shape: f32[1,128], index: 3, kind: input, shape index: {}]   ;;  %s982_s4 = inlined_call_operand.vmem [shape: f32[128,128], index: 4, kind: input, shape index: {}]   ;;  %s983_s5 = inlined_call_operand.vmem [shape: f32[128,256], index: 5, kind: input, shape index: {}]   ;;  %s984_s6 = inlined_call_operand.vmem [shape: f32[16,128], index: 6, kind: output, shape index: {0}]   ;;  %s985_s7 = inlined_call_operand.vmem [shape: f32[16,256], index: 7, kind: output, shape index: {1}]  }
   0x1 LB: > { %s637_s25 = sadd.s32 4294967295, %s724_s24   ;;  %p641_p0 = scmp.ge.s32.totalorder %s724_s24, 1  ;;  %s724_s24 = sphi %s768_s24, %s18_s24  }
   0x2   : > { %p248_p1 = scmp.lt.s32.totalorder %s724_s24, 3 }
   0x4   : > { %p249_p2 = pnand %p641_p0, %p248_p1 }
   0x5   : > { %p287_p3 = scmp.lt.s32.totalorder (!%p249_p2), %s637_s25, 1 }
   0x6   : > { %252 = sbr.rel (%p249_p2) target bundleno = 520 (0x208), region = 44 }
   0xb   : > { %s987_s25 = smov (!%p287_p3, %s637_s25), 1  ;;  %v465_v2 = vld [vmem:[%s983_s5 + $0xf8] sm:$0xff]  ;;  %v464_v3 = vld [vmem:[%s983_s5 + $0xf0] sm:$0xff]  ;;  %v463_v4 = vld [vmem:[%s983_s5 + $0xe8] sm:$0xff]  ;;  %v726_v6 = vmov 0.0   ;;  %vm727_vm0 = vmmov 0  }
   0xc   : > { %s779_s26 = sshll.u32 %s987_s25, 3  ;;  %466 = vmatprep.subr.mxu1 %v465_v2  ;;  %v462_v5 = vld [vmem:[%s983_s5 + $0xe0] sm:$0xff]  ;;  %669 = vmatprep.subr.mxu0 %v726_v6  ;;  %v362_v7 = vld [vmem:[%s982_s4 + $0x78] sm:$0xff]  ;;  %v361_v9 = vld [vmem:[%s982_s4 + $0x70] sm:$0xff]  ;;  %s651_s10 = sshll.u32 %s987_s25, 4 }
   0xd   : > { %s294_s29 = scalar_lea.vmem %s979_s1, %s779_s26  ;;  %s290_s9 = scalar_lea.vmem %s978_s0, %s779_s26  ;;  %467 = vmatpush1.msra.mxu1 %v464_v3  ;;  %v461_v8 = vld [vmem:[%s983_s5 + $0xd8] sm:$0xff]  ;;  %670 = vmatpush3.msra.mxu0 %v362_v7  ;;  %v460_v10 = vld [vmem:[%s983_s5 + $0xd0] sm:$0xff]  ;;  %v459_v11 = vld [vmem:[%s983_s5 + $0xc8] sm:$0xff] }
   0xe   : > { %v333_v0 = vld [vmem:[%s294_s29] sm:$0xff]  ;;  %468 = vmatprep.subr.mxu1 %v463_v4  ;;  %671 = vmatprep.subr.mxu0 %v726_v6  ;;  %v457_v21 = vld [vmem:[%s983_s5 + $0xb8] sm:$0xff]  ;;  %v360_v22 = vld [vmem:[%s982_s4 + $0x68] sm:$0xff]  ;;  %s303_s13 = scalar_lea.vmem %s985_s7, %s651_s10  ;;  %s298_s16 = scalar_lea.vmem %s984_s6, %s779_s26 }
   0xf   : > { %334 = vadd.xlane.f32.xlu0 %v333_v0  ;;  %v306_v1 = vld [vmem:[%s290_s9] sm:$0xff]  ;;  %469 = vmatpush1.msra.mxu1 %v462_v5  ;;  %v456_v23 = vld [vmem:[%s983_s5 + $0xb0] sm:$0xff]  ;;  %v455_v24 = vld [vmem:[%s983_s5 + $0xa8] sm:$0xff] }
  0x10   : > { %672 = vmatpush3.msra.mxu0 %v361_v9  ;;  %470 = vmatprep.subr.mxu1 %v461_v8  ;;  %v458_v12 = vld [vmem:[%s983_s5 + $0xc0] sm:$0xff]  ;;  %v453_v27 = vld [vmem:[%s983_s5 + $0x98] sm:$0xff]  ;;  %v452_v29 = vld [vmem:[%s983_s5 + $0x90] sm:$0xff] }
  0x11   : > { %673 = vmatprep.subr.mxu0 %v726_v6  ;;  %471 = vmatpush1.msra.mxu1 %v460_v10  ;;  %v359_v25 = vld [vmem:[%s982_s4 + $0x60] sm:$0xff]  ;;  %v358_v28 = vld [vmem:[%s982_s4 + $0x58] sm:$0xff]  ;;  %v451_v30 = vld [vmem:[%s983_s5 + $0x88] sm:$0xff] }
  0x12   : > { %530 = vmatprep.mubr.f32.mxu1 %v726_v6  ;;  %472 = vmatprep.subr.mxu1 %v459_v11  ;;  %v454_v26 = vld [vmem:[%s983_s5 + $0xa0] sm:$0xff]  ;;  %v357_v31 = vld [vmem:[%s982_s4 + $0x50] sm:$0xff]  ;;  %v449_v33 = vld [vmem:[%s983_s5 + $0x78] sm:$0xff] }
  0x13   : > { %307 = vadd.xlane.f32.xlu0 %v306_v1  ;;  %473 = vmatpush1.msra.mxu1 %v458_v12  ;;  %v450_v32 = vld [vmem:[%s983_s5 + $0x80] sm:$0xff]  ;;  %v356_v34 = vld [vmem:[%s982_s4 + $0x48] sm:$0xff]  ;;  %v448_v35 = vld [vmem:[%s983_s5 + $0x70] sm:$0xff] }
  0x14   : > { %474 = vmatprep.subr.mxu1 %v457_v21  ;;  %674 = vmatpush3.msra.mxu0 %v360_v22  ;;  %v447_v36 = vld [vmem:[%s983_s5 + $0x68] sm:$0xff]  ;;  %v355_v37 = vld [vmem:[%s982_s4 + $0x40] sm:$0xff]  ;;  %v445_v39 = vld [vmem:[%s983_s5 + $0x58] sm:$0xff] }
  0x15   : > { %475 = vmatpush1.msra.mxu1 %v456_v23  ;;  %675 = vmatprep.subr.mxu0 %v726_v6  ;;  %v446_v38 = vld [vmem:[%s983_s5 + $0x60] sm:$0xff]  ;;  %v354_v40 = vld [vmem:[%s982_s4 + $0x38] sm:$0xff]  ;;  %v444_v41 = vld [vmem:[%s983_s5 + $0x50] sm:$0xff] }
  0x16   : > { %476 = vmatprep.subr.mxu1 %v455_v24  ;;  %676 = vmatpush3.msra.mxu0 %v359_v25  ;;  %v443_v42 = vld [vmem:[%s983_s5 + $0x48] sm:$0xff]  ;;  %v353_v43 = vld [vmem:[%s982_s4 + $0x30] sm:$0xff]  ;;  %v442_v44 = vld [vmem:[%s983_s5 + $0x40] sm:$0xff] }
  0x17   : > { %477 = vmatpush1.msra.mxu1 %v454_v26  ;;  %677 = vmatprep.subr.mxu0 %v726_v6  ;;  %v441_v45 = vld [vmem:[%s983_s5 + $0x38] sm:$0xff]  ;;  %v352_v46 = vld [vmem:[%s982_s4 + $0x28] sm:$0xff]  ;;  %v440_v47 = vld [vmem:[%s983_s5 + $0x30] sm:$0xff] }
  0x18   : > { %478 = vmatprep.subr.mxu1 %v453_v27  ;;  %678 = vmatpush3.msra.mxu0 %v358_v28  ;;  %v439_v48 = vld [vmem:[%s983_s5 + $0x28] sm:$0xff]  ;;  %v351_v49 = vld [vmem:[%s982_s4 + $0x20] sm:$0xff]  ;;  %v437_v51 = vld [vmem:[%s983_s5 + $0x18] sm:$0xff] }
  0x19   : > { %479 = vmatpush1.msra.mxu1 %v452_v29  ;;  %679 = vmatprep.subr.mxu0 %v726_v6  ;;  %v438_v50 = vld [vmem:[%s983_s5 + $0x20] sm:$0xff]  ;;  %v350_v52 = vld [vmem:[%s982_s4 + $0x18] sm:$0xff]  ;;  %v436_v53 = vld [vmem:[%s983_s5 + $0x10] sm:$0xff] }
  0x1a   : > { %480 = vmatprep.subr.mxu1 %v451_v30  ;;  %680 = vmatpush3.msra.mxu0 %v357_v31  ;;  %v435_v54 = vld [vmem:[%s983_s5 + $0x8] sm:$0xff]  ;;  %v349_v55 = vld [vmem:[%s982_s4 + $0x10] sm:$0xff]  ;;  %v434_v56 = vld [vmem:[%s983_s5] sm:$0xff] }
  0x1b   : > { %481 = vmatpush1.msra.mxu1 %v450_v32  ;;  %681 = vmatprep.subr.mxu0 %v726_v6  ;;  %v348_v57 = vld [vmem:[%s982_s4 + $0x8] sm:$0xff]  ;;  %v347_v58 = vld [vmem:[%s982_s4] sm:$0xff] }
  0x1c   : > { %482 = vmatprep.subr.mxu1 %v449_v33  ;;  %682 = vmatpush3.msra.mxu0 %v356_v34  ;;  %v647_v2 = vld [vmem:[%s980_s2] ss:$0 sm:$0xff] }
  0x1d   : > { %483 = vmatpush1.msra.mxu1 %v448_v35  ;;  %683 = vmatprep.subr.mxu0 %v726_v6  ;;  %v648_v4 = vld [vmem:[%s981_s3] ss:$0 sm:$0xff] }
  0x1e   : > { %484 = vmatprep.subr.mxu1 %v447_v36  ;;  %684 = vmatpush3.msra.mxu0 %v355_v37 }
  0x1f   : > { %485 = vmatpush1.msra.mxu1 %v446_v38  ;;  %685 = vmatprep.subr.mxu0 %v726_v6 }
  0x20   : > { %486 = vmatprep.subr.mxu1 %v445_v39  ;;  %686 = vmatpush3.msra.mxu0 %v354_v40 }
  0x21   : > { %487 = vmatpush1.msra.mxu1 %v444_v41  ;;  %687 = vmatprep.subr.mxu0 %v726_v6 }
  0x22   : > { %488 = vmatprep.subr.mxu1 %v443_v42  ;;  %688 = vmatpush3.msra.mxu0 %v353_v43 }
  0x23   : > { %489 = vmatpush1.msra.mxu1 %v442_v44  ;;  %689 = vmatprep.subr.mxu0 %v726_v6 }
  0x24   : > { %490 = vmatprep.subr.mxu1 %v441_v45  ;;  %690 = vmatpush3.msra.mxu0 %v352_v46 }
  0x25   : > { %491 = vmatpush1.msra.mxu1 %v440_v47  ;;  %691 = vmatprep.subr.mxu0 %v726_v6 }
  0x26   : > { %492 = vmatprep.subr.mxu1 %v439_v48  ;;  %692 = vmatpush3.msra.mxu0 %v351_v49 }
  0x27   : > { %493 = vmatpush1.msra.mxu1 %v438_v50  ;;  %693 = vmatprep.subr.mxu0 %v726_v6 }
  0x28   : > { %494 = vmatprep.subr.mxu1 %v437_v51  ;;  %694 = vmatpush3.msra.mxu0 %v350_v52 }
  0x29   : > { %495 = vmatpush1.msra.mxu1 %v436_v53  ;;  %695 = vmatprep.subr.mxu0 %v726_v6 }
  0x2a   : > { %496 = vmatprep.subr.mxu1 %v435_v54  ;;  %696 = vmatpush3.msra.mxu0 %v349_v55 }
  0x2b   : > { %497 = vmatpush1.msra.mxu1 %v434_v56  ;;  %697 = vmatprep.subr.mxu0 %v726_v6 }
  0x2c   : > { %698 = vmatpush3.msra.mxu0 %v348_v57  ;;  %701 = vmatprep.mubr.msk.f32.mxu0 %vm727_vm0, %v726_v6 }
  0x2d   : > { %699 = vmatprep.subr.mxu0 %v726_v6 }
  0x2e   : > { %700 = vmatpush3.msra.mxu0 %v347_v58 }
  0x98   : > { %v335_v13 = vpop.xlane.xlu0 %334 }
  0x99   : > { %v336_v14 = vmul.f32 0.0078125, %v335_v13 }
  0x9b   : > { %v823_v15 = vsub.f32 %v333_v0, %v336_v14 }
  0x9c   : > { %v308_v16 = vpop.xlane.xlu0 %307 }
  0x9d   : > { %v310_v17 = vmul.f32 0.0078125, %v308_v16  ;;  %v338_v18 = vmul.f32 %v823_v15, %v823_v15 }
  0x9f   : > { %v827_v19 = vsub.f32 %v306_v1, %v310_v17  ;;  %339 = vadd.xlane.f32.xlu1 %v338_v18 }
  0xa1   : > { %v312_v20 = vmul.f32 %v827_v19, %v827_v19 }
  0xa3   : > { %313 = vadd.xlane.f32.xlu1 %v312_v20 }
 0x128   : > { %v340_v59 = vpop.xlane.xlu1 %339 }
 0x129   : > { %v341_v60 = vmul.f32 0.0078125, %v340_v59 }
 0x12b   : > { %v342_v61 = vadd.f32 1e-05, %v341_v60 }
 0x12c   : > { %v314_v62 = vpop.xlane.xlu1 %313 }
 0x12d   : > { %714 = vrsqrt.f32 %v342_v61  ;;  %v315_v63 = vmul.f32 0.0078125, %v314_v62 }
 0x12f   : > { %v316_v0 = vadd.f32 1e-05, %v315_v63 }
 0x131   : > { %716 = vrsqrt.f32 %v316_v0 }
 0x13a   : > { %v715_v1 = vpop.eup %714 }
 0x13b   : > { %v344_v3 = vmul.f32 %v715_v1, %v823_v15 }
 0x13d   : > { %v345_v5 = vmul.f32 %v647_v2, %v344_v3 }
 0x13e   : > { %v717_v6 = vpop.eup %716 }
 0x13f   : > { %v346_v7 = vadd.f32 %v648_v4, %v345_v5  ;;  %v318_v8 = vmul.f32 %v717_v6, %v827_v19 }
 0x141   : > { %531 = vmatmul.mubr.f32.vlgmr.msra.gmra.mxu1 %v346_v7  ;;  %v325_v9 = vmul.f32 %v647_v2, %v318_v8 }
 0x143   : > { %v332_v10 = vadd.f32 %v648_v4, %v325_v9 }
 0x145   : > { %702 = vmatmul.mubr.f32.vlgmr.msra.gmra.mxu0 %v332_v10 }
 0x201   : > { %v532_v11 = vpop.f32.mrf.mxu1 }
 0x202   : > { %537 = vst [vmem:[%s303_s13] sm:$0xff] %v532_v11 }
 0x203   : > { %v534_v12 = vpop.f32.mrf.mxu1 }
 0x204   : > { %538 = vst [vmem:[%s303_s13 + $0x8] sm:$0xff] %v534_v12 }
 0x205   : > { %v429_v13 = vpop.f32.mrf.mxu0 }
 0x206   : > { %433 = vst [vmem:[%s298_s16] sm:$0xff] %v429_v13 }
 0x207   : > { %v703_v14 = vpop.f32.mrf.mxu0 }
 0x208 PF: > { %s18_s24 = sadd.s32 1, %s724_s24  }
 0x209   : > { %p15_p4 = scmp.ge.s32.totalorder %s18_s24, 4  }
 0x20b   :  { %17 = sbr.rel (!%p15_p4) target bundleno = 1 (0x1), region = 89 }

// kernel: encoder_forward.7
= control target key start
LH: loop header
LB: loop body
LE: loop exit
PB: predicated region body
PF: predicated region fallthrough
CT: control target
= control target key end

     0   :  { %s1461_s0 = inlined_call_operand.hbm [shape: f32[16,128], index: 0, kind: input, shape index: {}]   ;;  %s1462_s1 = inlined_call_operand.hbm [shape: f32[16,128], index: 1, kind: input, shape index: {}]   ;;  %s1463_s2 = inlined_call_operand.hbm [shape: f32[1,128], index: 2, kind: input, shape index: {}]   ;;  %s1464_s3 = inlined_call_operand.hbm [shape: f32[1,128], index: 3, kind: input, shape index: {}]   ;;  %s1465_s4 = inlined_call_operand.hbm [shape: f32[128,128], index: 4, kind: input, shape index: {}]   ;;  %s1466_s5 = inlined_call_operand.hbm [shape: f32[128,256], index: 5, kind: input, shape index: {}]   ;;  %s1467_s6 = inlined_call_operand.vmem [shape: f32[16,128], index: 6, kind: output, shape index: {0}]   ;;  %s1468_s7 = inlined_call_operand.vmem [shape: f32[16,256], index: 7, kind: output, shape index: {1}]  }
   0x1   :  { %1472 = sst [smem:[#allocation17_spill]] %s1463_s2 }
   0x2   :  { %13 = vsyncpa [#allocation3], 0 }
   0x3   :  { %15 = vsyncpa [#allocation3 + $0x1], 0 }
   0x4   :  { %16 = vsyncpa [#allocation5], 0 }
   0x5   :  { %18 = vsyncpa [#allocation5 + $0x1], 0 }
   0x6   :  { %19 = vsyncpa [#allocation8], 0 }
   0x7   :  { %20 = vsyncpa [#allocation11], 0  ;;  %s1229_s24 = smov 0   ;;  %s1231_s25 = smov 0  }
   0x8   :  { %s1233_s26 = smov 0   ;;  %s1235_s27 = smov 0  }
   0x9 LB: > { %s1177_s28 = smov [#allocation6]   ;;  %s1250_s30 = sadd.s32 4294967295, %s1175_s27   ;;  %s1175_s27 = sphi %s1235_s27, %s1490_s27   ;;  %s1171_s26 = sphi %s1233_s26, %s1489_s26   ;;  %s1167_s25 = sphi %s1231_s25, %s1488_s25   ;;  %s1163_s24 = sphi %s1229_s24, %s1487_s24  }
   0xa   : > { %s232_s29 = sshll.u32 %s1177_s28, 4  ;;  %p793_p0 = scmp.ge.s32.totalorder %s1175_s27, 1  ;;  %s233_s29 = int_to_ptr.vmem [resolvable:$true] %s232_s29 }
   0xb   : > { %p1469_p1 = scmp.eq.s32.totalorder %s1250_s30, 0  ;;  %p219_p2 = scmp.lt.s32.totalorder %s1175_s27, 3 }
   0xc   : > { %s1178_s9 = smov [#allocation7]   ;;  %s1179_s11 = smov [#allocation9]  }
   0xd   : > { %p1255_p3 = pnand %p793_p0, %p219_p2  ;;  %s243_s10 = sshll.u32 %s1178_s9, 4  ;;  %s244_s10 = int_to_ptr.vmem [resolvable:$true] %s243_s10 }
   0xe   : > { %s253_s12 = sshll.u32 %s1179_s11, 4  ;;  %s976_s14 = scalar_lea.vmem %s233_s29, 16  ;;  %s1267_s12 = int_to_ptr.vmem [resolvable:$true] %s253_s12 }
   0xf   : > { %s1473_s8 = scalar_select %p1255_p3, 1, 0 }
  0x10   : > { %p890_p4 = pneg %p1255_p3  ;;  %p977_p7 = scmp.ne.s32.totalorder %s233_s29, %s976_s14 }
  0x11   : > { %s983_s15 = scalar_lea.vmem %s233_s29, 32  ;;  %p984_p10 = scmp.lt.s32.totalorder %s233_s29, %s233_s29 }
  0x12   : > { %p1263_p5 = pnand %p890_p4, %p1469_p1  ;;  %p985_p11 = scmp.lt.s32.totalorder %s983_s15, %s976_s14 }
  0x14   : > { %p967_p6 = pneg %p1263_p5  ;;  %p986_p12 = por %p985_p11, %p984_p10 }
  0x16   : > { %p979_p8 = pnand %p977_p7, %p967_p6 }
  0x18   : > { %p980_p9 = pneg %p979_p8 }
  0x1a   : > { %p987_p13 = pnand %p986_p12, %p980_p9 }
  0x1c   : > { %990 = shalt.err (!%p987_p13)
}
  0x1d   : > { %s1475_s2 = sld [smem:[#allocation17_spill]]  ;;  %s1002_s18 = scalar_lea.vmem %s244_s10, 16 }
  0x1e   : > { %p1003_p0 = scmp.ne.s32.totalorder %s244_s10, %s1002_s18  ;;  %s1009_s19 = scalar_lea.vmem %s244_s10, 32 }
  0x1f   : > { %p1010_p7 = scmp.lt.s32.totalorder %s244_s10, %s244_s10  ;;  %p1011_p8 = scmp.lt.s32.totalorder %s1009_s19, %s1002_s18 }
  0x20   : > { %p1005_p2 = pnand %p1003_p0, %p967_p6 }
  0x21   : > { %p1012_p1 = por %p1011_p8, %p1010_p7 }
  0x22   : > { %p1006_p4 = pneg %p1005_p2 }
  0x23   : > { %893 = dma.hbm_to_vmem [thread:$0]  (!%p1263_p5), %s1475_s2, 16, %s233_s29, [#allocation5]  }
  0x24   : > { %p1013_p10 = pnand %p1012_p1, %p1006_p4 }
  0x26   : > { %1016 = shalt.err (!%p1013_p10)
}
  0x27   : > { %896 = dma.hbm_to_vmem [thread:$0]  (!%p1263_p5), %s1464_s3, 16, %s244_s10, [#allocation8]  }
  0x28   : > { %s1028_s22 = scalar_lea.vmem %s1267_s12, 2048  ;;  %p1036_p13 = scmp.lt.s32.totalorder %s1267_s12, %s1267_s12 }
  0x29   : > { %p1029_p9 = scmp.ne.s32.totalorder %s1267_s12, %s1028_s22  ;;  %p1037_p1 = scmp.lt.s32.totalorder %s1028_s22, %s1028_s22 }
  0x2b   : > { %p1031_p11 = pnand %p1029_p9, %p967_p6  ;;  %p1038_p0 = por %p1037_p1, %p1036_p13 }
  0x2d   : > { %p1032_p12 = pneg %p1031_p11 }
  0x2f   : > { %p1039_p2 = pnand %p1038_p0, %p1032_p12 }
  0x31   : > { %1042 = shalt.err (!%p1039_p2)
}
  0x32   : > { %s1180_s23 = smov 128   ;;  %s1181_s28 = smov 8  }
  0x33   : > { %899 = dma.hbm_to_vmem [thread:$0]  (!%p1263_p5), %s1465_s4, 2048, %s1267_s12, [#allocation8], %s1180_s23, %s1180_s23, %s1181_s28  }
  0x34   : > { %s1182_s10 = smov [#allocation10]  }
  0x35   : > { %s266_s11 = sshll.u32 %s1182_s10, 4  ;;  %s267_s11 = int_to_ptr.vmem [resolvable:$true] %s266_s11 }
  0x36   : > { %s1054_s14 = scalar_lea.vmem %s267_s11, 4096  ;;  %p1062_p10 = scmp.lt.s32.totalorder %s267_s11, %s267_s11 }
  0x37   : > { %p1055_p4 = scmp.ne.s32.totalorder %s267_s11, %s1054_s14  ;;  %p1063_p9 = scmp.lt.s32.totalorder %s1054_s14, %s1054_s14 }
  0x39   : > { %p1057_p7 = pnand %p1055_p4, %p967_p6  ;;  %p1064_p11 = por %p1063_p9, %p1062_p10 }
  0x3b   : > { %p1058_p8 = pneg %p1057_p7 }
  0x3d   : > { %p1065_p12 = pnand %p1064_p11, %p1058_p8 }
  0x3f   : > { %1068 = shalt.err (!%p1065_p12)
}
  0x40   : > { %s1183_s15 = smov 256   ;;  %s1184_s12 = smov 16  }
  0x41   : > { %902 = dma.hbm_to_vmem [thread:$0]  (!%p1263_p5), %s1466_s5, 4096, %s267_s11, [#allocation11], %s1183_s15, %s1183_s15, %s1184_s12  }
  0x42   : > { %s1309_s18 = sadd.s32 1, %s1175_s27   ;;  %s33_s19 = sadd.s32 1, %s1171_s26 }
  0x43   : > { %s30_s20 = ssub.s32 %s1175_s27, %s1309_s18  ;;  %p40_p6 = scmp.ne.s32.totalorder %s1171_s26, %s1167_s25 }
  0x44   : > { %p31_p13 = scmp.eq.s32.totalorder %s30_s20, 0  ;;  %p41_p1 = scmp.eq.s32.totalorder %s1175_s27, 0 }
  0x45   : > { %p46_p0 = scmp.ne.s32.totalorder %s1167_s25, %s1163_s24  ;;  %p914_p2 = scmp.lt.s32.totalorder %s1175_s27, 2 }
  0x46   : > { %s1321_s21 = scalar_select %p31_p13, %s1171_s26, %s33_s19  }
  0x47   : > { %p42_p4 = por %p41_p1, %p40_p6  ;;  %p1476_p7 = scmp.eq.s32.totalorder %s1250_s30, 0 }
  0x48   : > { %s280_s22 = sand.u32 1, %s1171_s26   ;;  %s800_s23 = sshll.u32 %s1175_s27, 7 }
  0x49   : > { %p1325_p8 = por %p1476_p7, %p46_p0  ;;  %s1331_s28 = sshll.u32 %s280_s22, 3 }
  0x4a   : > { %s1336_s10 = scalar_lea.hbm %s1461_s0, %s800_s23  ;;  %s284_s24 = scalar_lea.vmem [#allocation2], %s1331_s28 }
  0x4b   : > { %s1477_s13 = scalar_select %p1325_p8, 1, 0 }
  0x4c   : > { %s291_s11 = sshll.u32 %s284_s24, 4  ;;  %p1339_p5 = pnand %p914_p2, %p42_p4  ;;  %s292_s11 = int_to_ptr.vmem [resolvable:$true] %s291_s11 }
  0x4d   : > { %s1346_s16 = scalar_lea.hbm %s1462_s1, %s800_s23  ;;  %s281_s17 = scalar_lea.sflag [#allocation3], %s280_s22 }
  0x4e   : > { %s1069_s19 = scalar_lea.hbm %s1336_s10, 128  ;;  %p1071_p9 = pneg %p1339_p5 }
  0x4f   : > { %p1070_p10 = scmp.ne.s32.totalorder %s1336_s10, %s1069_s19  ;;  %s1074_s9 = scalar_lea.hbm %s1461_s0, 256 }
  0x50   : > { %p1075_p6 = scmp.lt.s32.totalorder %s1336_s10, %s1461_s0  ;;  %p1076_p13 = scmp.lt.s32.totalorder %s1074_s9, %s1069_s19 }
  0x51   : > { %p1072_p11 = pnand %p1071_p9, %p1070_p10 }
  0x52   : > { %p1077_p1 = por %p1076_p13, %p1075_p6 }
  0x53   : > { %p1073_p12 = pneg %p1072_p11 }
  0x55   : > { %p1078_p0 = pnand %p1077_p1, %p1073_p12 }
  0x57   : > { %1081 = shalt.err (!%p1078_p0)
}
  0x58   : > { %s1082_s22 = scalar_lea.vmem %s292_s11, 128  ;;  %s1185_s23 = smov [#allocation2]  }
  0x59   : > { %p1083_p2 = scmp.ne.s32.totalorder %s292_s11, %s1082_s22  ;;  %s1087_s15 = sshll.u32 %s1185_s23, 4  ;;  %s1088_s15 = int_to_ptr.vmem [resolvable:$false] %s1087_s15 }
  0x5a   : > { %s1089_s12 = scalar_lea.vmem %s1088_s15, 256  ;;  %p1090_p10 = scmp.lt.s32.totalorder %s292_s11, %s1088_s15 }
  0x5b   : > { %p1085_p4 = pnand %p1083_p2, %p1071_p9  ;;  %p1091_p11 = scmp.lt.s32.totalorder %s1089_s12, %s1082_s22 }
  0x5d   : > { %p1086_p7 = pneg %p1085_p4  ;;  %p1092_p8 = por %p1091_p11, %p1090_p10 }
  0x5f   : > { %p1093_p3 = pnand %p1092_p8, %p1086_p7 }
  0x61   : > { %1096 = shalt.err (!%p1093_p3)
}
  0x62   : > { %906 = dma.hbm_to_vmem [thread:$0]  (!%p1339_p5), %s1336_s10, 128, %s292_s11, %s281_s17  }
  0x63   : > { %s298_s2 = sand.u32 1, %s1175_s27   ;;  %s302_s19 = scalar_lea.vmem [#allocation4], %s1331_s28 }
  0x64   : > { %s309_s20 = sshll.u32 %s302_s19, 4  ;;  %s299_s29 = scalar_lea.sflag [#allocation5], %s298_s2  ;;  %s310_s20 = int_to_ptr.vmem [resolvable:$true] %s309_s20 }
  0x65   : > { %s1097_s9 = scalar_lea.hbm %s1346_s16, 128  ;;  %s1102_s23 = scalar_lea.hbm %s1462_s1, 256 }
  0x66   : > { %p1098_p12 = scmp.ne.s32.totalorder %s1346_s16, %s1097_s9  ;;  %p1103_p6 = scmp.lt.s32.totalorder %s1346_s16, %s1462_s1 }
  0x67   : > { %p1104_p13 = scmp.lt.s32.totalorder %s1102_s23, %s1097_s9 }
  0x68   : > { %p1100_p3 = pnand %p1098_p12, %p1071_p9 }
  0x69   : > { %p1105_p1 = por %p1104_p13, %p1103_p6 }
  0x6a   : > { %p1101_p8 = pneg %p1100_p3 }
  0x6c   : > { %p1106_p0 = pnand %p1105_p1, %p1101_p8 }
  0x6e   : > { %1109 = shalt.err (!%p1106_p0)
}
  0x6f   : > { %s1110_s27 = scalar_lea.vmem %s310_s20, 128  ;;  %s1186_s28 = smov [#allocation4]  }
  0x70   : > { %p1111_p2 = scmp.ne.s32.totalorder %s310_s20, %s1110_s27  ;;  %s1115_s10 = sshll.u32 %s1186_s28, 4  ;;  %s1116_s10 = int_to_ptr.vmem [resolvable:$false] %s1115_s10 }
  0x71   : > { %s1117_s11 = scalar_lea.vmem %s1116_s10, 256  ;;  %p1118_p10 = scmp.lt.s32.totalorder %s310_s20, %s1116_s10 }
  0x72   : > { %p1113_p4 = pnand %p1111_p2, %p1071_p9  ;;  %p1119_p11 = scmp.lt.s32.totalorder %s1117_s11, %s1110_s27 }
  0x74   : > { %p1114_p7 = pneg %p1113_p4  ;;  %p1120_p12 = por %p1119_p11, %p1118_p10 }
  0x76   : > { %p1121_p3 = pnand %p1120_p12, %p1114_p7 }
  0x78   : > { %1124 = shalt.err (!%p1121_p3)
}
  0x79   : > { %909 = dma.hbm_to_vmem [thread:$0]  (!%p1339_p5), %s1346_s16, 128, %s310_s20, %s299_s29  }
  0x7a   : > { %p1479_p8 = scmp.ne.s32.totalorder %s1473_s8, 0 }
  0x7b   : > { %s320_s17 = sand.u32 (!%p1479_p8), 1, %s1167_s25   ;;  %p1480_p9 = scmp.ne.s32.totalorder (!%p1479_p8), %s1477_s13, 0 }
  0x7c   : > { %318 = sbr.rel (%p1479_p8) target bundleno = 649 (0x289), region = 44  ;;  %s804_s2 = sshll.u32 (!%p1479_p8), %s320_s17, 3 }
  0x7d   : > { %s321_s19 = scalar_lea.sflag (!%p1479_p8), [#allocation3], %s320_s17  ;;  %s324_s9 = scalar_lea.vmem (!%p1479_p8), [#allocation2], %s804_s2 }
  0x81   : > { %1142 = dma.done.wait (%p1480_p9), %s321_s19, 128  }
  0x82   : > { %1144 = vsyncadd (%p1480_p9), %s321_s19, 4294967168  ;;  %s329_s24 = sand.u32 1, %s1250_s30   ;;  %s333_s22 = scalar_lea.vmem [#allocation4], %s804_s2 }
  0x83   : > { %s330_s14 = scalar_lea.sflag [#allocation5], %s329_s24 }
  0x84   : > { %1146 = dma.done.wait (%p1480_p9), %s330_s14, 128  }
  0x85   : > { %1148 = vsyncadd (%p1480_p9), %s330_s14, 4294967168  ;;  %p1481_p5 = scmp.eq.s32.totalorder %s1250_s30, 0 }
  0x87   : > { %1150 = dma.done.wait (%p1481_p5), [#allocation5], 16   ;;  %p1482_p6 = pmov %p1481_p5 }
  0x88   : > { %p1483_p13 = pmov %p1481_p5 }
  0x89   : > { %1152 = vsyncadd (%p1482_p6), [#allocation5], 4294967280 }
  0x8a   : > { %1154 = dma.done.wait (%p1483_p13), [#allocation8], 2064   ;;  %p1484_p1 = pmov %p1481_p5 }
  0x8c   : > { %1156 = vsyncadd (%p1484_p1), [#allocation8], 4294965232  ;;  %p1485_p0 = pmov %p1484_p1 }
  0x8e   : > { %1158 = dma.done.wait (%p1485_p0), [#allocation11], 4096   ;;  %p1486_p2 = pmov %p1485_p0 }
  0x8f   : > { %v427_v0 = vld [vmem:[%s333_s22] sm:$0xff]  ;;  %v400_v1 = vld [vmem:[%s324_s9] sm:$0xff]  ;;  %v1187_v6 = vmov 0.0   ;;  %vm1188_vm0 = vmmov 0   ;;  %p389_p4 = scmp.lt.s32.totalorder %s1250_s30, 1 }
  0x90   : > { %1160 = vsyncadd (%p1486_p2), [#allocation11], 4294963200  ;;  %428 = vadd.xlane.f32.xlu0 %v427_v0  ;;  %v559_v2 = vld [vmem:[#allocation10 + $0xf8] sm:$0xff]  ;;  %v558_v3 = vld [vmem:[#allocation10 + $0xf0] sm:$0xff]  ;;  %835 = vmatprep.subr.mxu0 %v1187_v6 }
  0x91   : > { %v557_v4 = vld [vmem:[#allocation10 + $0xe8] sm:$0xff]  ;;  %560 = vmatprep.subr.mxu1 %v559_v2  ;;  %v556_v5 = vld [vmem:[#allocation10 + $0xe0] sm:$0xff]  ;;  %v456_v7 = vld [vmem:[#allocation9 + $0x78] sm:$0xff]  ;;  %624 = vmatprep.mubr.f32.mxu1 %v1187_v6  ;;  %s1492_s30 = smov (!%p389_p4, %s1250_s30), 1 }
  0x92   : > { %561 = vmatpush1.msra.mxu1 %v558_v3  ;;  %v555_v8 = vld [vmem:[#allocation10 + $0xd8] sm:$0xff]  ;;  %836 = vmatpush3.msra.mxu0 %v456_v7  ;;  %v455_v9 = vld [vmem:[#allocation9 + $0x70] sm:$0xff]  ;;  %v553_v11 = vld [vmem:[#allocation10 + $0xc8] sm:$0xff]  ;;  %s817_s8 = sshll.u32 %s1492_s30, 4  ;;  %s810_s29 = sshll.u32 %s1492_s30, 3 }
  0x93   : > { %562 = vmatprep.subr.mxu1 %v557_v4  ;;  %v554_v10 = vld [vmem:[#allocation10 + $0xd0] sm:$0xff]  ;;  %837 = vmatprep.subr.mxu0 %v1187_v6  ;;  %v552_v12 = vld [vmem:[#allocation10 + $0xc0] sm:$0xff]  ;;  %v551_v21 = vld [vmem:[#allocation10 + $0xb8] sm:$0xff]  ;;  %s397_s20 = scalar_lea.vmem %s1468_s7, %s817_s8  ;;  %s392_s12 = scalar_lea.vmem %s1467_s6, %s810_s29 }
  0x94   : > { %401 = vadd.xlane.f32.xlu0 %v400_v1  ;;  %563 = vmatpush1.msra.mxu1 %v556_v5  ;;  %v454_v22 = vld [vmem:[#allocation9 + $0x68] sm:$0xff]  ;;  %v550_v23 = vld [vmem:[#allocation10 + $0xb0] sm:$0xff]  ;;  %v453_v25 = vld [vmem:[#allocation9 + $0x60] sm:$0xff] }
  0x95   : > { %838 = vmatpush3.msra.mxu0 %v455_v9  ;;  %564 = vmatprep.subr.mxu1 %v555_v8  ;;  %v549_v24 = vld [vmem:[#allocation10 + $0xa8] sm:$0xff]  ;;  %v548_v26 = vld [vmem:[#allocation10 + $0xa0] sm:$0xff]  ;;  %v547_v27 = vld [vmem:[#allocation10 + $0x98] sm:$0xff] }
  0x96   : > { %839 = vmatprep.subr.mxu0 %v1187_v6  ;;  %565 = vmatpush1.msra.mxu1 %v554_v10  ;;  %v452_v28 = vld [vmem:[#allocation9 + $0x58] sm:$0xff]  ;;  %v546_v29 = vld [vmem:[#allocation10 + $0x90] sm:$0xff]  ;;  %v545_v30 = vld [vmem:[#allocation10 + $0x88] sm:$0xff] }
  0x97   : > { %566 = vmatprep.subr.mxu1 %v553_v11  ;;  %840 = vmatpush3.msra.mxu0 %v454_v22  ;;  %v451_v31 = vld [vmem:[#allocation9 + $0x50] sm:$0xff]  ;;  %v544_v32 = vld [vmem:[#allocation10 + $0x80] sm:$0xff]  ;;  %v543_v33 = vld [vmem:[#allocation10 + $0x78] sm:$0xff] }
  0x98   : > { %567 = vmatpush1.msra.mxu1 %v552_v12  ;;  %841 = vmatprep.subr.mxu0 %v1187_v6  ;;  %v450_v34 = vld [vmem:[#allocation9 + $0x48] sm:$0xff]  ;;  %v542_v35 = vld [vmem:[#allocation10 + $0x70] sm:$0xff]  ;;  %v449_v37 = vld [vmem:[#allocation9 + $0x40] sm:$0xff] }
  0x99   : > { %568 = vmatprep.subr.mxu1 %v551_v21  ;;  %842 = vmatpush3.msra.mxu0 %v453_v25  ;;  %v541_v36 = vld [vmem:[#allocation10 + $0x68] sm:$0xff]  ;;  %v540_v38 = vld [vmem:[#allocation10 + $0x60] sm:$0xff]  ;;  %v539_v39 = vld [vmem:[#allocation10 + $0x58] sm:$0xff] }
  0x9a   : > { %569 = vmatpush1.msra.mxu1 %v550_v23  ;;  %843 = vmatprep.subr.mxu0 %v1187_v6  ;;  %v448_v40 = vld [vmem:[#allocation9 + $0x38] sm:$0xff]  ;;  %v538_v41 = vld [vmem:[#allocation10 + $0x50] sm:$0xff]  ;;  %v537_v42 = vld [vmem:[#allocation10 + $0x48] sm:$0xff] }
  0x9b   : > { %570 = vmatprep.subr.mxu1 %v549_v24  ;;  %844 = vmatpush3.msra.mxu0 %v452_v28  ;;  %v447_v43 = vld [vmem:[#allocation9 + $0x30] sm:$0xff]  ;;  %v536_v44 = vld [vmem:[#allocation10 + $0x40] sm:$0xff]  ;;  %v535_v45 = vld [vmem:[#allocation10 + $0x38] sm:$0xff] }
  0x9c   : > { %571 = vmatpush1.msra.mxu1 %v548_v26  ;;  %845 = vmatprep.subr.mxu0 %v1187_v6  ;;  %v446_v46 = vld [vmem:[#allocation9 + $0x28] sm:$0xff]  ;;  %v534_v47 = vld [vmem:[#allocation10 + $0x30] sm:$0xff]  ;;  %v445_v49 = vld [vmem:[#allocation9 + $0x20] sm:$0xff] }
  0x9d   : > { %572 = vmatprep.subr.mxu1 %v547_v27  ;;  %846 = vmatpush3.msra.mxu0 %v451_v31  ;;  %v533_v48 = vld [vmem:[#allocation10 + $0x28] sm:$0xff]  ;;  %v532_v50 = vld [vmem:[#allocation10 + $0x20] sm:$0xff]  ;;  %v531_v51 = vld [vmem:[#allocation10 + $0x18] sm:$0xff] }
  0x9e   : > { %573 = vmatpush1.msra.mxu1 %v546_v29  ;;  %847 = vmatprep.subr.mxu0 %v1187_v6  ;;  %v444_v52 = vld [vmem:[#allocation9 + $0x18] sm:$0xff]  ;;  %v530_v53 = vld [vmem:[#allocation10 + $0x10] sm:$0xff]  ;;  %v529_v54 = vld [vmem:[#allocation10 + $0x8] sm:$0xff] }
  0x9f   : > { %574 = vmatprep.subr.mxu1 %v545_v30  ;;  %848 = vmatpush3.msra.mxu0 %v450_v34  ;;  %v443_v55 = vld [vmem:[#allocation9 + $0x10] sm:$0xff]  ;;  %v528_v56 = vld [vmem:[#allocation10] sm:$0xff]  ;;  %v442_v57 = vld [vmem:[#allocation9 + $0x8] sm:$0xff] }
  0xa0   : > { %575 = vmatpush1.msra.mxu1 %v544_v32  ;;  %849 = vmatprep.subr.mxu0 %v1187_v6  ;;  %v441_v58 = vld [vmem:[#allocation9] sm:$0xff]  ;;  %v813_v2 = vld [vmem:[#allocation6] ss:$0 sm:$0xff]  ;;  %v814_v4 = vld [vmem:[#allocation7] ss:$0 sm:$0xff] }
  0xa1   : > { %576 = vmatprep.subr.mxu1 %v543_v33  ;;  %850 = vmatpush3.msra.mxu0 %v449_v37 }
  0xa2   : > { %577 = vmatpush1.msra.mxu1 %v542_v35  ;;  %851 = vmatprep.subr.mxu0 %v1187_v6 }
  0xa3   : > { %578 = vmatprep.subr.mxu1 %v541_v36  ;;  %852 = vmatpush3.msra.mxu0 %v448_v40 }
  0xa4   : > { %579 = vmatpush1.msra.mxu1 %v540_v38  ;;  %853 = vmatprep.subr.mxu0 %v1187_v6 }
  0xa5   : > { %580 = vmatprep.subr.mxu1 %v539_v39  ;;  %854 = vmatpush3.msra.mxu0 %v447_v43 }
  0xa6   : > { %581 = vmatpush1.msra.mxu1 %v538_v41  ;;  %855 = vmatprep.subr.mxu0 %v1187_v6 }
  0xa7   : > { %582 = vmatprep.subr.mxu1 %v537_v42  ;;  %856 = vmatpush3.msra.mxu0 %v446_v46 }
  0xa8   : > { %583 = vmatpush1.msra.mxu1 %v536_v44  ;;  %857 = vmatprep.subr.mxu0 %v1187_v6 }
  0xa9   : > { %584 = vmatprep.subr.mxu1 %v535_v45  ;;  %858 = vmatpush3.msra.mxu0 %v445_v49 }
  0xaa   : > { %585 = vmatpush1.msra.mxu1 %v534_v47  ;;  %859 = vmatprep.subr.mxu0 %v1187_v6 }
  0xab   : > { %586 = vmatprep.subr.mxu1 %v533_v48  ;;  %860 = vmatpush3.msra.mxu0 %v444_v52 }
  0xac   : > { %587 = vmatpush1.msra.mxu1 %v532_v50  ;;  %861 = vmatprep.subr.mxu0 %v1187_v6 }
  0xad   : > { %588 = vmatprep.subr.mxu1 %v531_v51  ;;  %862 = vmatpush3.msra.mxu0 %v443_v55 }
  0xae   : > { %589 = vmatpush1.msra.mxu1 %v530_v53  ;;  %863 = vmatprep.subr.mxu0 %v1187_v6 }
  0xaf   : > { %590 = vmatprep.subr.mxu1 %v529_v54  ;;  %864 = vmatpush3.msra.mxu0 %v442_v57 }
  0xb0   : > { %591 = vmatpush1.msra.mxu1 %v528_v56  ;;  %867 = vmatprep.mubr.msk.f32.mxu0 %vm1188_vm0, %v1187_v6 }
  0xb1   : > { %865 = vmatprep.subr.mxu0 %v1187_v6 }
  0xb2   : > { %866 = vmatpush3.msra.mxu0 %v441_v58 }
 0x119   : > { %v429_v13 = vpop.xlane.xlu0 %428 }
 0x11a   : > { %v430_v14 = vmul.f32 0.0078125, %v429_v13 }
 0x11c   : > { %v1416_v15 = vsub.f32 %v427_v0, %v430_v14 }
 0x11d   : > { %v402_v16 = vpop.xlane.xlu0 %401 }
 0x11e   : > { %v404_v17 = vmul.f32 0.0078125, %v402_v16  ;;  %v432_v18 = vmul.f32 %v1416_v15, %v1416_v15 }
 0x120   : > { %v1420_v19 = vsub.f32 %v400_v1, %v404_v17  ;;  %433 = vadd.xlane.f32.xlu1 %v432_v18 }
 0x122   : > { %v406_v20 = vmul.f32 %v1420_v19, %v1420_v19 }
 0x124   : > { %407 = vadd.xlane.f32.xlu1 %v406_v20 }
 0x1a9   : > { %v434_v59 = vpop.xlane.xlu1 %433 }
 0x1aa   : > { %v435_v60 = vmul.f32 0.0078125, %v434_v59 }
 0x1ac   : > { %v436_v61 = vadd.f32 1e-05, %v435_v60 }
 0x1ad   : > { %v408_v62 = vpop.xlane.xlu1 %407 }
 0x1ae   : > { %961 = vrsqrt.f32 %v436_v61  ;;  %v409_v63 = vmul.f32 0.0078125, %v408_v62 }
 0x1b0   : > { %v410_v0 = vadd.f32 1e-05, %v409_v63 }
 0x1b2   : > { %963 = vrsqrt.f32 %v410_v0 }
 0x1bb   : > { %v962_v1 = vpop.eup %961 }
 0x1bc   : > { %v438_v3 = vmul.f32 %v962_v1, %v1416_v15 }
 0x1be   : > { %v439_v5 = vmul.f32 %v813_v2, %v438_v3 }
 0x1bf   : > { %v964_v7 = vpop.eup %963 }
 0x1c0   : > { %v440_v8 = vadd.f32 %v814_v4, %v439_v5  ;;  %v412_v6 = vmul.f32 %v964_v7, %v1420_v19 }
 0x1c2   : > { %625 = vmatmul.mubr.f32.vlgmr.msra.gmra.mxu1 %v440_v8  ;;  %v419_v9 = vmul.f32 %v813_v2, %v412_v6 }
 0x1c4   : > { %v426_v10 = vadd.f32 %v814_v4, %v419_v9 }
 0x1c6   : > { %868 = vmatmul.mubr.f32.vlgmr.msra.gmra.mxu0 %v426_v10 }
 0x282   : > { %v626_v11 = vpop.f32.mrf.mxu1 }
 0x283   : > { %631 = vst [vmem:[%s397_s20] sm:$0xff] %v626_v11 }
 0x284   : > { %v628_v12 = vpop.f32.mrf.mxu1 }
 0x285   : > { %632 = vst [vmem:[%s397_s20 + $0x8] sm:$0xff] %v628_v12 }
 0x286   : > { %v523_v13 = vpop.f32.mrf.mxu0 }
 0x287   : > { %527 = vst [vmem:[%s392_s12] sm:$0xff] %v523_v13 }
 0x288   : > { %v869_v14 = vpop.f32.mrf.mxu0 }
 0x289 PF: > { %p23_p7 = scmp.ge.s32.totalorder %s1309_s18, 4   ;;  %s1487_s24 = smov %s1167_s25 }
 0x28a   : > { %s1488_s25 = smov %s1171_s26  ;;  %s1489_s26 = smov %s1321_s21 }
 0x28b   : > { %s1490_s27 = smov %s1309_s18  ;;  %25 = sbr.rel (!%p23_p7) target bundleno = 9 (0x9), region = 125 }
 0x290   :  { %668 = vsyncpa [#allocation3], 1 }
 0x291   :  { %670 = vsyncpa [#allocation3 + $0x1], 1 }
 0x292   :  { %671 = vsyncpa [#allocation5], 1 }
 0x293   :  { %673 = vsyncpa [#allocation5 + $0x1], 1 }
 0x294   :  { %674 = vsyncpa [#allocation8], 1 }
 0x295   :  { %675 = vsyncpa [#allocation11], 1 }

// kernel: encoder_forward.8
= control target key start
LH: loop header
LB: loop body
LE: loop exit
PB: predicated region body
PF: predicated region fallthrough
CT: control target
= control target key end

     0   :  { %s1041_s9 = smov 0   ;;  %s1133_s0 = inlined_call_operand.vmem [shape: f32[16,128], index: 0, kind: input, shape index: {}]   ;;  %s1134_s1 = inlined_call_operand.vmem [shape: f32[16,256], index: 1, kind: input, shape index: {}]   ;;  %s1135_s2 = inlined_call_operand.vmem [shape: f32[16,128], index: 2, kind: output, shape index: {}]  }
   0x1 LB: > { %s904_s10 = sadd.s32 4294967295, %s1019_s9   ;;  %p908_p0 = scmp.ge.s32.totalorder %s1019_s9, 1  ;;  %s1019_s9 = sphi %s1041_s9, %s12_s9  }
   0x2   : > { %p121_p1 = scmp.lt.s32.totalorder %s1019_s9, 3 }
   0x4   : > { %p122_p2 = pnand %p908_p0, %p121_p1 }
   0x5   : > { %p146_p3 = scmp.lt.s32.totalorder (!%p122_p2), %s904_s10, 1  ;;  %s1023_s19 = smov (!%p122_p2), 96  }
   0x6   : > { %125 = sbr.rel (%p122_p2) target bundleno = 1087 (0x43f), region = 28  ;;  %s1024_s20 = smov (!%p122_p2), 64  }
   0x7   : > { %s1025_s21 = smov (!%p122_p2), 32  }
   0xb   : > { %v1021_v0 = vmov 0.0   ;;  %vm1022_vm0 = vmmov 0   ;;  %s1137_s10 = smov (!%p146_p3, %s904_s10), 1  ;;  %vm163_vm1 = vcmask 261120   ;;  %vm240_vm2 = vcmask 64512  }
   0xc   : > { %944 = vmatprep.subr.mxu0 %v1021_v0  ;;  %946 = vmatprep.mubr.msk.f32.mxu0 %vm1022_vm0, %v1021_v0  ;;  %s909_s11 = sshll.u32 %s1137_s10, 3  ;;  %s927_s12 = sshll.u32 %s1137_s10, 4  ;;  %vm834_vm3 = vcmask 523264   ;;  %vm836_vm4 = vcmask 785408  }
   0xd   : > { %949 = vmatprep.subr.mxu1 %v1021_v0  ;;  %951 = vmatprep.mubr.msk.f32.mxu1 %vm1022_vm0, %v1021_v0  ;;  %s154_s15 = scalar_lea.vmem %s1134_s1, %s927_s12  ;;  %s149_s18 = scalar_lea.vmem %s1133_s0, %s909_s11 }
   0xe   : > { %v161_v1 = vld [vmem:[%s154_s15] sm:$0xff]  ;;  %v162_v7 = vld [vmem:[%s154_s15 + $0x8] sm:$0xff]  ;;  %s158_s24 = scalar_lea.vmem %s1135_s2, %s909_s11 }
   0xf   : > { %v159_v2 = vld [vmem:[%s149_s18] sm:$0xff]  ;;  %945 = vmatpush3.xpose.msk.msra.mxu0 %vm163_vm1, %v161_v1  ;;  %950 = vmatpush3.msra.mxu1 %v162_v7 }
  0x10   : > { %v160_v3 = vmul.f32 0.17677669, %v159_v2  ;;  %959 = vmatprep.subr.mxu0 %v1021_v0  ;;  %954 = vmatprep.subr.mxu1 %v1021_v0 }
  0x12   : > { %947 = vmatmul.mubr.msk.f32.vlgmr.msra.gmra.mxu0 %vm163_vm1, %v160_v3  ;;  %325 = vrot.lane.b32.xlu1 %v160_v3, %s1023_s19 }
  0x13   : > { %961 = vmatprep.mubr.msk.f32.mxu0 %vm1022_vm0, %v1021_v0 }
  0x16   : > { %493 = vrot.lane.b32.xlu1 %v161_v1, %s1024_s20 }
  0x1a   : > { %491 = vrot.lane.b32.xlu1 %v160_v3, %s1024_s20 }
  0x1e   : > { %658 = vrot.lane.b32.xlu1 %v161_v1, %s1025_s21 }
  0x22   : > { %656 = vrot.lane.b32.xlu1 %v160_v3, %s1025_s21 }
  0x84   : > { %v326_v11 = vpop.permute.xlu1 %325 }
  0x88   : > { %v494_v12 = vpop.permute.xlu1 %493 }
  0x8c   : > { %v492_v15 = vpop.permute.xlu1 %491 }
  0x90   : > { %v659_v16 = vpop.permute.xlu1 %658 }
  0x94   : > { %v657_v17 = vpop.permute.xlu1 %656 }
  0xd2   : > { %v236_v4 = vpop.f32.mrf.mxu0 }
  0xd3   : > { %v241_v5 = vsel %vm240_vm2, %v236_v4, -inf }
  0xd4   : > { %242 = vmax.xlane.f32.xlu0 %v241_v5  ;;  %v948_v6 = vpop.f32.mrf.mxu0 }
  0xea   : > { %327 = vrot.lane.b32.xlu0 %v161_v1, %s1023_s19 }
 0x15d   : > { %v243_v8 = vpop.xlane.xlu0 %242 }
 0x15e   : > { %v244_v9 = vsub.f32 %v236_v4, %v243_v8 }
 0x160   : > { %v245_v10 = vmul.f32 1.442695, %v244_v9 }
 0x161   : > { %v328_v13 = vpop.permute.xlu0 %327 }
 0x162   : > { %997 = vpow2.f32 %v245_v10 }
 0x16f   : > { %v1080_v14 = vpop.eup %997 }
 0x170   : > { %952 = vmatmul.mubr.msk.f32.vlgmr.msra.gmra.mxu1 %vm240_vm2, %v1080_v14  ;;  %v247_v47 = vsel %vm240_vm2, %v1080_v14, 0.0 }
 0x171   : > { %955 = vmatpush3.xpose.msk.msra.mxu1 %vm163_vm1, %v328_v13  ;;  %956 = vmatprep.mubr.msk.f32.mxu1 %vm1022_vm0, %v1021_v0 }
 0x172   : > { %964 = vmatprep.subr.mxu1 %v1021_v0 }
 0x174   : > { %957 = vmatmul.mubr.msk.f32.vlgmr.msra.gmra.mxu1 %vm163_vm1, %v326_v11 }
 0x175   : > { %965 = vmatpush3.xpose.msk.msra.mxu1 %vm163_vm1, %v494_v12  ;;  %966 = vmatprep.mubr.msk.f32.mxu1 %vm1022_vm0, %v1021_v0 }
 0x176   : > { %974 = vmatprep.subr.mxu1 %v1021_v0 }
 0x178   : > { %967 = vmatmul.mubr.msk.f32.vlgmr.msra.gmra.mxu1 %vm163_vm1, %v492_v15 }
 0x179   : > { %975 = vmatpush3.xpose.msk.msra.mxu1 %vm163_vm1, %v659_v16  ;;  %976 = vmatprep.mubr.msk.f32.mxu1 %vm1022_vm0, %v1021_v0 }
 0x17c   : > { %977 = vmatmul.mubr.msk.f32.vlgmr.msra.gmra.mxu1 %vm163_vm1, %v657_v17 }
 0x230   : > { %v1098_v18 = vpop.f32.mrf.mxu1 }
 0x232   : > { %v953_v19 = vpop.f32.mrf.mxu1 }
 0x234   : > { %v399_v20 = vpop.f32.mrf.mxu1 }
 0x235   : > { %v403_v21 = vsel %vm240_vm2, %v399_v20, -inf }
 0x236   : > { %404 = vmax.xlane.f32.xlu1 %v403_v21  ;;  %v958_v22 = vpop.f32.mrf.mxu1 }
 0x238   : > { %v565_v23 = vpop.f32.mrf.mxu1 }
 0x239   : > { %v569_v24 = vsel %vm240_vm2, %v565_v23, -inf }
 0x23a   : > { %570 = vmax.xlane.f32.xlu0 %v569_v24  ;;  %v968_v25 = vpop.f32.mrf.mxu1 }
 0x23c   : > { %v730_v26 = vpop.f32.mrf.mxu1 }
 0x23d   : > { %v734_v28 = vsel %vm240_vm2, %v730_v26, -inf }
 0x23e   : > { %v978_v27 = vpop.f32.mrf.mxu1 }
 0x247   : > { %578 = vrot.lane.b32.xlu1 %v162_v7, %s1024_s20 }
 0x250   : > { %413 = vrot.lane.b32.xlu0 %v162_v7, %s1023_s19 }
 0x26b   : > { %735 = vmax.xlane.f32.xlu1 %v734_v28 }
 0x27c   : > { %743 = vrot.lane.b32.xlu1 %v162_v7, %s1025_s21 }
 0x2bf   : > { %v405_v29 = vpop.xlane.xlu1 %404 }
 0x2c0   : > { %v406_v30 = vsub.f32 %v399_v20, %v405_v29 }
 0x2c2   : > { %v407_v31 = vmul.f32 1.442695, %v406_v30 }
 0x2c3   : > { %v571_v32 = vpop.xlane.xlu0 %570  ;;  %v579_v37 = vpop.permute.xlu1 %578 }
 0x2c4   : > { %999 = vpow2.f32 %v407_v31  ;;  %v572_v33 = vsub.f32 %v565_v23, %v571_v32 }
 0x2c6   : > { %v573_v34 = vmul.f32 1.442695, %v572_v33 }
 0x2c7   : > { %v414_v35 = vpop.permute.xlu0 %413 }
 0x2c8   : > { %1001 = vpow2.f32 %v573_v34  ;;  %960 = vmatpush3.msra.mxu0 %v414_v35 }
 0x2c9   : > { %969 = vmatprep.subr.mxu0 %v1021_v0 }
 0x2d1   : > { %v1000_v36 = vpop.eup %999 }
 0x2d2   : > { %962 = vmatmul.mubr.msk.f32.vlgmr.msra.gmra.mxu0 %vm240_vm2, %v1000_v36  ;;  %v409_v38 = vsel %vm240_vm2, %v1000_v36, 0.0 }
 0x2d3   : > { %970 = vmatpush3.msra.mxu0 %v579_v37  ;;  %410 = vadd.xlane.f32.xlu0 %v409_v38 }
 0x2d4   : > { %971 = vmatprep.mubr.msk.f32.mxu0 %vm1022_vm0, %v1021_v0  ;;  %979 = vmatprep.subr.mxu0 %v1021_v0 }
 0x2d5   : > { %v1002_v39 = vpop.eup %1001 }
 0x2d6   : > { %972 = vmatmul.mubr.msk.f32.vlgmr.msra.gmra.mxu0 %vm240_vm2, %v1002_v39  ;;  %v575_v40 = vsel %vm240_vm2, %v1002_v39, 0.0 }
 0x2d7   : > { %576 = vadd.xlane.f32.xlu1 %v575_v40  ;;  %981 = vmatprep.mubr.msk.f32.mxu0 %vm1022_vm0, %v1021_v0 }
 0x2f4   : > { %v736_v41 = vpop.xlane.xlu1 %735 }
 0x2f5   : > { %v737_v42 = vsub.f32 %v730_v26, %v736_v41 }
 0x2f7   : > { %v738_v43 = vmul.f32 1.442695, %v737_v42 }
 0x2f8   : > { %v744_v44 = vpop.permute.xlu1 %743 }
 0x2f9   : > { %1003 = vpow2.f32 %v738_v43  ;;  %980 = vmatpush3.msra.mxu0 %v744_v44 }
 0x306   : > { %v1004_v45 = vpop.eup %1003 }
 0x307   : > { %982 = vmatmul.mubr.msk.f32.vlgmr.msra.gmra.mxu0 %vm240_vm2, %v1004_v45  ;;  %v740_v46 = vsel %vm240_vm2, %v1004_v45, 0.0 }
 0x308   : > { %741 = vadd.xlane.f32.xlu0 %v740_v46 }
 0x30c   : > { %248 = vadd.xlane.f32.xlu0 %v247_v47 }
 0x35c   : > { %v411_v48 = vpop.xlane.xlu0 %410 }
 0x35d   : > { %1005 = vrcp.f32 %v411_v48 }
 0x360   : > { %v577_v49 = vpop.xlane.xlu1 %576 }
 0x361   : > { %1007 = vrcp.f32 %v577_v49 }
 0x36a   : > { %v1006_v50 = vpop.eup %1005 }
 0x36e   : > { %v1008_v54 = vpop.eup %1007 }
 0x391   : > { %v742_v58 = vpop.xlane.xlu0 %741 }
 0x392   : > { %v485_v51 = vpop.f32.mrf.mxu0  ;;  %1009 = vrcp.f32 %v742_v58 }
 0x393   : > { %v490_v52 = vmul.f32 %v1006_v50, %v485_v51 }
 0x394   : > { %v963_v53 = vpop.f32.mrf.mxu0 }
 0x395   : > { %822 = vrot.lane.b32.xlu1 %v490_v52, %s1025_s21  ;;  %v249_v63 = vpop.xlane.xlu0 %248 }
 0x396   : > { %v650_v55 = vpop.f32.mrf.mxu0  ;;  %1011 = vrcp.f32 %v249_v63 }
 0x397   : > { %v655_v56 = vmul.f32 %v1008_v54, %v650_v55 }
 0x398   : > { %v973_v57 = vpop.f32.mrf.mxu0 }
 0x399   : > { %826 = vrot.lane.b32.xlu0 %v655_v56, %s1024_s20 }
 0x39f   : > { %v1010_v59 = vpop.eup %1009 }
 0x3a3   : > { %v1012_v0 = vpop.eup %1011 }
 0x3a4   : > { %v324_v2 = vmul.f32 %v1012_v0, %v1098_v18 }
 0x3c7   : > { %v815_v60 = vpop.f32.mrf.mxu0 }
 0x3c8   : > { %v820_v61 = vmul.f32 %v1010_v59, %v815_v60 }
 0x3c9   : > { %v983_v62 = vpop.f32.mrf.mxu0 }
 0x3ca   : > { %830 = vrot.lane.b32.xlu1 %v820_v61, %s1023_s19 }
 0x407   : > { %v823_v1 = vpop.permute.xlu1 %822 }
 0x408   : > { %v833_v4 = vsel %vm163_vm1, %v324_v2, %v823_v1 }
 0x40b   : > { %v827_v3 = vpop.permute.xlu0 %826 }
 0x40c   : > { %v835_v5 = vsel %vm834_vm3, %v833_v4, %v827_v3 }
 0x43c   : > { %v831_v6 = vpop.permute.xlu1 %830 }
 0x43d   : > { %v837_v7 = vsel %vm836_vm4, %v835_v5, %v831_v6 }
 0x43e   : > { %838 = vst [vmem:[%s158_s24] sm:$0xff] %v837_v7 }
 0x43f PF: > { %s12_s9 = sadd.s32 1, %s1019_s9  }
 0x440   : > { %p9_p4 = scmp.ge.s32.totalorder %s12_s9, 4  }
 0x442   :  { %11 = sbr.rel (!%p9_p4) target bundleno = 1 (0x1), region = 61 }

// kernel: encoder_forward.9
= control target key start
LH: loop header
LB: loop body
LE: loop exit
PB: predicated region body
PF: predicated region fallthrough
CT: control target
= control target key end

     0   :  { %15 = vsyncpa [#allocation3], 0  ;;  %s1054_s13 = smov 0   ;;  %s1270_s0 = inlined_call_operand.vmem [shape: f32[16,128], index: 0, kind: input, shape index: {}]   ;;  %s1271_s1 = inlined_call_operand.vmem [shape: f32[16,128], index: 1, kind: input, shape index: {}]   ;;  %s1272_s2 = inlined_call_operand.vmem [shape: f32[1,128], index: 2, kind: input, shape index: {}]   ;;  %s1273_s3 = inlined_call_operand.vmem [shape: f32[1,128], index: 3, kind: input, shape index: {}]   ;;  %s1274_s4 = inlined_call_operand.vmem [shape: f32[128,128], index: 4, kind: input, shape index: {}]   ;;  %s1275_s5 = inlined_call_operand.vmem [shape: f32[1,128], index: 5, kind: input, shape index: {}]   ;;  %s1276_s6 = inlined_call_operand.vmem [shape: f32[128,256], index: 6, kind: input, shape index: {}]   ;;  %s1277_s7 = inlined_call_operand.vmem [shape: f32[1,256], index: 7, kind: input, shape index: {}]   ;;  %s1278_s8 = inlined_call_operand.hbm [shape: f32[256,128], index: 8, kind: input, shape index: {}]   ;;  %s1279_s9 = inlined_call_operand.vmem [shape: f32[1,128], index: 9, kind: input, shape index: {}]   ;;  %s1280_s10 = inlined_call_operand.vmem [shape: f32[16,128], index: 10, kind: output, shape index: {}]  }
   0x1 LB: > { %s1060_s14 = sadd.s32 4294967295, %s992_s13   ;;  %p826_p0 = scmp.ge.s32.totalorder %s992_s13, 1  ;;  %s992_s13 = sphi %s1054_s13, %s21_s13  }
   0x2   : > { %p272_p1 = scmp.lt.s32.totalorder %s992_s13, 3  ;;  %s994_s15 = smov [#allocation2]  }
   0x3   : > { %s302_s16 = sshll.u32 %s994_s15, 4  ;;  %p935_p3 = scmp.eq.s32.totalorder %s1060_s14, 0  ;;  %s303_s16 = int_to_ptr.vmem [resolvable:$true] %s302_s16 }
   0x4   : > { %p1064_p2 = pnand %p826_p0, %p272_p1  ;;  %s967_s18 = scalar_lea.vmem %s303_s16, 4096 }
   0x5   : > { %p968_p7 = scmp.ne.s32.totalorder %s303_s16, %s967_s18  ;;  %p975_p10 = scmp.lt.s32.totalorder %s303_s16, %s303_s16 }
   0x6   : > { %p931_p4 = pneg %p1064_p2  ;;  %p976_p11 = scmp.lt.s32.totalorder %s967_s18, %s967_s18 }
   0x8   : > { %p932_p5 = pnand %p935_p3, %p931_p4  ;;  %p977_p12 = por %p976_p11, %p975_p10 }
   0xa   : > { %p958_p6 = pneg %p932_p5 }
   0xc   : > { %p970_p8 = pnand %p968_p7, %p958_p6 }
   0xe   : > { %p971_p9 = pneg %p970_p8 }
  0x10   : > { %p978_p13 = pnand %p977_p12, %p971_p9 }
  0x12   : > { %981 = shalt.err (!%p978_p13)
}
  0x13   : > { %s995_s19 = smov 128   ;;  %s996_s20 = smov 8  }
  0x14   : > { %934 = dma.hbm_to_vmem [thread:$0]  (!%p932_p5), %s1278_s8, 4096, %s303_s16, [#allocation3], %s995_s19, %s995_s19, %s996_s20  }
  0x15   : > { %335 = sbr.rel (%p1064_p2) target bundleno = 983 (0x3d7), region = 60 }
  0x1a   : > { %987 = dma.done.wait (%p935_p3), [#allocation3], 4096  }
  0x1b   : > { %989 = vsyncadd (%p935_p3), [#allocation3], 4294963200  ;;  %v997_v0 = vmov 0.0   ;;  %vm998_vm0 = vmmov 0   ;;  %v404_v1 = vld [vmem:[%s1274_s4 + $0x78] sm:$0xff]  ;;  %v403_v2 = vld [vmem:[%s1274_s4 + $0x70] sm:$0xff] }
  0x1c   : > { %892 = vmatprep.subr.mxu0 %v997_v0  ;;  %924 = vmatprep.mubr.msk.f32.mxu0 %vm998_vm0, %v997_v0  ;;  %v402_v3 = vld [vmem:[%s1274_s4 + $0x68] sm:$0xff]  ;;  %v401_v4 = vld [vmem:[%s1274_s4 + $0x60] sm:$0xff]  ;;  %v400_v5 = vld [vmem:[%s1274_s4 + $0x58] sm:$0xff]  ;;  %p375_p0 = scmp.lt.s32.totalorder %s1060_s14, 1 }
  0x1d   : > { %619 = vmatprep.mubr.f32.mxu1 %v997_v0  ;;  %893 = vmatpush3.msra.mxu0 %v404_v1  ;;  %v399_v6 = vld [vmem:[%s1274_s4 + $0x50] sm:$0xff]  ;;  %v398_v7 = vld [vmem:[%s1274_s4 + $0x48] sm:$0xff]  ;;  %v397_v8 = vld [vmem:[%s1274_s4 + $0x40] sm:$0xff] }
  0x1e   : > { %894 = vmatprep.subr.mxu0 %v997_v0  ;;  %v396_v9 = vld [vmem:[%s1274_s4 + $0x38] sm:$0xff]  ;;  %v395_v10 = vld [vmem:[%s1274_s4 + $0x30] sm:$0xff]  ;;  %v394_v11 = vld [vmem:[%s1274_s4 + $0x28] sm:$0xff]  ;;  %s1283_s14 = smov (!%p375_p0, %s1060_s14), 1 }
  0x1f   : > { %895 = vmatpush3.msra.mxu0 %v403_v2  ;;  %v393_v12 = vld [vmem:[%s1274_s4 + $0x20] sm:$0xff]  ;;  %v392_v13 = vld [vmem:[%s1274_s4 + $0x18] sm:$0xff]  ;;  %s1123_s11 = sshll.u32 %s1283_s14, 3  ;;  %v391_v14 = vld [vmem:[%s1274_s4 + $0x10] sm:$0xff] }
  0x20   : > { %896 = vmatprep.subr.mxu0 %v997_v0  ;;  %v390_v15 = vld [vmem:[%s1274_s4 + $0x8] sm:$0xff]  ;;  %s382_s20 = scalar_lea.vmem %s1271_s1, %s1123_s11  ;;  %v389_v16 = vld [vmem:[%s1274_s4] sm:$0xff]  ;;  %s378_s24 = scalar_lea.vmem %s1270_s0, %s1123_s11  ;;  %v542_v24 = vld [vmem:[%s1276_s6 + $0xf8] sm:$0xff] }
  0x21   : > { %897 = vmatpush3.msra.mxu0 %v402_v3  ;;  %v388_v17 = vld [vmem:[%s382_s20] sm:$0xff]  ;;  %v541_v25 = vld [vmem:[%s1276_s6 + $0xf0] sm:$0xff]  ;;  %v540_v26 = vld [vmem:[%s1276_s6 + $0xe8] sm:$0xff]  ;;  %555 = vmatprep.subr.mxu1 %v542_v24  ;;  %s386_s29 = scalar_lea.vmem %s1280_s10, %s1123_s11 }
  0x22   : > { %898 = vmatprep.subr.mxu0 %v997_v0  ;;  %v834_v18 = vld [vmem:[%s1275_s5] ss:$0 sm:$0xff]  ;;  %556 = vmatpush1.msra.mxu1 %v541_v25  ;;  %v538_v28 = vld [vmem:[%s1276_s6 + $0xd8] sm:$0xff]  ;;  %v537_v29 = vld [vmem:[%s1276_s6 + $0xd0] sm:$0xff] }
  0x23   : > { %899 = vmatpush3.msra.mxu0 %v401_v4  ;;  %v387_v19 = vld [vmem:[%s378_s24] sm:$0xff]  ;;  %557 = vmatprep.subr.mxu1 %v540_v26  ;;  %v536_v30 = vld [vmem:[%s1276_s6 + $0xc8] sm:$0xff]  ;;  %v534_v36 = vld [vmem:[%s1276_s6 + $0xb8] sm:$0xff] }
  0x24   : > { %900 = vmatprep.subr.mxu0 %v997_v0  ;;  %v539_v27 = vld [vmem:[%s1276_s6 + $0xe0] sm:$0xff]  ;;  %v533_v37 = vld [vmem:[%s1276_s6 + $0xb0] sm:$0xff]  ;;  %v532_v38 = vld [vmem:[%s1276_s6 + $0xa8] sm:$0xff] }
  0x25   : > { %901 = vmatpush3.msra.mxu0 %v400_v5  ;;  %558 = vmatpush1.msra.mxu1 %v539_v27  ;;  %v535_v31 = vld [vmem:[%s1276_s6 + $0xc0] sm:$0xff]  ;;  %v530_v40 = vld [vmem:[%s1276_s6 + $0x98] sm:$0xff]  ;;  %v529_v41 = vld [vmem:[%s1276_s6 + $0x90] sm:$0xff] }
  0x26   : > { %902 = vmatprep.subr.mxu0 %v997_v0  ;;  %559 = vmatprep.subr.mxu1 %v538_v28  ;;  %v531_v39 = vld [vmem:[%s1276_s6 + $0xa0] sm:$0xff]  ;;  %v528_v42 = vld [vmem:[%s1276_s6 + $0x88] sm:$0xff]  ;;  %v526_v44 = vld [vmem:[%s1276_s6 + $0x78] sm:$0xff] }
  0x27   : > { %903 = vmatpush3.msra.mxu0 %v399_v6  ;;  %560 = vmatpush1.msra.mxu1 %v537_v29  ;;  %v527_v43 = vld [vmem:[%s1276_s6 + $0x80] sm:$0xff]  ;;  %v525_v45 = vld [vmem:[%s1276_s6 + $0x70] sm:$0xff]  ;;  %v524_v46 = vld [vmem:[%s1276_s6 + $0x68] sm:$0xff] }
  0x28   : > { %904 = vmatprep.subr.mxu0 %v997_v0  ;;  %561 = vmatprep.subr.mxu1 %v536_v30  ;;  %v523_v47 = vld [vmem:[%s1276_s6 + $0x60] sm:$0xff]  ;;  %v522_v48 = vld [vmem:[%s1276_s6 + $0x58] sm:$0xff]  ;;  %v521_v49 = vld [vmem:[%s1276_s6 + $0x50] sm:$0xff] }
  0x29   : > { %905 = vmatpush3.msra.mxu0 %v398_v7  ;;  %562 = vmatpush1.msra.mxu1 %v535_v31  ;;  %v520_v50 = vld [vmem:[%s1276_s6 + $0x48] sm:$0xff]  ;;  %v519_v51 = vld [vmem:[%s1276_s6 + $0x40] sm:$0xff]  ;;  %v518_v52 = vld [vmem:[%s1276_s6 + $0x38] sm:$0xff] }
  0x2a   : > { %906 = vmatprep.subr.mxu0 %v997_v0  ;;  %563 = vmatprep.subr.mxu1 %v534_v36  ;;  %v517_v53 = vld [vmem:[%s1276_s6 + $0x30] sm:$0xff]  ;;  %v516_v54 = vld [vmem:[%s1276_s6 + $0x28] sm:$0xff]  ;;  %v515_v55 = vld [vmem:[%s1276_s6 + $0x20] sm:$0xff] }
  0x2b   : > { %907 = vmatpush3.msra.mxu0 %v397_v8  ;;  %564 = vmatpush1.msra.mxu1 %v533_v37  ;;  %v514_v56 = vld [vmem:[%s1276_s6 + $0x18] sm:$0xff]  ;;  %v513_v57 = vld [vmem:[%s1276_s6 + $0x10] sm:$0xff]  ;;  %v512_v58 = vld [vmem:[%s1276_s6 + $0x8] sm:$0xff] }
  0x2c   : > { %908 = vmatprep.subr.mxu0 %v997_v0  ;;  %565 = vmatprep.subr.mxu1 %v532_v38  ;;  %v511_v59 = vld [vmem:[%s1276_s6] sm:$0xff]  ;;  %v667_v60 = vld [vmem:[#allocation2 + $0xf8] sm:$0xff]  ;;  %v666_v62 = vld [vmem:[#allocation2 + $0xf0] sm:$0xff]  ;;  %v545_v38 = vlaneseq }
  0x2d   : > { %909 = vmatpush3.msra.mxu0 %v396_v9  ;;  %566 = vmatpush1.msra.mxu1 %v531_v39  ;;  %v651_v61 = vld [vmem:[#allocation2 + $0x78] sm:$0xff]  ;;  %v650_v63 = vld [vmem:[#allocation2 + $0x70] sm:$0xff]  ;;  %v649_v1 = vld [vmem:[#allocation2 + $0x68] sm:$0xff] }
  0x2e   : > { %910 = vmatprep.subr.mxu0 %v997_v0  ;;  %567 = vmatprep.subr.mxu1 %v530_v40  ;;  %v835_v6 = vld [vmem:[%s1272_s2] ss:$0 sm:$0xff]  ;;  %v658_v24 = vld [vmem:[#allocation2 + $0xb0] sm:$0xff]  ;;  %v657_v26 = vld [vmem:[#allocation2 + $0xa8] sm:$0xff]  ;;  %v546_v39 = vshrl.u32 %v545_v38, 7 }
  0x2f   : > { %911 = vmatpush3.msra.mxu0 %v395_v10  ;;  %568 = vmatpush1.msra.mxu1 %v529_v41  ;;  %v836_v8 = vld [vmem:[%s1273_s3] ss:$0 sm:$0xff]  ;;  %v642_v25 = vld [vmem:[#allocation2 + $0x30] sm:$0xff]  ;;  %v641_v27 = vld [vmem:[#allocation2 + $0x28] sm:$0xff] }
  0x30   : > { %912 = vmatprep.subr.mxu0 %v997_v0  ;;  %569 = vmatprep.subr.mxu1 %v528_v42  ;;  %v656_v28 = vld [vmem:[#allocation2 + $0xa0] sm:$0xff]  ;;  %v655_v30 = vld [vmem:[#allocation2 + $0x98] sm:$0xff]  ;;  %v547_v40 = vsub.s32 0, %v546_v39  ;;  %v551_v42 = vsub.s32 1, %v546_v39 }
  0x31   : > { %913 = vmatpush3.msra.mxu0 %v394_v11  ;;  %570 = vmatpush1.msra.mxu1 %v527_v43  ;;  %v664_v11 = vld [vmem:[#allocation2 + $0xe0] sm:$0xff]  ;;  %v639_v31 = vld [vmem:[#allocation2 + $0x18] sm:$0xff] }
  0x32   : > { %914 = vmatprep.subr.mxu0 %v997_v0  ;;  %571 = vmatprep.subr.mxu1 %v526_v44  ;;  %v640_v29 = vld [vmem:[#allocation2 + $0x20] sm:$0xff] }
  0x33   : > { %915 = vmatpush3.msra.mxu0 %v393_v12  ;;  %572 = vmatpush1.msra.mxu1 %v525_v45  ;;  %v648_v12 = vld [vmem:[#allocation2 + $0x60] sm:$0xff] }
  0x34   : > { %916 = vmatprep.subr.mxu0 %v997_v0  ;;  %573 = vmatprep.subr.mxu1 %v524_v46  ;;  %v652_v36 = vld [vmem:[#allocation2 + $0x80] sm:$0xff] }
  0x35   : > { %917 = vmatpush3.msra.mxu0 %v392_v13  ;;  %574 = vmatpush1.msra.mxu1 %v523_v47  ;;  %v663_v13 = vld [vmem:[#allocation2 + $0xd8] sm:$0xff]  ;;  %v636_v37 = vld [vmem:[#allocation2] sm:$0xff] }
  0x36   : > { %918 = vmatprep.subr.mxu0 %v997_v0  ;;  %575 = vmatprep.subr.mxu1 %v522_v48  ;;  %v543_v41 = vld [vmem:[%s1277_s7] sm:$0x3] }
  0x37   : > { %919 = vmatpush3.msra.mxu0 %v391_v14  ;;  %576 = vmatpush1.msra.mxu1 %v521_v49  ;;  %v647_v14 = vld [vmem:[#allocation2 + $0x58] sm:$0xff]  ;;  %v548_v43 = vrot.slane %v543_v41, %v547_v40  ;;  %v552_v44 = vrot.slane %v543_v41, %v551_v42 }
  0x38   : > { %920 = vmatprep.subr.mxu0 %v997_v0  ;;  %577 = vmatprep.subr.mxu1 %v520_v50 }
  0x39   : > { %921 = vmatpush3.msra.mxu0 %v390_v15  ;;  %578 = vmatpush1.msra.mxu1 %v519_v51  ;;  %v662_v15 = vld [vmem:[#allocation2 + $0xd0] sm:$0xff] }
  0x3a   : > { %922 = vmatprep.subr.mxu0 %v997_v0  ;;  %579 = vmatprep.subr.mxu1 %v518_v52  ;;  %v665_v0 = vld [vmem:[#allocation2 + $0xe8] sm:$0xff] }
  0x3b   : > { %923 = vmatpush3.msra.mxu0 %v389_v16  ;;  %580 = vmatpush1.msra.mxu1 %v517_v53  ;;  %v646_v16 = vld [vmem:[#allocation2 + $0x50] sm:$0xff] }
  0x3c   : > { %925 = vmatmul.mubr.f32.vlgmr.msra.gmra.mxu0 %v388_v17  ;;  %581 = vmatprep.subr.mxu1 %v516_v54  ;;  %v661_v17 = vld [vmem:[#allocation2 + $0xc8] sm:$0xff] }
  0x3d   : > { %582 = vmatpush1.msra.mxu1 %v515_v55  ;;  %857 = vmatprep.subr.mxu0 %v667_v60  ;;  %v837_v60 = vld [vmem:[%s1279_s9] ss:$0 sm:$0xff] }
  0x3e   : > { %583 = vmatprep.subr.mxu1 %v514_v56  ;;  %858 = vmatpush3.msra.mxu0 %v651_v61 }
  0x3f   : > { %584 = vmatpush1.msra.mxu1 %v513_v57  ;;  %859 = vmatprep.subr.mxu0 %v666_v62 }
  0x40   : > { %585 = vmatprep.subr.mxu1 %v512_v58  ;;  %860 = vmatpush3.msra.mxu0 %v650_v63 }
  0x41   : > { %586 = vmatpush1.msra.mxu1 %v511_v59  ;;  %861 = vmatprep.subr.mxu0 %v665_v0 }
  0x42   : > { %862 = vmatpush3.msra.mxu0 %v649_v1 }
  0x43   : > { %863 = vmatprep.subr.mxu0 %v664_v11 }
  0x44   : > { %864 = vmatpush3.msra.mxu0 %v648_v12 }
  0x45   : > { %865 = vmatprep.subr.mxu0 %v663_v13 }
  0x46   : > { %866 = vmatpush3.msra.mxu0 %v647_v14 }
  0x47   : > { %867 = vmatprep.subr.mxu0 %v662_v15 }
  0x48   : > { %868 = vmatpush3.msra.mxu0 %v646_v16 }
  0x49   : > { %869 = vmatprep.subr.mxu0 %v661_v17 }
  0xfc   : > { %v478_v20 = vpop.f32.mrf.mxu0 }
  0xfd   : > { %v479_v21 = vadd.f32 %v834_v18, %v478_v20  ;;  %v645_v18 = vld [vmem:[#allocation2 + $0x48] sm:$0xff]  ;;  %v644_v20 = vld [vmem:[#allocation2 + $0x40] sm:$0xff] }
  0xfe   : > { %v926_v22 = vpop.f32.mrf.mxu0  ;;  %870 = vmatpush3.msra.mxu0 %v645_v18 }
  0xff   : > { %v1145_v23 = vadd.f32 %v479_v21, %v387_v19  ;;  %v660_v19 = vld [vmem:[#allocation2 + $0xc0] sm:$0xff]  ;;  %v659_v21 = vld [vmem:[#allocation2 + $0xb8] sm:$0xff] }
 0x100   : > { %871 = vmatprep.subr.mxu0 %v660_v19  ;;  %v643_v22 = vld [vmem:[#allocation2 + $0x38] sm:$0xff] }
 0x101   : > { %485 = vadd.xlane.f32.xlu0 %v1145_v23  ;;  %872 = vmatpush3.msra.mxu0 %v644_v20 }
 0x102   : > { %873 = vmatprep.subr.mxu0 %v659_v21 }
 0x103   : > { %874 = vmatpush3.msra.mxu0 %v643_v22 }
 0x104   : > { %875 = vmatprep.subr.mxu0 %v658_v24 }
 0x105   : > { %876 = vmatpush3.msra.mxu0 %v642_v25 }
 0x106   : > { %877 = vmatprep.subr.mxu0 %v657_v26 }
 0x107   : > { %878 = vmatpush3.msra.mxu0 %v641_v27 }
 0x108   : > { %879 = vmatprep.subr.mxu0 %v656_v28 }
 0x109   : > { %880 = vmatpush3.msra.mxu0 %v640_v29 }
 0x10a   : > { %881 = vmatprep.subr.mxu0 %v655_v30 }
 0x10b   : > { %882 = vmatpush3.msra.mxu0 %v639_v31 }
 0x18a   : > { %v486_v32 = vpop.xlane.xlu0 %485 }
 0x18b   : > { %v488_v33 = vmul.f32 0.0078125, %v486_v32  ;;  %v654_v32 = vld [vmem:[#allocation2 + $0x90] sm:$0xff] }
 0x18c   : > { %883 = vmatprep.subr.mxu0 %v654_v32 }
 0x18d   : > { %v1173_v34 = vsub.f32 %v1145_v23, %v488_v33  ;;  %v638_v33 = vld [vmem:[#allocation2 + $0x10] sm:$0xff] }
 0x18e   : > { %884 = vmatpush3.msra.mxu0 %v638_v33 }
 0x18f   : > { %v490_v35 = vmul.f32 %v1173_v34, %v1173_v34 }
 0x191   : > { %491 = vadd.xlane.f32.xlu0 %v490_v35  ;;  %v637_v35 = vld [vmem:[#allocation2 + $0x8] sm:$0xff] }
 0x21a   : > { %v492_v2 = vpop.xlane.xlu0 %491 }
 0x21b   : > { %v493_v3 = vmul.f32 0.0078125, %v492_v2 }
 0x21d   : > { %v494_v4 = vadd.f32 1e-05, %v493_v3 }
 0x21f   : > { %950 = vrsqrt.f32 %v494_v4 }
 0x22c   : > { %v951_v5 = vpop.eup %950 }
 0x22d   : > { %v496_v7 = vmul.f32 %v951_v5, %v1173_v34  ;;  %v653_v34 = vld [vmem:[#allocation2 + $0x88] sm:$0xff] }
 0x22e   : > { %885 = vmatprep.subr.mxu0 %v653_v34 }
 0x22f   : > { %v503_v9 = vmul.f32 %v835_v6, %v496_v7  ;;  %886 = vmatpush3.msra.mxu0 %v637_v35 }
 0x230   : > { %887 = vmatprep.subr.mxu0 %v652_v36 }
 0x231   : > { %v510_v10 = vadd.f32 %v836_v8, %v503_v9  ;;  %888 = vmatpush3.msra.mxu0 %v636_v37 }
 0x233   : > { %620 = vmatmul.mubr.f32.vlgmr.msra.gmra.mxu1 %v510_v10 }
 0x2f3   : > { %v621_v45 = vpop.f32.mrf.mxu1 }
 0x2f4   : > { %v622_v46 = vadd.f32 %v621_v45, %v548_v43 }
 0x2f5   : > { %v623_v47 = vpop.f32.mrf.mxu1 }
 0x2f6   : > { %v628_v48 = vmul.f32 0.70710677, %v622_v46  ;;  %v624_v49 = vadd.f32 %v623_v47, %v552_v44  ;;  %v626_v56 = vmul.f32 0.5, %v622_v46 }
 0x2f8   : > { %952 = verf.f32 %v628_v48  ;;  %v629_v50 = vmul.f32 0.70710677, %v624_v49  ;;  %v627_v54 = vmul.f32 0.5, %v624_v49 }
 0x2fa   : > { %954 = verf.f32 %v629_v50 }
 0x305   : > { %v953_v51 = vpop.eup %952 }
 0x306   : > { %v632_v53 = vadd.f32 1.0, %v953_v51 }
 0x307   : > { %v955_v52 = vpop.eup %954 }
 0x308   : > { %v633_v55 = vadd.f32 1.0, %v955_v52  ;;  %v634_v58 = vmul.f32 %v632_v53, %v626_v56 }
 0x30a   : > { %v635_v57 = vmul.f32 %v633_v55, %v627_v54 }
 0x30c   : > { %739 = vmatprep.mubr.f32.mxu0 %v635_v57 }
 0x30d   : > { %740 = vmatmul.mubr.f32.vlgmr.msra.gmra.mxu0 %v634_v58 }
 0x3cd   : > { %v889_v59 = vpop.f32.mrf.mxu0 }
 0x3cf   : > { %v890_v61 = vpop.f32.mrf.mxu0 }
 0x3d0   : > { %v891_v62 = vadd.f32 %v890_v61, %v889_v59 }
 0x3d2   : > { %v742_v63 = vadd.f32 %v891_v62, %v837_v60 }
 0x3d4   : > { %v745_v0 = vadd.f32 %v742_v63, %v1145_v23 }
 0x3d6   : > { %746 = vst [vmem:[%s386_s29] sm:$0xff] %v745_v0 }
 0x3d7 PF: > { %s21_s13 = sadd.s32 1, %s992_s13  }
 0x3d8   : > { %p18_p1 = scmp.ge.s32.totalorder %s21_s13, 4  }
 0x3da   :  { %20 = sbr.rel (!%p18_p1) target bundleno = 1 (0x1), region = 98 }
 0x3df   :  { %766 = vsyncpa [#allocation3], 1 }
 0x3e0   :  { %768 = vsyncpa [#allocation3 + $0x1], 1 }

// kernel: encoder_forward.13
= control target key start
LH: loop header
LB: loop body
LE: loop exit
PB: predicated region body
PF: predicated region fallthrough
CT: control target
= control target key end

     0   :  { %8 = vsyncpa [#allocation3], 0  ;;  %s498_s0 = inlined_call_operand.vmem [shape: f32[16,128], index: 0, kind: input, shape index: {}]   ;;  %s499_s1 = inlined_call_operand.vmem [shape: f32[1,128], index: 1, kind: input, shape index: {}]   ;;  %s500_s2 = inlined_call_operand.vmem [shape: f32[1,128], index: 2, kind: input, shape index: {}]   ;;  %s501_s3 = inlined_call_operand.hbm [shape: f32[16,128], index: 3, kind: output, shape index: {}]  }
   0x1   :  { %10 = vsyncpa [#allocation3 + $0x1], 0  ;;  %s405_s12 = smov 0   ;;  %s407_s13 = smov 0  }
   0x2   :  { %s409_s14 = smov 0   ;;  %s411_s15 = smov 0  }
   0x3 LB: > { %s426_s16 = sadd.s32 4294967295, %s382_s15   ;;  %s269_s17 = sadd.s32 4294967294, %s382_s15   ;;  %s382_s15 = sphi %s411_s15, %s507_s15   ;;  %s378_s14 = sphi %s409_s14, %s506_s14   ;;  %s374_s13 = sphi %s407_s13, %s505_s13   ;;  %s370_s12 = sphi %s405_s12, %s504_s12  }
   0x4   : > { %s430_s18 = sadd.s32 1, %s382_s15   ;;  %s91_s19 = sadd.s32 1, %s378_s14 }
   0x5   : > { %s88_s20 = ssub.s32 %s382_s15, %s430_s18  ;;  %p101_p0 = scmp.ne.s32.totalorder %s378_s14, %s374_s13 }
   0x6   : > { %p89_p1 = scmp.eq.s32.totalorder %s88_s20, 0  ;;  %p102_p2 = scmp.eq.s32.totalorder %s426_s16, 1 }
   0x7   : > { %p107_p3 = scmp.ne.s32.totalorder %s374_s13, %s370_s12  ;;  %p108_p4 = scmp.eq.s32.totalorder %s269_s17, 1 }
   0x8   : > { %s441_s21 = scalar_select %p89_p1, %s378_s14, %s91_s19  }
   0x9   : > { %p443_p5 = por %p102_p2, %p101_p0  ;;  %p447_p6 = por %p108_p4, %p107_p3 }
   0xa   : > { %p272_p7 = scmp.ge.s32.totalorder %s382_s15, 1  ;;  %p139_p8 = scmp.lt.s32.totalorder %s382_s15, 3 }
   0xc   : > { %p140_p9 = pnand %p272_p7, %p139_p8 }
   0xd   : > { %p162_p10 = scmp.lt.s32.totalorder (!%p140_p9), %s426_s16, 1  ;;  %s159_s29 = sand.u32 (!%p140_p9), 1, %s374_s13  }
   0xe   : > { %143 = sbr.rel (%p140_p9) target bundleno = 343 (0x157), region = 32  ;;  %s273_s30 = sshll.u32 (!%p140_p9), %s159_s29, 3 }
   0xf   : > { %s278_s8 = sshll.u32 (!%p140_p9), %s426_s16, 7  ;;  %s161_s9 = scalar_lea.vmem (!%p140_p9), [#allocation2], %s273_s30 }
  0x10   : > { %s210_s10 = sshll.u32 (!%p140_p9), %s161_s9, 4  ;;  %s208_s19 = scalar_lea.hbm (!%p140_p9), %s501_s3, %s278_s8  ;;  %s211_s10 = int_to_ptr.vmem [resolvable:$true] %s210_s10 }
  0x11   : > { %s197_s20 = scalar_lea.sflag (!%p140_p9), [#allocation3], %s159_s29 }
  0x13   : > { %s163_s24 = scalar_select %p162_p10, %s426_s16, 1  ;;  %v275_v9 = vld [vmem:[%s499_s1] ss:$0 sm:$0xff] }
  0x14   : > { %v276_v11 = vld [vmem:[%s500_s2] ss:$0 sm:$0xff] }
  0x15   : > { %s274_s25 = sshll.u32 %s163_s24, 3  ;;  %s322_s24 = scalar_lea.vmem %s211_s10, 128 }
  0x16   : > { %s165_s28 = scalar_lea.vmem %s498_s0, %s274_s25  ;;  %p323_p11 = scmp.ne.s32.totalorder %s211_s10, %s322_s24 }
  0x17   : > { %v166_v0 = vld [vmem:[%s165_s28] sm:$0xff]  ;;  %s384_s25 = smov [#allocation2]  }
  0x18   : > { %169 = vadd.xlane.f32.xlu0 %v166_v0  ;;  %p324_p12 = pnand %p323_p11, %p443_p5  ;;  %s326_s26 = sshll.u32 %s384_s25, 4  ;;  %s327_s26 = int_to_ptr.vmem [resolvable:$false] %s326_s26 }
  0x19   : > { %s328_s16 = scalar_lea.vmem %s327_s26, 256  ;;  %p329_p0 = scmp.lt.s32.totalorder %s211_s10, %s327_s26 }
  0x1a   : > { %p325_p13 = pneg %p324_p12  ;;  %p330_p1 = scmp.lt.s32.totalorder %s328_s16, %s322_s24 }
  0x1c   : > { %p331_p2 = por %p330_p1, %p329_p0 }
  0x1e   : > { %p332_p3 = pnand %p331_p2, %p325_p13 }
  0xa1   : > { %v170_v1 = vpop.xlane.xlu0 %169 }
  0xa2   : > { %v172_v2 = vmul.f32 0.0078125, %v170_v1 }
  0xa4   : > { %v173_v3 = vsub.f32 %v166_v0, %v172_v2 }
  0xa6   : > { %v174_v4 = vmul.f32 %v173_v3, %v173_v3 }
  0xa8   : > { %175 = vadd.xlane.f32.xlu0 %v174_v4 }
 0x131   : > { %v176_v5 = vpop.xlane.xlu0 %175 }
 0x132   : > { %v177_v6 = vmul.f32 0.0078125, %v176_v5 }
 0x134   : > { %v178_v7 = vadd.f32 1e-05, %v177_v6 }
 0x136   : > { %320 = vrsqrt.f32 %v178_v7 }
 0x143   : > { %v321_v8 = vpop.eup %320 }
 0x144   : > { %v180_v10 = vmul.f32 %v321_v8, %v173_v3 }
 0x146   : > { %v187_v12 = vmul.f32 %v275_v9, %v180_v10 }
 0x148   : > { %v194_v13 = vadd.f32 %v276_v11, %v187_v12 }
 0x14a   : > { %195 = vst [vmem:[%s161_s9] sm:$0xff] %v194_v13 }
 0x14b   : > { %335 = shalt.err (!%p332_p3)
}
 0x14c   : > { %s336_s27 = scalar_lea.hbm %s208_s19, 128  ;;  %s340_s30 = scalar_lea.hbm %s501_s3, 256 }
 0x14d   : > { %p337_p4 = scmp.ne.s32.totalorder %s208_s19, %s336_s27  ;;  %p341_p9 = scmp.lt.s32.totalorder %s208_s19, %s501_s3 }
 0x14e   : > { %p342_p10 = scmp.lt.s32.totalorder %s340_s30, %s336_s27 }
 0x14f   : > { %p338_p7 = pnand %p337_p4, %p443_p5 }
 0x150   : > { %p343_p11 = por %p342_p10, %p341_p9 }
 0x151   : > { %p339_p8 = pneg %p338_p7 }
 0x153   : > { %p344_p12 = pnand %p343_p11, %p339_p8 }
 0x155   : > { %347 = shalt.err (!%p344_p12)
}
 0x156   : > { %281 = dma.vmem_to_hbm [thread:$0]  (%p443_p5), %s211_s10, 128, %s208_s19, %s197_s20  }
 0x157 PF: > { %p287_p13 = scmp.ge.s32.totalorder %s382_s15, 2  ;;  %s222_s6 = sand.u32 1, %s370_s12  }
 0x158   : > { %s223_s7 = scalar_lea.sflag [#allocation3], %s222_s6 }
 0x159   : > { %p284_p0 = pnand %p287_p13, %p447_p6 }
 0x15b   : > { %p285_p1 = pneg %p284_p0 }
 0x15d   : > { %365 = dma.done.wait (%p285_p1), %s223_s7, 128  }
 0x15e   : > { %367 = vsyncadd (%p285_p1), %s223_s7, 4294967168  ;;  %p13_p2 = scmp.ge.s32.totalorder %s430_s18, 4   ;;  %s504_s12 = smov %s374_s13 }
 0x15f   : > { %s505_s13 = smov %s378_s14  ;;  %s506_s14 = smov %s441_s21 }
 0x160   : > { %s507_s15 = smov %s430_s18  ;;  %15 = sbr.rel (!%p13_p2) target bundleno = 3 (0x3), region = 67 }
 0x165   :  { %228 = vsyncpa [#allocation3], 1 }
 0x166   :  { %230 = vsyncpa [#allocation3 + $0x1], 1 }

// kernel: encoder_forward.12
= control target key start
LH: loop header
LB: loop body
LE: loop exit
PB: predicated region body
PF: predicated region fallthrough
CT: control target
= control target key end

     0   :  { %s979_s13 = smov 0   ;;  %s1273_s0 = inlined_call_operand.vmem [shape: f32[16,128], index: 0, kind: input, shape index: {}]   ;;  %s1274_s1 = inlined_call_operand.vmem [shape: f32[16,128], index: 1, kind: input, shape index: {}]   ;;  %s1275_s2 = inlined_call_operand.vmem [shape: f32[1,128], index: 2, kind: input, shape index: {}]   ;;  %s1276_s3 = inlined_call_operand.vmem [shape: f32[1,128], index: 3, kind: input, shape index: {}]   ;;  %s1277_s4 = inlined_call_operand.vmem [shape: f32[128,128], index: 4, kind: input, shape index: {}]   ;;  %s1278_s5 = inlined_call_operand.vmem [shape: f32[1,128], index: 5, kind: input, shape index: {}]   ;;  %s1279_s6 = inlined_call_operand.vmem [shape: f32[128,256], index: 6, kind: input, shape index: {}]   ;;  %s1280_s7 = inlined_call_operand.vmem [shape: f32[1,256], index: 7, kind: input, shape index: {}]   ;;  %s1281_s8 = inlined_call_operand.vmem [shape: f32[256,128], index: 8, kind: input, shape index: {}]   ;;  %s1282_s9 = inlined_call_operand.vmem [shape: f32[1,128], index: 9, kind: input, shape index: {}]   ;;  %s1283_s10 = inlined_call_operand.vmem [shape: f32[16,128], index: 10, kind: output, shape index: {}]  }
   0x1 LB: > { %s797_s14 = sadd.s32 4294967295, %s920_s13   ;;  %p801_p0 = scmp.ge.s32.totalorder %s920_s13, 1  ;;  %s920_s13 = sphi %s979_s13, %s20_s13  }
   0x2   : > { %p320_p1 = scmp.lt.s32.totalorder %s920_s13, 3 }
   0x4   : > { %p321_p2 = pnand %p801_p0, %p320_p1 }
   0x5   : > { %p360_p3 = scmp.lt.s32.totalorder (!%p321_p2), %s797_s14, 1 }
   0x6   : > { %324 = sbr.rel (%p321_p2) target bundleno = 967 (0x3c7), region = 60 }
   0xb   : > { %v389_v0 = vld [vmem:[%s1277_s4 + $0x78] sm:$0xff]  ;;  %v922_v1 = vmov 0.0   ;;  %v388_v2 = vld [vmem:[%s1277_s4 + $0x70] sm:$0xff]  ;;  %vm923_vm0 = vmmov 0   ;;  %v387_v3 = vld [vmem:[%s1277_s4 + $0x68] sm:$0xff]  ;;  %s1285_s14 = smov (!%p360_p3, %s797_s14), 1 }
   0xc   : > { %863 = vmatprep.subr.mxu0 %v922_v1  ;;  %895 = vmatprep.mubr.msk.f32.mxu0 %vm923_vm0, %v922_v1  ;;  %v386_v4 = vld [vmem:[%s1277_s4 + $0x60] sm:$0xff]  ;;  %v385_v5 = vld [vmem:[%s1277_s4 + $0x58] sm:$0xff]  ;;  %v384_v6 = vld [vmem:[%s1277_s4 + $0x50] sm:$0xff]  ;;  %s1030_s23 = sshll.u32 %s1285_s14, 3 }
   0xd   : > { %864 = vmatpush3.msra.mxu0 %v389_v0  ;;  %604 = vmatprep.mubr.f32.mxu1 %v922_v1  ;;  %v383_v7 = vld [vmem:[%s1277_s4 + $0x48] sm:$0xff]  ;;  %v382_v8 = vld [vmem:[%s1277_s4 + $0x40] sm:$0xff]  ;;  %v381_v9 = vld [vmem:[%s1277_s4 + $0x38] sm:$0xff]  ;;  %s367_s30 = scalar_lea.vmem %s1274_s1, %s1030_s23  ;;  %s363_s16 = scalar_lea.vmem %s1273_s0, %s1030_s23 }
   0xe   : > { %865 = vmatprep.subr.mxu0 %v922_v1  ;;  %v380_v10 = vld [vmem:[%s1277_s4 + $0x30] sm:$0xff]  ;;  %v379_v11 = vld [vmem:[%s1277_s4 + $0x28] sm:$0xff]  ;;  %v378_v12 = vld [vmem:[%s1277_s4 + $0x20] sm:$0xff]  ;;  %s371_s11 = scalar_lea.vmem %s1283_s10, %s1030_s23 }
   0xf   : > { %866 = vmatpush3.msra.mxu0 %v388_v2  ;;  %v377_v13 = vld [vmem:[%s1277_s4 + $0x18] sm:$0xff]  ;;  %v376_v14 = vld [vmem:[%s1277_s4 + $0x10] sm:$0xff]  ;;  %v375_v15 = vld [vmem:[%s1277_s4 + $0x8] sm:$0xff] }
  0x10   : > { %867 = vmatprep.subr.mxu0 %v922_v1  ;;  %v374_v16 = vld [vmem:[%s1277_s4] sm:$0xff]  ;;  %v527_v24 = vld [vmem:[%s1279_s6 + $0xf8] sm:$0xff]  ;;  %v526_v25 = vld [vmem:[%s1279_s6 + $0xf0] sm:$0xff] }
  0x11   : > { %868 = vmatpush3.msra.mxu0 %v387_v3  ;;  %v373_v17 = vld [vmem:[%s367_s30] sm:$0xff]  ;;  %v525_v26 = vld [vmem:[%s1279_s6 + $0xe8] sm:$0xff]  ;;  %540 = vmatprep.subr.mxu1 %v527_v24  ;;  %v523_v28 = vld [vmem:[%s1279_s6 + $0xd8] sm:$0xff] }
  0x12   : > { %869 = vmatprep.subr.mxu0 %v922_v1  ;;  %v805_v18 = vld [vmem:[%s1278_s5] ss:$0 sm:$0xff]  ;;  %541 = vmatpush1.msra.mxu1 %v526_v25  ;;  %v522_v29 = vld [vmem:[%s1279_s6 + $0xd0] sm:$0xff]  ;;  %v521_v30 = vld [vmem:[%s1279_s6 + $0xc8] sm:$0xff] }
  0x13   : > { %870 = vmatpush3.msra.mxu0 %v386_v4  ;;  %v372_v19 = vld [vmem:[%s363_s16] sm:$0xff]  ;;  %542 = vmatprep.subr.mxu1 %v525_v26  ;;  %v519_v36 = vld [vmem:[%s1279_s6 + $0xb8] sm:$0xff]  ;;  %v518_v37 = vld [vmem:[%s1279_s6 + $0xb0] sm:$0xff] }
  0x14   : > { %871 = vmatprep.subr.mxu0 %v922_v1  ;;  %v524_v27 = vld [vmem:[%s1279_s6 + $0xe0] sm:$0xff]  ;;  %v517_v38 = vld [vmem:[%s1279_s6 + $0xa8] sm:$0xff]  ;;  %v515_v40 = vld [vmem:[%s1279_s6 + $0x98] sm:$0xff] }
  0x15   : > { %872 = vmatpush3.msra.mxu0 %v385_v5  ;;  %543 = vmatpush1.msra.mxu1 %v524_v27  ;;  %v520_v31 = vld [vmem:[%s1279_s6 + $0xc0] sm:$0xff]  ;;  %v514_v41 = vld [vmem:[%s1279_s6 + $0x90] sm:$0xff]  ;;  %v513_v42 = vld [vmem:[%s1279_s6 + $0x88] sm:$0xff] }
  0x16   : > { %873 = vmatprep.subr.mxu0 %v922_v1  ;;  %544 = vmatprep.subr.mxu1 %v523_v28  ;;  %v516_v39 = vld [vmem:[%s1279_s6 + $0xa0] sm:$0xff]  ;;  %v511_v44 = vld [vmem:[%s1279_s6 + $0x78] sm:$0xff]  ;;  %v510_v45 = vld [vmem:[%s1279_s6 + $0x70] sm:$0xff] }
  0x17   : > { %874 = vmatpush3.msra.mxu0 %v384_v6  ;;  %545 = vmatpush1.msra.mxu1 %v522_v29  ;;  %v512_v43 = vld [vmem:[%s1279_s6 + $0x80] sm:$0xff]  ;;  %v509_v46 = vld [vmem:[%s1279_s6 + $0x68] sm:$0xff]  ;;  %v507_v48 = vld [vmem:[%s1279_s6 + $0x58] sm:$0xff] }
  0x18   : > { %875 = vmatprep.subr.mxu0 %v922_v1  ;;  %546 = vmatprep.subr.mxu1 %v521_v30  ;;  %v508_v47 = vld [vmem:[%s1279_s6 + $0x60] sm:$0xff]  ;;  %v506_v49 = vld [vmem:[%s1279_s6 + $0x50] sm:$0xff]  ;;  %v505_v50 = vld [vmem:[%s1279_s6 + $0x48] sm:$0xff] }
  0x19   : > { %876 = vmatpush3.msra.mxu0 %v383_v7  ;;  %547 = vmatpush1.msra.mxu1 %v520_v31  ;;  %v504_v51 = vld [vmem:[%s1279_s6 + $0x40] sm:$0xff]  ;;  %v503_v52 = vld [vmem:[%s1279_s6 + $0x38] sm:$0xff]  ;;  %v502_v53 = vld [vmem:[%s1279_s6 + $0x30] sm:$0xff] }
  0x1a   : > { %877 = vmatprep.subr.mxu0 %v922_v1  ;;  %548 = vmatprep.subr.mxu1 %v519_v36  ;;  %v501_v54 = vld [vmem:[%s1279_s6 + $0x28] sm:$0xff]  ;;  %v500_v55 = vld [vmem:[%s1279_s6 + $0x20] sm:$0xff]  ;;  %v499_v56 = vld [vmem:[%s1279_s6 + $0x18] sm:$0xff] }
  0x1b   : > { %878 = vmatpush3.msra.mxu0 %v382_v8  ;;  %549 = vmatpush1.msra.mxu1 %v518_v37  ;;  %v498_v57 = vld [vmem:[%s1279_s6 + $0x10] sm:$0xff]  ;;  %v497_v58 = vld [vmem:[%s1279_s6 + $0x8] sm:$0xff]  ;;  %v496_v59 = vld [vmem:[%s1279_s6] sm:$0xff] }
  0x1c   : > { %879 = vmatprep.subr.mxu0 %v922_v1  ;;  %550 = vmatprep.subr.mxu1 %v517_v38  ;;  %v652_v60 = vld [vmem:[%s1281_s8 + $0xf8] sm:$0xff]  ;;  %v651_v62 = vld [vmem:[%s1281_s8 + $0xf0] sm:$0xff]  ;;  %v650_v0 = vld [vmem:[%s1281_s8 + $0xe8] sm:$0xff]  ;;  %v530_v38 = vlaneseq }
  0x1d   : > { %880 = vmatpush3.msra.mxu0 %v381_v9  ;;  %551 = vmatpush1.msra.mxu1 %v516_v39  ;;  %v636_v61 = vld [vmem:[%s1281_s8 + $0x78] sm:$0xff]  ;;  %v635_v63 = vld [vmem:[%s1281_s8 + $0x70] sm:$0xff]  ;;  %v806_v6 = vld [vmem:[%s1275_s2] ss:$0 sm:$0xff] }
  0x1e   : > { %881 = vmatprep.subr.mxu0 %v922_v1  ;;  %552 = vmatprep.subr.mxu1 %v515_v40  ;;  %v807_v8 = vld [vmem:[%s1276_s3] ss:$0 sm:$0xff]  ;;  %v643_v24 = vld [vmem:[%s1281_s8 + $0xb0] sm:$0xff]  ;;  %v642_v26 = vld [vmem:[%s1281_s8 + $0xa8] sm:$0xff]  ;;  %v531_v39 = vshrl.u32 %v530_v38, 7 }
  0x1f   : > { %882 = vmatpush3.msra.mxu0 %v380_v10  ;;  %553 = vmatpush1.msra.mxu1 %v514_v41  ;;  %v627_v25 = vld [vmem:[%s1281_s8 + $0x30] sm:$0xff]  ;;  %v626_v27 = vld [vmem:[%s1281_s8 + $0x28] sm:$0xff]  ;;  %v641_v28 = vld [vmem:[%s1281_s8 + $0xa0] sm:$0xff] }
  0x20   : > { %883 = vmatprep.subr.mxu0 %v922_v1  ;;  %554 = vmatprep.subr.mxu1 %v513_v42  ;;  %v625_v29 = vld [vmem:[%s1281_s8 + $0x20] sm:$0xff]  ;;  %v640_v30 = vld [vmem:[%s1281_s8 + $0x98] sm:$0xff]  ;;  %v532_v40 = vsub.s32 0, %v531_v39  ;;  %v536_v42 = vsub.s32 1, %v531_v39 }
  0x21   : > { %884 = vmatpush3.msra.mxu0 %v379_v11  ;;  %555 = vmatpush1.msra.mxu1 %v512_v43  ;;  %v649_v11 = vld [vmem:[%s1281_s8 + $0xe0] sm:$0xff]  ;;  %v624_v31 = vld [vmem:[%s1281_s8 + $0x18] sm:$0xff] }
  0x22   : > { %885 = vmatprep.subr.mxu0 %v922_v1  ;;  %556 = vmatprep.subr.mxu1 %v511_v44  ;;  %v637_v36 = vld [vmem:[%s1281_s8 + $0x80] sm:$0xff] }
  0x23   : > { %886 = vmatpush3.msra.mxu0 %v378_v12  ;;  %557 = vmatpush1.msra.mxu1 %v510_v45  ;;  %v633_v12 = vld [vmem:[%s1281_s8 + $0x60] sm:$0xff] }
  0x24   : > { %887 = vmatprep.subr.mxu0 %v922_v1  ;;  %558 = vmatprep.subr.mxu1 %v509_v46  ;;  %v621_v37 = vld [vmem:[%s1281_s8] sm:$0xff] }
  0x25   : > { %888 = vmatpush3.msra.mxu0 %v377_v13  ;;  %559 = vmatpush1.msra.mxu1 %v508_v47  ;;  %v648_v13 = vld [vmem:[%s1281_s8 + $0xd8] sm:$0xff]  ;;  %v528_v41 = vld [vmem:[%s1280_s7] sm:$0x3] }
  0x26   : > { %889 = vmatprep.subr.mxu0 %v922_v1  ;;  %560 = vmatprep.subr.mxu1 %v507_v48  ;;  %v533_v43 = vrot.slane %v528_v41, %v532_v40  ;;  %v537_v44 = vrot.slane %v528_v41, %v536_v42 }
  0x27   : > { %890 = vmatpush3.msra.mxu0 %v376_v14  ;;  %561 = vmatpush1.msra.mxu1 %v506_v49  ;;  %v632_v14 = vld [vmem:[%s1281_s8 + $0x58] sm:$0xff] }
  0x28   : > { %891 = vmatprep.subr.mxu0 %v922_v1  ;;  %562 = vmatprep.subr.mxu1 %v505_v50 }
  0x29   : > { %892 = vmatpush3.msra.mxu0 %v375_v15  ;;  %563 = vmatpush1.msra.mxu1 %v504_v51  ;;  %v647_v15 = vld [vmem:[%s1281_s8 + $0xd0] sm:$0xff] }
  0x2a   : > { %893 = vmatprep.subr.mxu0 %v922_v1  ;;  %564 = vmatprep.subr.mxu1 %v503_v52  ;;  %v634_v1 = vld [vmem:[%s1281_s8 + $0x68] sm:$0xff] }
  0x2b   : > { %894 = vmatpush3.msra.mxu0 %v374_v16  ;;  %565 = vmatpush1.msra.mxu1 %v502_v53  ;;  %v631_v16 = vld [vmem:[%s1281_s8 + $0x50] sm:$0xff] }
  0x2c   : > { %896 = vmatmul.mubr.f32.vlgmr.msra.gmra.mxu0 %v373_v17  ;;  %566 = vmatprep.subr.mxu1 %v501_v54  ;;  %v646_v17 = vld [vmem:[%s1281_s8 + $0xc8] sm:$0xff] }
  0x2d   : > { %567 = vmatpush1.msra.mxu1 %v500_v55  ;;  %828 = vmatprep.subr.mxu0 %v652_v60  ;;  %v808_v60 = vld [vmem:[%s1282_s9] ss:$0 sm:$0xff] }
  0x2e   : > { %568 = vmatprep.subr.mxu1 %v499_v56  ;;  %829 = vmatpush3.msra.mxu0 %v636_v61 }
  0x2f   : > { %569 = vmatpush1.msra.mxu1 %v498_v57  ;;  %830 = vmatprep.subr.mxu0 %v651_v62 }
  0x30   : > { %570 = vmatprep.subr.mxu1 %v497_v58  ;;  %831 = vmatpush3.msra.mxu0 %v635_v63 }
  0x31   : > { %571 = vmatpush1.msra.mxu1 %v496_v59  ;;  %832 = vmatprep.subr.mxu0 %v650_v0 }
  0x32   : > { %833 = vmatpush3.msra.mxu0 %v634_v1 }
  0x33   : > { %834 = vmatprep.subr.mxu0 %v649_v11 }
  0x34   : > { %835 = vmatpush3.msra.mxu0 %v633_v12 }
  0x35   : > { %836 = vmatprep.subr.mxu0 %v648_v13 }
  0x36   : > { %837 = vmatpush3.msra.mxu0 %v632_v14 }
  0x37   : > { %838 = vmatprep.subr.mxu0 %v647_v15 }
  0x38   : > { %839 = vmatpush3.msra.mxu0 %v631_v16 }
  0x39   : > { %840 = vmatprep.subr.mxu0 %v646_v17 }
  0xec   : > { %v463_v20 = vpop.f32.mrf.mxu0 }
  0xed   : > { %v464_v21 = vadd.f32 %v805_v18, %v463_v20  ;;  %v630_v18 = vld [vmem:[%s1281_s8 + $0x48] sm:$0xff]  ;;  %v629_v20 = vld [vmem:[%s1281_s8 + $0x40] sm:$0xff] }
  0xee   : > { %v897_v22 = vpop.f32.mrf.mxu0  ;;  %841 = vmatpush3.msra.mxu0 %v630_v18 }
  0xef   : > { %v1052_v23 = vadd.f32 %v464_v21, %v372_v19  ;;  %v645_v19 = vld [vmem:[%s1281_s8 + $0xc0] sm:$0xff]  ;;  %v644_v21 = vld [vmem:[%s1281_s8 + $0xb8] sm:$0xff] }
  0xf0   : > { %842 = vmatprep.subr.mxu0 %v645_v19  ;;  %v628_v22 = vld [vmem:[%s1281_s8 + $0x38] sm:$0xff] }
  0xf1   : > { %470 = vadd.xlane.f32.xlu0 %v1052_v23  ;;  %843 = vmatpush3.msra.mxu0 %v629_v20 }
  0xf2   : > { %844 = vmatprep.subr.mxu0 %v644_v21 }
  0xf3   : > { %845 = vmatpush3.msra.mxu0 %v628_v22 }
  0xf4   : > { %846 = vmatprep.subr.mxu0 %v643_v24 }
  0xf5   : > { %847 = vmatpush3.msra.mxu0 %v627_v25 }
  0xf6   : > { %848 = vmatprep.subr.mxu0 %v642_v26 }
  0xf7   : > { %849 = vmatpush3.msra.mxu0 %v626_v27 }
  0xf8   : > { %850 = vmatprep.subr.mxu0 %v641_v28 }
  0xf9   : > { %851 = vmatpush3.msra.mxu0 %v625_v29 }
  0xfa   : > { %852 = vmatprep.subr.mxu0 %v640_v30 }
  0xfb   : > { %853 = vmatpush3.msra.mxu0 %v624_v31 }
 0x17a   : > { %v471_v32 = vpop.xlane.xlu0 %470 }
 0x17b   : > { %v473_v33 = vmul.f32 0.0078125, %v471_v32  ;;  %v639_v32 = vld [vmem:[%s1281_s8 + $0x90] sm:$0xff] }
 0x17c   : > { %854 = vmatprep.subr.mxu0 %v639_v32 }
 0x17d   : > { %v1080_v34 = vsub.f32 %v1052_v23, %v473_v33  ;;  %v623_v33 = vld [vmem:[%s1281_s8 + $0x10] sm:$0xff] }
 0x17e   : > { %855 = vmatpush3.msra.mxu0 %v623_v33 }
 0x17f   : > { %v475_v35 = vmul.f32 %v1080_v34, %v1080_v34 }
 0x181   : > { %476 = vadd.xlane.f32.xlu0 %v475_v35  ;;  %v622_v35 = vld [vmem:[%s1281_s8 + $0x8] sm:$0xff] }
 0x20a   : > { %v477_v2 = vpop.xlane.xlu0 %476 }
 0x20b   : > { %v478_v3 = vmul.f32 0.0078125, %v477_v2 }
 0x20d   : > { %v479_v4 = vadd.f32 1e-05, %v478_v3 }
 0x20f   : > { %908 = vrsqrt.f32 %v479_v4 }
 0x21c   : > { %v909_v5 = vpop.eup %908 }
 0x21d   : > { %v481_v7 = vmul.f32 %v909_v5, %v1080_v34  ;;  %v638_v34 = vld [vmem:[%s1281_s8 + $0x88] sm:$0xff] }
 0x21e   : > { %856 = vmatprep.subr.mxu0 %v638_v34 }
 0x21f   : > { %v488_v9 = vmul.f32 %v806_v6, %v481_v7  ;;  %857 = vmatpush3.msra.mxu0 %v622_v35 }
 0x220   : > { %858 = vmatprep.subr.mxu0 %v637_v36 }
 0x221   : > { %v495_v10 = vadd.f32 %v807_v8, %v488_v9  ;;  %859 = vmatpush3.msra.mxu0 %v621_v37 }
 0x223   : > { %605 = vmatmul.mubr.f32.vlgmr.msra.gmra.mxu1 %v495_v10 }
 0x2e3   : > { %v606_v45 = vpop.f32.mrf.mxu1 }
 0x2e4   : > { %v607_v46 = vadd.f32 %v606_v45, %v533_v43 }
 0x2e5   : > { %v608_v47 = vpop.f32.mrf.mxu1 }
 0x2e6   : > { %v613_v48 = vmul.f32 0.70710677, %v607_v46  ;;  %v609_v49 = vadd.f32 %v608_v47, %v537_v44  ;;  %v611_v56 = vmul.f32 0.5, %v607_v46 }
 0x2e8   : > { %910 = verf.f32 %v613_v48  ;;  %v614_v50 = vmul.f32 0.70710677, %v609_v49  ;;  %v612_v54 = vmul.f32 0.5, %v609_v49 }
 0x2ea   : > { %912 = verf.f32 %v614_v50 }
 0x2f5   : > { %v911_v51 = vpop.eup %910 }
 0x2f6   : > { %v617_v53 = vadd.f32 1.0, %v911_v51 }
 0x2f7   : > { %v913_v52 = vpop.eup %912 }
 0x2f8   : > { %v618_v55 = vadd.f32 1.0, %v913_v52  ;;  %v619_v58 = vmul.f32 %v617_v53, %v611_v56 }
 0x2fa   : > { %v620_v57 = vmul.f32 %v618_v55, %v612_v54 }
 0x2fc   : > { %724 = vmatprep.mubr.f32.mxu0 %v620_v57 }
 0x2fd   : > { %725 = vmatmul.mubr.f32.vlgmr.msra.gmra.mxu0 %v619_v58 }
 0x3bd   : > { %v860_v59 = vpop.f32.mrf.mxu0 }
 0x3bf   : > { %v861_v61 = vpop.f32.mrf.mxu0 }
 0x3c0   : > { %v862_v62 = vadd.f32 %v861_v61, %v860_v59 }
 0x3c2   : > { %v727_v63 = vadd.f32 %v862_v62, %v808_v60 }
 0x3c4   : > { %v730_v0 = vadd.f32 %v727_v63, %v1052_v23 }
 0x3c6   : > { %731 = vst [vmem:[%s371_s11] sm:$0xff] %v730_v0 }
 0x3c7 PF: > { %s20_s13 = sadd.s32 1, %s920_s13  }
 0x3c8   : > { %p17_p4 = scmp.ge.s32.totalorder %s20_s13, 4  }
 0x3ca   :  { %19 = sbr.rel (!%p17_p4) target bundleno = 1 (0x1), region = 93 }

</bundles_post_ra>
